<compile_context>
chip_gen: v5e
topology: v5e:2x2
jax: 0.10.0
libtpu: 0.0.40
codegen_flags: <defaults>
</compile_context>

<pallas_src>
import functools
import numpy as np

import jax
import jax.numpy as jnp
from jax.experimental import pallas as pl
from jax.experimental.pallas import tpu as pltpu


# ----------------------------- Pallas kernels ------------------------------


def backbone_kernel(x_ref, w_ref, b_ref, o_ref, acc_ref):
    """Tiled Linear(C*H*W -> F) + bias + ReLU; grid = (M/tm, N/tn, K/tk)."""
    k = pl.program_id(2)

    @pl.when(k == 0)
    def _():
        acc_ref[...] = jnp.zeros_like(acc_ref)

    acc_ref[...] += jnp.dot(x_ref[...], w_ref[...],
                            preferred_element_type=jnp.float32)

    @pl.when(k == pl.num_programs(2) - 1)
    def _():
        o_ref[...] = jnp.maximum(acc_ref[...] + b_ref[...], 0.0)


def lstm_kernel(x_ref, w_ref, b_ref, xlast_ref, hlast_ref):
    """Whole (short) LSTM recurrence in a single invocation.

    x_ref:     (n_seq, seq*F) f32  backbone features, timesteps packed in lanes
    w_ref:     (F+H, 4H)      bf16 stacked [W_ih; W_hh] (PyTorch i,f,g,o order)
    b_ref:     (1, 4H)        f32  b_ih + b_hh
    xlast_ref: (n_seq, F)     f32  backbone features at t = seq-1
    hlast_ref: (n_seq, H)     f32  LSTM output at t = seq-1
    """
    F = xlast_ref.shape[-1]
    H = hlast_ref.shape[-1]
    n = x_ref.shape[0]
    seq = x_ref.shape[-1] // F

    w = w_ref[...]
    bias = b_ref[...]
    h = jnp.zeros((n, H), jnp.float32)
    c = jnp.zeros((n, H), jnp.float32)

    # seq is small & static: unroll so the scheduler sees the full recurrence.
    for t in range(seq):
        x_t = x_ref[:, t * F:(t + 1) * F]                        # (n, F) f32
        xh = jnp.concatenate([x_t, h], axis=-1).astype(jnp.bfloat16)
        gates = jnp.dot(xh, w, preferred_element_type=jnp.float32) + bias
        i_g = jax.nn.sigmoid(gates[:, 0 * H:1 * H])
        f_g = jax.nn.sigmoid(gates[:, 1 * H:2 * H])
        g_g = jnp.tanh(gates[:, 2 * H:3 * H])
        o_g = jax.nn.sigmoid(gates[:, 3 * H:4 * H])
        c = f_g * c + i_g * g_g
        h = o_g * jnp.tanh(c)

    xlast_ref[...] = x_ref[:, (seq - 1) * F:seq * F]
    hlast_ref[...] = h


def head_kernel(x1_ref, h_ref, g_ref, w1_ref, b1_ref, gamma_ref, beta_ref,
                mean_ref, var_ref, w2_ref, b2_ref, o_ref):
    """Person max-pool + adaptive max-pool + Linear/BN(eval)/ReLU/Linear.

    x1_ref: (b, bb, F)   backbone features at last timestep
    h_ref:  (b, bb, H)   LSTM output at last timestep
    g_ref:  (wmax, F+H, F) one-hot gather matrices encoding the adaptive bins
    o_ref:  (b, C_pad)   lane-padded logits (sliced to num_classes outside)
    """
    p1 = jnp.max(x1_ref[...], axis=1)                            # (b, F)
    p2 = jnp.max(h_ref[...], axis=1)                             # (b, H)
    pooled_bb = jnp.concatenate([p1, p2], axis=-1)               # (b, F+H)

    # AdaptiveMaxPool (F+H -> F): each bin has <= wmax elements; gather each
    # candidate with an exact one-hot matmul and take the elementwise max.
    pooled = jnp.dot(pooled_bb, g_ref[0], preferred_element_type=jnp.float32)
    for k in range(1, g_ref.shape[0]):
        pooled = jnp.maximum(
            pooled,
            jnp.dot(pooled_bb, g_ref[k], preferred_element_type=jnp.float32))

    y = jnp.dot(pooled, w1_ref[...], preferred_element_type=jnp.float32) + b1_ref[...]
    eps = 1e-5
    y = (y - mean_ref[...]) * jax.lax.rsqrt(var_ref[...] + eps) * gamma_ref[...] + beta_ref[...]
    y = jnp.maximum(y, 0.0)            # ReLU; Dropout(eval) is identity
    o_ref[...] = jnp.dot(y, w2_ref[...], preferred_element_type=jnp.float32) + b2_ref[...]


# ------------------------------- glue / wrapper -----------------------------


def _full_spec(shape):
    nd = len(shape)
    return pl.BlockSpec(shape, lambda i, _n=nd: (0,) * _n)


def _pick_tile(dim, pref, align):
    """Largest multiple of `align` that divides `dim` and is <= pref, else dim."""
    if dim <= pref:
        return dim
    best = None
    for cand in range(align, min(pref, dim) + 1, align):
        if dim % cand == 0:
            best = cand
    return best if best is not None else dim


def adaptive_pool_gather_mats(fin, fout):
    """One-hot gather matrices for PyTorch adaptive max-pool bins.

    Bin j = [floor(j*fin/fout), ceil((j+1)*fin/fout)).  Returns g of shape
    (wmax, fin, fout) such that max_k (x @ g[k]) == adaptive_max_pool(x).
    """
    starts = [(j * fin) // fout for j in range(fout)]
    ends = [-(-((j + 1) * fin) // fout) for j in range(fout)]
    wmax = max(e - s for s, e in zip(starts, ends))
    g = np.zeros((wmax, fin, fout), np.float32)
    for j in range(fout):
        for k in range(wmax):
            g[k, min(starts[j] + k, ends[j] - 1), j] = 1.0
    return jnp.asarray(g)


def init_params(key, c, h, w, F, H, Dh, num_classes, c_pad):
    din = c * h * w
    ks = jax.random.split(key, 10)
    p = {}
    # ResNet-50 stand-in (frozen backbone); weights stored bf16 for the MXU.
    p["w_feat"] = (jax.random.normal(ks[0], (din, F), jnp.float32) * 0.05).astype(jnp.bfloat16)
    p["b_feat"] = jnp.zeros((1, F), jnp.float32)
    # LSTM (frozen). PyTorch weights are (4H, in); stored stacked+transposed as
    # [W_ih; W_hh] : (F+H, 4H) so each step is a single fused gate matmul.
    w_ih = jax.random.normal(ks[1], (F, 4 * H), jnp.float32) * 0.1
    w_hh = jax.random.normal(ks[2], (H, 4 * H), jnp.float32) * 0.1
    p["w_lstm"] = jnp.concatenate([w_ih, w_hh], axis=0).astype(jnp.bfloat16)
    # NOTE: when loading real PyTorch weights this must be (b_ih + b_hh).
    p["b_lstm"] = jax.random.normal(ks[3], (1, 4 * H), jnp.float32) * 0.05
    # fc head: Linear(F,Dh) -> BN(Dh) -> ReLU -> Dropout -> Linear(Dh, num_classes)
    p["w1"] = jax.random.normal(ks[4], (F, Dh), jnp.float32) * 0.05
    p["b1"] = jax.random.normal(ks[5], (1, Dh), jnp.float32) * 0.05
    p["bn_gamma"] = 1.0 + jax.random.normal(ks[6], (1, Dh), jnp.float32) * 0.1
    p["bn_beta"] = jax.random.normal(ks[7], (1, Dh), jnp.float32) * 0.1
    p["bn_mean"] = jax.random.normal(ks[8], (1, Dh), jnp.float32) * 0.1
    p["bn_var"] = 1.0 + jnp.abs(jax.random.normal(ks[9], (1, Dh), jnp.float32)) * 0.1
    # Final linear padded to a 128-lane output; extra columns are zero and
    # sliced away outside the kernel.
    w2 = jax.random.normal(jax.random.fold_in(key, 77), (Dh, num_classes), jnp.float32) * 0.05
    b2 = jax.random.normal(jax.random.fold_in(key, 78), (1, num_classes), jnp.float32) * 0.05
    p["w2"] = jnp.zeros((Dh, c_pad), jnp.float32).at[:, :num_classes].set(w2)
    p["b2"] = jnp.zeros((1, c_pad), jnp.float32).at[:, :num_classes].set(b2)
    return p


@functools.partial(jax.jit, static_argnames=("F", "H", "Dh", "num_classes"))
def group_activity_classifier(x, params, *, F, H, Dh, num_classes):
    b, bb, seq, c, h, w = x.shape
    n_total = b * bb * seq
    n_seq = b * bb
    din = c * h * w
    c_pad = params["w2"].shape[-1]

    # ---- backbone stand-in: tiled (n_total, din) @ (din, F) + bias + ReLU ----
    xf = x.reshape(n_total, din).astype(jnp.bfloat16)
    tm = _pick_tile(n_total, 256, 16)
    tn = _pick_tile(F, 256, 128)
    tk = _pick_tile(din, 512, 128)
    grid = (n_total // tm, F // tn, din // tk)
    cost = pl.CostEstimate(
        flops=2 * n_total * din * F,
        transcendentals=0,
        bytes_accessed=n_total * din * 2 + din * F * 2 + n_total * F * 4 + F * 4)
    x1 = pl.pallas_call(
        backbone_kernel,
        grid=grid,
        in_specs=[pl.BlockSpec((tm, tk), lambda i, j, k: (i, k)),
                  pl.BlockSpec((tk, tn), lambda i, j, k: (k, j)),
                  pl.BlockSpec((1, tn), lambda i, j, k: (0, j))],
        out_specs=pl.BlockSpec((tm, tn), lambda i, j, k: (i, j)),
        out_shape=jax.ShapeDtypeStruct((n_total, F), jnp.float32),
        scratch_shapes=[pltpu.VMEM((tm, tn), jnp.float32)],
        compiler_params=pltpu.CompilerParams(
            dimension_semantics=("parallel", "parallel", "arbitrary"),
            vmem_limit_bytes=48 * 1024 * 1024),
        cost_estimate=cost,
    )(xf, params["w_feat"], params["b_feat"])

    # ---- LSTM over seq: one call, fused gate matmul, last timestep only ----
    x1_rows = x1.reshape(n_seq, seq * F)   # contiguous view: no transpose/copy
    x1_last, h_last = pl.pallas_call(
        lstm_kernel,
        grid=(1,),
        in_specs=[_full_spec((n_seq, seq * F)),
                  _full_spec((F + H, 4 * H)),
                  _full_spec((1, 4 * H))],
        out_specs=[_full_spec((n_seq, F)),
                   _full_spec((n_seq, H))],
        out_shape=(jax.ShapeDtypeStruct((n_seq, F), jnp.float32),
                   jax.ShapeDtypeStruct((n_seq, H), jnp.float32)),
        compiler_params=pltpu.CompilerParams(
            dimension_semantics=("arbitrary",),
            vmem_limit_bytes=48 * 1024 * 1024),
    )(x1_rows, params["w_lstm"], params["b_lstm"])

    # ---- pooling + fc head (concat / last-step selection fused in-kernel) ----
    gmats = adaptive_pool_gather_mats(F + H, F)          # static (wmax, F+H, F)
    out_pad = pl.pallas_call(
        head_kernel,
        grid=(1,),
        in_specs=[_full_spec((b, bb, F)),
                  _full_spec((b, bb, H)),
                  _full_spec(tuple(gmats.shape)),
                  _full_spec((F, Dh)),
                  _full_spec((1, Dh)),
                  _full_spec((1, Dh)),
                  _full_spec((1, Dh)),
                  _full_spec((1, Dh)),
                  _full_spec((1, Dh)),
                  _full_spec((Dh, c_pad)),
                  _full_spec((1, c_pad))],
        out_specs=_full_spec((b, c_pad)),
        out_shape=jax.ShapeDtypeStruct((b, c_pad), jnp.float32),
        compiler_params=pltpu.CompilerParams(dimension_semantics=("arbitrary",)),
    )(x1_last.reshape(b, bb, F), h_last.reshape(b, bb, H), gmats,
      params["w1"], params["b1"], params["bn_gamma"], params["bn_beta"],
      params["bn_mean"], params["bn_var"], params["w2"], params["b2"])
    return out_pad[:, :num_classes]


# ------------------------------- reference ---------------------------------


def reference_forward(x, params, *, F, H, Dh, num_classes):
    """Pure-JAX (non-Pallas) reference of the same eval-mode forward pass."""
    b, bb, seq, c, h, w = x.shape
    n_total = b * bb * seq
    din = c * h * w
    xf = x.reshape(n_total, din).astype(jnp.bfloat16)
    feat = jnp.maximum(
        jnp.dot(xf, params["w_feat"], preferred_element_type=jnp.float32)
        + params["b_feat"], 0.0)
    feat_seq = feat.reshape(b * bb, seq, F)
    hs = jnp.zeros((b * bb, H), jnp.float32)
    cs = jnp.zeros((b * bb, H), jnp.float32)
    for t in range(seq):
        xh = jnp.concatenate([feat_seq[:, t, :], hs], axis=-1).astype(jnp.bfloat16)
        gates = jnp.dot(xh, params["w_lstm"],
                        preferred_element_type=jnp.float32) + params["b_lstm"]
        i_g = jax.nn.sigmoid(gates[:, 0 * H:1 * H])
        f_g = jax.nn.sigmoid(gates[:, 1 * H:2 * H])
        g_g = jnp.tanh(gates[:, 2 * H:3 * H])
        o_g = jax.nn.sigmoid(gates[:, 3 * H:4 * H])
        cs = f_g * cs + i_g * g_g
        hs = o_g * jnp.tanh(cs)
    last = jnp.concatenate([feat_seq[:, -1, :], hs], axis=-1).reshape(b, bb, F + H)
    pooled_bb = jnp.max(last, axis=1)                     # (b, F+H)
    fin, fout = F + H, F
    cols = []
    for j in range(fout):
        s = (j * fin) // fout
        e = -(-((j + 1) * fin) // fout)
        cols.append(jnp.max(pooled_bb[:, s:e], axis=-1))
    pooled = jnp.stack(cols, axis=-1)                     # (b, F)
    hp = jax.lax.Precision.HIGHEST
    y = jnp.dot(pooled, params["w1"], precision=hp) + params["b1"]
    y = (y - params["bn_mean"]) * jax.lax.rsqrt(params["bn_var"] + 1e-5) \
        * params["bn_gamma"] + params["bn_beta"]
    y = jnp.maximum(y, 0.0)
    w2 = params["w2"][:, :num_classes]
    b2 = params["b2"][:, :num_classes]
    return jnp.dot(y, w2, precision=hp) + b2


# --------------------------------- main -------------------------------------


if __name__ == "__main__":
    # Small shapes consistent with the module's forward contract.
    b, bb, seq, c, h, w = 2, 4, 4, 3, 16, 16
    F, H, Dh, num_classes = 256, 128, 128, 8   # F ~ resnet feat dim, H ~ lstm hidden
    C_PAD = 128                                # lane-padded logits width

    key = jax.random.PRNGKey(0)
    k_x, k_p = jax.random.split(key)
    x = jax.random.normal(k_x, (b, bb, seq, c, h, w), jnp.float32)
    params = init_params(k_p, c, h, w, F, H, Dh, num_classes, C_PAD)

    out = group_activity_classifier(x, params, F=F, H=H, Dh=Dh,
                                    num_classes=num_classes)
    out = jax.block_until_ready(out)
    assert out.shape == (b, num_classes), out.shape
    assert bool(jnp.all(jnp.isfinite(out)))

    ref = jax.block_until_ready(
        reference_forward(x, params, F=F, H=H, Dh=Dh, num_classes=num_classes))
    max_err = float(np.max(np.abs(np.asarray(out) - np.asarray(ref))))
    assert np.allclose(np.asarray(out), np.asarray(ref), rtol=2e-2, atol=2e-2), max_err

    print("KERNEL_OK")
</pallas_src>

<mosaic_0001>
module attributes {stable_mosaic.version = 11 : i64} {
  func.func @backbone_kernel(%arg0: i32, %arg1: i32, %arg2: i32, %arg3: memref<32x384xbf16, #tpu.memory_space<vmem>>, %arg4: memref<384x256xbf16, #tpu.memory_space<vmem>>, %arg5: memref<1x256xf32, #tpu.memory_space<vmem>>, %arg6: memref<32x256xf32, #tpu.memory_space<vmem>>, %arg7: memref<32x256xf32, #tpu.memory_space<vmem>>) attributes {dimension_semantics = [#tpu.dimension_semantics<parallel>, #tpu.dimension_semantics<parallel>, #tpu.dimension_semantics<arbitrary>], iteration_bounds = array<i64: 1, 1, 2>, scalar_prefetch = 0 : i64, scratch_operands = 1 : i64, tpu.core_type = #tpu.core_type<tc>, window_params = [{transform_indices = @transform_0, window_bounds = array<i64: 32, 384>}, {transform_indices = @transform_1, window_bounds = array<i64: 384, 256>}, {transform_indices = @transform_2, window_bounds = array<i64: 1, 256>}, {transform_indices = @transform_3, window_bounds = array<i64: 32, 256>}]} {
    %c0_i32 = arith.constant 0 : i32
    %0 = arith.cmpi eq, %arg2, %c0_i32 : i32
    %1 = arith.extui %0 : i1 to i32
    %c0_i32_0 = arith.constant 0 : i32
    %2 = arith.cmpi ne, %1, %c0_i32_0 : i32
    scf.if %2 {
      %cst_9 = arith.constant 0.000000e+00 : f32
      %12 = vector.broadcast %cst_9 : f32 to vector<32x256xf32>
      %c0_10 = arith.constant 0 : index
      %c0_11 = arith.constant 0 : index
      %13 = vector.load %arg7[%c0_10, %c0_11] : memref<32x256xf32, #tpu.memory_space<vmem>>, vector<32x256xf32>
      tpu.vector_store %arg7[%c0_10, %c0_11], %12 {strides = array<i32>} : memref<32x256xf32, #tpu.memory_space<vmem>>, vector<32x256xf32>,
    } else {
    }
    %c0 = arith.constant 0 : index
    %c0_1 = arith.constant 0 : index
    %3 = vector.load %arg7[%c0, %c0_1] : memref<32x256xf32, #tpu.memory_space<vmem>>, vector<32x256xf32>
    %c0_2 = arith.constant 0 : index
    %c0_3 = arith.constant 0 : index
    %4 = vector.load %arg3[%c0_2, %c0_3] : memref<32x384xbf16, #tpu.memory_space<vmem>>, vector<32x384xbf16>
    %c0_4 = arith.constant 0 : index
    %c0_5 = arith.constant 0 : index
    %5 = vector.load %arg4[%c0_4, %c0_5] : memref<384x256xbf16, #tpu.memory_space<vmem>>, vector<384x256xbf16>
    %cst = arith.constant dense<0.000000e+00> : vector<32x256xf32>
    %6 = tpu.matmul %4, %5, %cst {dimension_numbers = #tpu.dot_dimension_numbers<[1], [0], [0], [1], [0, 0, 1, 1], [], []>} : vector<32x384xbf16>, vector<384x256xbf16>, vector<32x256xf32> -> vector<32x256xf32>
    %7 = arith.addf %3, %6 : vector<32x256xf32>
    %c0_6 = arith.constant 0 : index
    %c0_7 = arith.constant 0 : index
    %8 = vector.load %arg7[%c0_6, %c0_7] : memref<32x256xf32, #tpu.memory_space<vmem>>, vector<32x256xf32>
    tpu.vector_store %arg7[%c0_6, %c0_7], %7 {strides = array<i32>} : memref<32x256xf32, #tpu.memory_space<vmem>>, vector<32x256xf32>,
    %c1_i32 = arith.constant 1 : i32
    %9 = arith.cmpi eq, %arg2, %c1_i32 : i32
    %10 = arith.extui %9 : i1 to i32
    %c0_i32_8 = arith.constant 0 : i32
    %11 = arith.cmpi ne, %10, %c0_i32_8 : i32
    scf.if %11 {
      %c0_9 = arith.constant 0 : index
      %c0_10 = arith.constant 0 : index
      %12 = vector.load %arg7[%c0_9, %c0_10] : memref<32x256xf32, #tpu.memory_space<vmem>>, vector<32x256xf32>
      %c0_11 = arith.constant 0 : index
      %c0_12 = arith.constant 0 : index
      %13 = vector.load %arg5[%c0_11, %c0_12] : memref<1x256xf32, #tpu.memory_space<vmem>>, vector<1x256xf32>
      %14 = vector.broadcast %13 : vector<1x256xf32> to vector<32x256xf32>
      %15 = arith.addf %12, %14 : vector<32x256xf32>
      %cst_13 = arith.constant 0.000000e+00 : f32
      %16 = vector.broadcast %cst_13 : f32 to vector<32x256xf32>
      %17 = arith.maximumf %15, %16 : vector<32x256xf32>
      %c0_14 = arith.constant 0 : index
      %c0_15 = arith.constant 0 : index
      %18 = vector.load %arg6[%c0_14, %c0_15] : memref<32x256xf32, #tpu.memory_space<vmem>>, vector<32x256xf32>
      tpu.vector_store %arg6[%c0_14, %c0_15], %17 {strides = array<i32>} : memref<32x256xf32, #tpu.memory_space<vmem>>, vector<32x256xf32>,
    } else {
    }
    return
  }
  func.func @transform_0(%arg0: i32, %arg1: i32, %arg2: i32) -> (i32, i32) {
    %c0_i32 = arith.constant 0 : i32
    return %arg0, %arg2 : i32, i32
  }
  func.func @transform_1(%arg0: i32, %arg1: i32, %arg2: i32) -> (i32, i32) {
    %c0_i32 = arith.constant 0 : i32
    return %arg2, %arg1 : i32, i32
  }
  func.func @transform_2(%arg0: i32, %arg1: i32, %arg2: i32) -> (i32, i32) {
    %c0_i32 = arith.constant 0 : i32
    %c0_i32_0 = arith.constant 0 : i32
    return %c0_i32, %arg1 : i32, i32
  }
  func.func @transform_3(%arg0: i32, %arg1: i32, %arg2: i32) -> (i32, i32) {
    %c0_i32 = arith.constant 0 : i32
    return %arg0, %arg1 : i32, i32
  }
}

module attributes {stable_mosaic.version = 11 : i64} {
  func.func @lstm_kernel(%arg0: i32, %arg1: memref<8x1024xf32, #tpu.memory_space<vmem>>, %arg2: memref<384x512xbf16, #tpu.memory_space<vmem>>, %arg3: memref<1x512xf32, #tpu.memory_space<vmem>>, %arg4: memref<8x256xf32, #tpu.memory_space<vmem>>, %arg5: memref<8x128xf32, #tpu.memory_space<vmem>>) attributes {dimension_semantics = [#tpu.dimension_semantics<arbitrary>], iteration_bounds = array<i64: 1>, scalar_prefetch = 0 : i64, scratch_operands = 0 : i64, tpu.core_type = #tpu.core_type<tc>, window_params = [{pipeline_mode = #tpu.pipeline_mode<synchronous>, transform_indices = @transform_0, window_bounds = array<i64: 8, 1024>}, {pipeline_mode = #tpu.pipeline_mode<synchronous>, transform_indices = @transform_1, window_bounds = array<i64: 384, 512>}, {pipeline_mode = #tpu.pipeline_mode<synchronous>, transform_indices = @transform_2, window_bounds = array<i64: 1, 512>}, {pipeline_mode = #tpu.pipeline_mode<synchronous>, transform_indices = @transform_3, window_bounds = array<i64: 8, 256>}, {pipeline_mode = #tpu.pipeline_mode<synchronous>, transform_indices = @transform_4, window_bounds = array<i64: 8, 128>}]} {
    %c0 = arith.constant 0 : index
    %c0_0 = arith.constant 0 : index
    %0 = vector.load %arg2[%c0, %c0_0] : memref<384x512xbf16, #tpu.memory_space<vmem>>, vector<384x512xbf16>
    %c0_1 = arith.constant 0 : index
    %c0_2 = arith.constant 0 : index
    %1 = vector.load %arg3[%c0_1, %c0_2] : memref<1x512xf32, #tpu.memory_space<vmem>>, vector<1x512xf32>
    %cst = arith.constant 0.000000e+00 : f32
    %2 = vector.broadcast %cst : f32 to vector<8x128xf32>
    %cst_3 = arith.constant 0.000000e+00 : f32
    %3 = vector.broadcast %cst_3 : f32 to vector<8x128xf32>
    %c0_4 = arith.constant 0 : index
    %c0_5 = arith.constant 0 : index
    %4 = vector.load %arg1[%c0_4, %c0_5] : memref<8x1024xf32, #tpu.memory_space<vmem>>, vector<8x256xf32>
    %5 = tpu.concatenate %4, %2 in 1 : vector<8x256xf32>, vector<8x128xf32> -> vector<8x384xf32>
    %6 = arith.truncf %5 : vector<8x384xf32> to vector<8x384xbf16>
    %cst_6 = arith.constant dense<0.000000e+00> : vector<8x512xf32>
    %7 = tpu.matmul %6, %0, %cst_6 {dimension_numbers = #tpu.dot_dimension_numbers<[1], [0], [0], [1], [0, 0, 1, 1], [], []>} : vector<8x384xbf16>, vector<384x512xbf16>, vector<8x512xf32> -> vector<8x512xf32>
    %8 = vector.broadcast %1 : vector<1x512xf32> to vector<8x512xf32>
    %9 = arith.addf %7, %8 : vector<8x512xf32>
    %10 = vector.extract_strided_slice %9 {offsets = [0, 0], sizes = [8, 128], strides = [1, 1]} : vector<8x512xf32> to vector<8x128xf32>
    %11 = arith.negf %10 : vector<8x128xf32>
    %12 = math.exp %11 : vector<8x128xf32>
    %cst_7 = arith.constant 1.000000e+00 : f32
    %13 = vector.broadcast %cst_7 : f32 to vector<8x128xf32>
    %14 = arith.addf %13, %12 : vector<8x128xf32>
    %15 = arith.divf %13, %14 : vector<8x128xf32>
    %16 = vector.extract_strided_slice %9 {offsets = [0, 128], sizes = [8, 128], strides = [1, 1]} : vector<8x512xf32> to vector<8x128xf32>
    %17 = arith.negf %16 : vector<8x128xf32>
    %18 = math.exp %17 : vector<8x128xf32>
    %cst_8 = arith.constant 1.000000e+00 : f32
    %19 = vector.broadcast %cst_8 : f32 to vector<8x128xf32>
    %20 = arith.addf %19, %18 : vector<8x128xf32>
    %21 = arith.divf %19, %20 : vector<8x128xf32>
    %22 = vector.extract_strided_slice %9 {offsets = [0, 256], sizes = [8, 128], strides = [1, 1]} : vector<8x512xf32> to vector<8x128xf32>
    %23 = math.tanh %22 : vector<8x128xf32>
    %24 = vector.extract_strided_slice %9 {offsets = [0, 384], sizes = [8, 128], strides = [1, 1]} : vector<8x512xf32> to vector<8x128xf32>
    %25 = arith.negf %24 : vector<8x128xf32>
    %26 = math.exp %25 : vector<8x128xf32>
    %cst_9 = arith.constant 1.000000e+00 : f32
    %27 = vector.broadcast %cst_9 : f32 to vector<8x128xf32>
    %28 = arith.addf %27, %26 : vector<8x128xf32>
    %29 = arith.divf %27, %28 : vector<8x128xf32>
    %30 = arith.mulf %21, %3 : vector<8x128xf32>
    %31 = arith.mulf %15, %23 : vector<8x128xf32>
    %32 = arith.addf %30, %31 : vector<8x128xf32>
    %33 = math.tanh %32 : vector<8x128xf32>
    %34 = arith.mulf %29, %33 : vector<8x128xf32>
    %c0_10 = arith.constant 0 : index
    %c256 = arith.constant 256 : index
    %35 = vector.load %arg1[%c0_10, %c256] : memref<8x1024xf32, #tpu.memory_space<vmem>>, vector<8x256xf32>
    %36 = tpu.concatenate %35, %34 in 1 : vector<8x256xf32>, vector<8x128xf32> -> vector<8x384xf32>
    %37 = arith.truncf %36 : vector<8x384xf32> to vector<8x384xbf16>
    %cst_11 = arith.constant dense<0.000000e+00> : vector<8x512xf32>
    %38 = tpu.matmul %37, %0, %cst_11 {dimension_numbers = #tpu.dot_dimension_numbers<[1], [0], [0], [1], [0, 0, 1, 1], [], []>} : vector<8x384xbf16>, vector<384x512xbf16>, vector<8x512xf32> -> vector<8x512xf32>
    %39 = vector.broadcast %1 : vector<1x512xf32> to vector<8x512xf32>
    %40 = arith.addf %38, %39 : vector<8x512xf32>
    %41 = vector.extract_strided_slice %40 {offsets = [0, 0], sizes = [8, 128], strides = [1, 1]} : vector<8x512xf32> to vector<8x128xf32>
    %42 = arith.negf %41 : vector<8x128xf32>
    %43 = math.exp %42 : vector<8x128xf32>
    %cst_12 = arith.constant 1.000000e+00 : f32
    %44 = vector.broadcast %cst_12 : f32 to vector<8x128xf32>
    %45 = arith.addf %44, %43 : vector<8x128xf32>
    %46 = arith.divf %44, %45 : vector<8x128xf32>
    %47 = vector.extract_strided_slice %40 {offsets = [0, 128], sizes = [8, 128], strides = [1, 1]} : vector<8x512xf32> to vector<8x128xf32>
    %48 = arith.negf %47 : vector<8x128xf32>
    %49 = math.exp %48 : vector<8x128xf32>
    %cst_13 = arith.constant 1.000000e+00 : f32
    %50 = vector.broadcast %cst_13 : f32 to vector<8x128xf32>
    %51 = arith.addf %50, %49 : vector<8x128xf32>
    %52 = arith.divf %50, %51 : vector<8x128xf32>
    %53 = vector.extract_strided_slice %40 {offsets = [0, 256], sizes = [8, 128], strides = [1, 1]} : vector<8x512xf32> to vector<8x128xf32>
    %54 = math.tanh %53 : vector<8x128xf32>
    %55 = vector.extract_strided_slice %40 {offsets = [0, 384], sizes = [8, 128], strides = [1, 1]} : vector<8x512xf32> to vector<8x128xf32>
    %56 = arith.negf %55 : vector<8x128xf32>
    %57 = math.exp %56 : vector<8x128xf32>
    %cst_14 = arith.constant 1.000000e+00 : f32
    %58 = vector.broadcast %cst_14 : f32 to vector<8x128xf32>
    %59 = arith.addf %58, %57 : vector<8x128xf32>
    %60 = arith.divf %58, %59 : vector<8x128xf32>
    %61 = arith.mulf %52, %32 : vector<8x128xf32>
    %62 = arith.mulf %46, %54 : vector<8x128xf32>
    %63 = arith.addf %61, %62 : vector<8x128xf32>
    %64 = math.tanh %63 : vector<8x128xf32>
    %65 = arith.mulf %60, %64 : vector<8x128xf32>
    %c0_15 = arith.constant 0 : index
    %c512 = arith.constant 512 : index
    %66 = vector.load %arg1[%c0_15, %c512] : memref<8x1024xf32, #tpu.memory_space<vmem>>, vector<8x256xf32>
    %67 = tpu.concatenate %66, %65 in 1 : vector<8x256xf32>, vector<8x128xf32> -> vector<8x384xf32>
    %68 = arith.truncf %67 : vector<8x384xf32> to vector<8x384xbf16>
    %cst_16 = arith.constant dense<0.000000e+00> : vector<8x512xf32>
    %69 = tpu.matmul %68, %0, %cst_16 {dimension_numbers = #tpu.dot_dimension_numbers<[1], [0], [0], [1], [0, 0, 1, 1], [], []>} : vector<8x384xbf16>, vector<384x512xbf16>, vector<8x512xf32> -> vector<8x512xf32>
    %70 = vector.broadcast %1 : vector<1x512xf32> to vector<8x512xf32>
    %71 = arith.addf %69, %70 : vector<8x512xf32>
    %72 = vector.extract_strided_slice %71 {offsets = [0, 0], sizes = [8, 128], strides = [1, 1]} : vector<8x512xf32> to vector<8x128xf32>
    %73 = arith.negf %72 : vector<8x128xf32>
    %74 = math.exp %73 : vector<8x128xf32>
    %cst_17 = arith.constant 1.000000e+00 : f32
    %75 = vector.broadcast %cst_17 : f32 to vector<8x128xf32>
    %76 = arith.addf %75, %74 : vector<8x128xf32>
    %77 = arith.divf %75, %76 : vector<8x128xf32>
    %78 = vector.extract_strided_slice %71 {offsets = [0, 128], sizes = [8, 128], strides = [1, 1]} : vector<8x512xf32> to vector<8x128xf32>
    %79 = arith.negf %78 : vector<8x128xf32>
    %80 = math.exp %79 : vector<8x128xf32>
    %cst_18 = arith.constant 1.000000e+00 : f32
    %81 = vector.broadcast %cst_18 : f32 to vector<8x128xf32>
    %82 = arith.addf %81, %80 : vector<8x128xf32>
    %83 = arith.divf %81, %82 : vector<8x128xf32>
    %84 = vector.extract_strided_slice %71 {offsets = [0, 256], sizes = [8, 128], strides = [1, 1]} : vector<8x512xf32> to vector<8x128xf32>
    %85 = math.tanh %84 : vector<8x128xf32>
    %86 = vector.extract_strided_slice %71 {offsets = [0, 384], sizes = [8, 128], strides = [1, 1]} : vector<8x512xf32> to vector<8x128xf32>
    %87 = arith.negf %86 : vector<8x128xf32>
    %88 = math.exp %87 : vector<8x128xf32>
    %cst_19 = arith.constant 1.000000e+00 : f32
    %89 = vector.broadcast %cst_19 : f32 to vector<8x128xf32>
    %90 = arith.addf %89, %88 : vector<8x128xf32>
    %91 = arith.divf %89, %90 : vector<8x128xf32>
    %92 = arith.mulf %83, %63 : vector<8x128xf32>
    %93 = arith.mulf %77, %85 : vector<8x128xf32>
    %94 = arith.addf %92, %93 : vector<8x128xf32>
    %95 = math.tanh %94 : vector<8x128xf32>
    %96 = arith.mulf %91, %95 : vector<8x128xf32>
    %c0_20 = arith.constant 0 : index
    %c768 = arith.constant 768 : index
    %97 = vector.load %arg1[%c0_20, %c768] : memref<8x1024xf32, #tpu.memory_space<vmem>>, vector<8x256xf32>
    %98 = tpu.concatenate %97, %96 in 1 : vector<8x256xf32>, vector<8x128xf32> -> vector<8x384xf32>
    %99 = arith.truncf %98 : vector<8x384xf32> to vector<8x384xbf16>
    %cst_21 = arith.constant dense<0.000000e+00> : vector<8x512xf32>
    %100 = tpu.matmul %99, %0, %cst_21 {dimension_numbers = #tpu.dot_dimension_numbers<[1], [0], [0], [1], [0, 0, 1, 1], [], []>} : vector<8x384xbf16>, vector<384x512xbf16>, vector<8x512xf32> -> vector<8x512xf32>
    %101 = vector.broadcast %1 : vector<1x512xf32> to vector<8x512xf32>
    %102 = arith.addf %100, %101 : vector<8x512xf32>
    %103 = vector.extract_strided_slice %102 {offsets = [0, 0], sizes = [8, 128], strides = [1, 1]} : vector<8x512xf32> to vector<8x128xf32>
    %104 = arith.negf %103 : vector<8x128xf32>
    %105 = math.exp %104 : vector<8x128xf32>
    %cst_22 = arith.constant 1.000000e+00 : f32
    %106 = vector.broadcast %cst_22 : f32 to vector<8x128xf32>
    %107 = arith.addf %106, %105 : vector<8x128xf32>
    %108 = arith.divf %106, %107 : vector<8x128xf32>
    %109 = vector.extract_strided_slice %102 {offsets = [0, 128], sizes = [8, 128], strides = [1, 1]} : vector<8x512xf32> to vector<8x128xf32>
    %110 = arith.negf %109 : vector<8x128xf32>
    %111 = math.exp %110 : vector<8x128xf32>
    %cst_23 = arith.constant 1.000000e+00 : f32
    %112 = vector.broadcast %cst_23 : f32 to vector<8x128xf32>
    %113 = arith.addf %112, %111 : vector<8x128xf32>
    %114 = arith.divf %112, %113 : vector<8x128xf32>
    %115 = vector.extract_strided_slice %102 {offsets = [0, 256], sizes = [8, 128], strides = [1, 1]} : vector<8x512xf32> to vector<8x128xf32>
    %116 = math.tanh %115 : vector<8x128xf32>
    %117 = vector.extract_strided_slice %102 {offsets = [0, 384], sizes = [8, 128], strides = [1, 1]} : vector<8x512xf32> to vector<8x128xf32>
    %118 = arith.negf %117 : vector<8x128xf32>
    %119 = math.exp %118 : vector<8x128xf32>
    %cst_24 = arith.constant 1.000000e+00 : f32
    %120 = vector.broadcast %cst_24 : f32 to vector<8x128xf32>
    %121 = arith.addf %120, %119 : vector<8x128xf32>
    %122 = arith.divf %120, %121 : vector<8x128xf32>
    %123 = arith.mulf %114, %94 : vector<8x128xf32>
    %124 = arith.mulf %108, %116 : vector<8x128xf32>
    %125 = arith.addf %123, %124 : vector<8x128xf32>
    %126 = math.tanh %125 : vector<8x128xf32>
    %127 = arith.mulf %122, %126 : vector<8x128xf32>
    %c0_25 = arith.constant 0 : index
    %c768_26 = arith.constant 768 : index
    %128 = vector.load %arg1[%c0_25, %c768_26] : memref<8x1024xf32, #tpu.memory_space<vmem>>, vector<8x256xf32>
    %c0_27 = arith.constant 0 : index
    %c0_28 = arith.constant 0 : index
    %129 = vector.load %arg4[%c0_27, %c0_28] : memref<8x256xf32, #tpu.memory_space<vmem>>, vector<8x256xf32>
    tpu.vector_store %arg4[%c0_27, %c0_28], %128 {strides = array<i32>} : memref<8x256xf32, #tpu.memory_space<vmem>>, vector<8x256xf32>,
    %c0_29 = arith.constant 0 : index
    %c0_30 = arith.constant 0 : index
    %130 = vector.load %arg5[%c0_29, %c0_30] : memref<8x128xf32, #tpu.memory_space<vmem>>, vector<8x128xf32>
    tpu.vector_store %arg5[%c0_29, %c0_30], %127 {strides = array<i32>} : memref<8x128xf32, #tpu.memory_space<vmem>>, vector<8x128xf32>,
    return
  }
  func.func @transform_0(%arg0: i32) -> (i32, i32) {
    %c0_i32 = arith.constant 0 : i32
    %c0_i32_0 = arith.constant 0 : i32
    %c0_i32_1 = arith.constant 0 : i32
    return %c0_i32, %c0_i32_0 : i32, i32
  }
  func.func @transform_1(%arg0: i32) -> (i32, i32) {
    %c0_i32 = arith.constant 0 : i32
    %c0_i32_0 = arith.constant 0 : i32
    %c0_i32_1 = arith.constant 0 : i32
    return %c0_i32, %c0_i32_0 : i32, i32
  }
  func.func @transform_2(%arg0: i32) -> (i32, i32) {
    %c0_i32 = arith.constant 0 : i32
    %c0_i32_0 = arith.constant 0 : i32
    %c0_i32_1 = arith.constant 0 : i32
    return %c0_i32, %c0_i32_0 : i32, i32
  }
  func.func @transform_3(%arg0: i32) -> (i32, i32) {
    %c0_i32 = arith.constant 0 : i32
    %c0_i32_0 = arith.constant 0 : i32
    %c0_i32_1 = arith.constant 0 : i32
    return %c0_i32, %c0_i32_0 : i32, i32
  }
  func.func @transform_4(%arg0: i32) -> (i32, i32) {
    %c0_i32 = arith.constant 0 : i32
    %c0_i32_0 = arith.constant 0 : i32
    %c0_i32_1 = arith.constant 0 : i32
    return %c0_i32, %c0_i32_0 : i32, i32
  }
}

module attributes {stable_mosaic.version = 11 : i64} {
  func.func @head_kernel(%arg0: i32, %arg1: memref<2x4x256xf32, #tpu.memory_space<vmem>>, %arg2: memref<2x4x128xf32, #tpu.memory_space<vmem>>, %arg3: memref<2x384x256xf32, #tpu.memory_space<vmem>>, %arg4: memref<256x128xf32, #tpu.memory_space<vmem>>, %arg5: memref<1x128xf32, #tpu.memory_space<vmem>>, %arg6: memref<1x128xf32, #tpu.memory_space<vmem>>, %arg7: memref<1x128xf32, #tpu.memory_space<vmem>>, %arg8: memref<1x128xf32, #tpu.memory_space<vmem>>, %arg9: memref<1x128xf32, #tpu.memory_space<vmem>>, %arg10: memref<128x128xf32, #tpu.memory_space<vmem>>, %arg11: memref<1x128xf32, #tpu.memory_space<vmem>>, %arg12: memref<2x128xf32, #tpu.memory_space<vmem>>) attributes {dimension_semantics = [#tpu.dimension_semantics<arbitrary>], iteration_bounds = array<i64: 1>, scalar_prefetch = 0 : i64, scratch_operands = 0 : i64, tpu.core_type = #tpu.core_type<tc>, window_params = [{pipeline_mode = #tpu.pipeline_mode<synchronous>, transform_indices = @transform_0, window_bounds = array<i64: 2, 4, 256>}, {pipeline_mode = #tpu.pipeline_mode<synchronous>, transform_indices = @transform_1, window_bounds = array<i64: 2, 4, 128>}, {pipeline_mode = #tpu.pipeline_mode<synchronous>, transform_indices = @transform_2, window_bounds = array<i64: 2, 384, 256>}, {pipeline_mode = #tpu.pipeline_mode<synchronous>, transform_indices = @transform_3, window_bounds = array<i64: 256, 128>}, {pipeline_mode = #tpu.pipeline_mode<synchronous>, transform_indices = @transform_4, window_bounds = array<i64: 1, 128>}, {pipeline_mode = #tpu.pipeline_mode<synchronous>, transform_indices = @transform_5, window_bounds = array<i64: 1, 128>}, {pipeline_mode = #tpu.pipeline_mode<synchronous>, transform_indices = @transform_6, window_bounds = array<i64: 1, 128>}, {pipeline_mode = #tpu.pipeline_mode<synchronous>, transform_indices = @transform_7, window_bounds = array<i64: 1, 128>}, {pipeline_mode = #tpu.pipeline_mode<synchronous>, transform_indices = @transform_8, window_bounds = array<i64: 1, 128>}, {pipeline_mode = #tpu.pipeline_mode<synchronous>, transform_indices = @transform_9, window_bounds = array<i64: 128, 128>}, {pipeline_mode = #tpu.pipeline_mode<synchronous>, transform_indices = @transform_10, window_bounds = array<i64: 1, 128>}, {pipeline_mode = #tpu.pipeline_mode<synchronous>, transform_indices = @transform_11, window_bounds = array<i64: 2, 128>}]} {
    %c0 = arith.constant 0 : index
    %c0_0 = arith.constant 0 : index
    %c0_1 = arith.constant 0 : index
    %0 = vector.load %arg1[%c0, %c0_0, %c0_1] : memref<2x4x256xf32, #tpu.memory_space<vmem>>, vector<2x4x256xf32>
    %cst = arith.constant dense<0xFF800000> : vector<2x256xf32>
    %1 = vector.multi_reduction <maximumf>, %0, %cst [1] : vector<2x4x256xf32> to vector<2x256xf32>
    %c0_2 = arith.constant 0 : index
    %c0_3 = arith.constant 0 : index
    %c0_4 = arith.constant 0 : index
    %2 = vector.load %arg2[%c0_2, %c0_3, %c0_4] : memref<2x4x128xf32, #tpu.memory_space<vmem>>, vector<2x4x128xf32>
    %cst_5 = arith.constant dense<0xFF800000> : vector<2x128xf32>
    %3 = vector.multi_reduction <maximumf>, %2, %cst_5 [1] : vector<2x4x128xf32> to vector<2x128xf32>
    %4 = tpu.concatenate %1, %3 in 1 : vector<2x256xf32>, vector<2x128xf32> -> vector<2x384xf32>
    %c0_6 = arith.constant 0 : index
    %c0_7 = arith.constant 0 : index
    %c0_8 = arith.constant 0 : index
    %5 = vector.load %arg3[%c0_6, %c0_7, %c0_8] : memref<2x384x256xf32, #tpu.memory_space<vmem>>, vector<1x384x256xf32>
    %6 = vector.shape_cast %5 : vector<1x384x256xf32> to vector<384x256xf32>
    %cst_9 = arith.constant dense<0.000000e+00> : vector<2x256xf32>
    %7 = tpu.matmul %4, %6, %cst_9 {dimension_numbers = #tpu.dot_dimension_numbers<[1], [0], [0], [1], [0, 0, 1, 1], [], []>} : vector<2x384xf32>, vector<384x256xf32>, vector<2x256xf32> -> vector<2x256xf32>
    %c1 = arith.constant 1 : index
    %c0_10 = arith.constant 0 : index
    %c0_11 = arith.constant 0 : index
    %8 = vector.load %arg3[%c1, %c0_10, %c0_11] : memref<2x384x256xf32, #tpu.memory_space<vmem>>, vector<1x384x256xf32>
    %9 = vector.shape_cast %8 : vector<1x384x256xf32> to vector<384x256xf32>
    %cst_12 = arith.constant dense<0.000000e+00> : vector<2x256xf32>
    %10 = tpu.matmul %4, %9, %cst_12 {dimension_numbers = #tpu.dot_dimension_numbers<[1], [0], [0], [1], [0, 0, 1, 1], [], []>} : vector<2x384xf32>, vector<384x256xf32>, vector<2x256xf32> -> vector<2x256xf32>
    %11 = arith.maximumf %7, %10 : vector<2x256xf32>
    %c0_13 = arith.constant 0 : index
    %c0_14 = arith.constant 0 : index
    %12 = vector.load %arg4[%c0_13, %c0_14] : memref<256x128xf32, #tpu.memory_space<vmem>>, vector<256x128xf32>
    %cst_15 = arith.constant dense<0.000000e+00> : vector<2x128xf32>
    %13 = tpu.matmul %11, %12, %cst_15 {dimension_numbers = #tpu.dot_dimension_numbers<[1], [0], [0], [1], [0, 0, 1, 1], [], []>} : vector<2x256xf32>, vector<256x128xf32>, vector<2x128xf32> -> vector<2x128xf32>
    %c0_16 = arith.constant 0 : index
    %c0_17 = arith.constant 0 : index
    %14 = vector.load %arg5[%c0_16, %c0_17] : memref<1x128xf32, #tpu.memory_space<vmem>>, vector<1x128xf32>
    %15 = vector.broadcast %14 : vector<1x128xf32> to vector<2x128xf32>
    %16 = arith.addf %13, %15 : vector<2x128xf32>
    %c0_18 = arith.constant 0 : index
    %c0_19 = arith.constant 0 : index
    %17 = vector.load %arg8[%c0_18, %c0_19] : memref<1x128xf32, #tpu.memory_space<vmem>>, vector<1x128xf32>
    %18 = vector.broadcast %17 : vector<1x128xf32> to vector<2x128xf32>
    %19 = arith.subf %16, %18 : vector<2x128xf32>
    %c0_20 = arith.constant 0 : index
    %c0_21 = arith.constant 0 : index
    %20 = vector.load %arg9[%c0_20, %c0_21] : memref<1x128xf32, #tpu.memory_space<vmem>>, vector<1x128xf32>
    %cst_22 = arith.constant 9.99999974E-6 : f32
    %21 = vector.broadcast %cst_22 : f32 to vector<1x128xf32>
    %22 = arith.addf %20, %21 : vector<1x128xf32>
    %23 = math.rsqrt %22 : vector<1x128xf32>
    %24 = vector.broadcast %23 : vector<1x128xf32> to vector<2x128xf32>
    %25 = arith.mulf %19, %24 : vector<2x128xf32>
    %c0_23 = arith.constant 0 : index
    %c0_24 = arith.constant 0 : index
    %26 = vector.load %arg6[%c0_23, %c0_24] : memref<1x128xf32, #tpu.memory_space<vmem>>, vector<1x128xf32>
    %27 = vector.broadcast %26 : vector<1x128xf32> to vector<2x128xf32>
    %28 = arith.mulf %25, %27 : vector<2x128xf32>
    %c0_25 = arith.constant 0 : index
    %c0_26 = arith.constant 0 : index
    %29 = vector.load %arg7[%c0_25, %c0_26] : memref<1x128xf32, #tpu.memory_space<vmem>>, vector<1x128xf32>
    %30 = vector.broadcast %29 : vector<1x128xf32> to vector<2x128xf32>
    %31 = arith.addf %28, %30 : vector<2x128xf32>
    %cst_27 = arith.constant 0.000000e+00 : f32
    %32 = vector.broadcast %cst_27 : f32 to vector<2x128xf32>
    %33 = arith.maximumf %31, %32 : vector<2x128xf32>
    %c0_28 = arith.constant 0 : index
    %c0_29 = arith.constant 0 : index
    %34 = vector.load %arg10[%c0_28, %c0_29] : memref<128x128xf32, #tpu.memory_space<vmem>>, vector<128x128xf32>
    %cst_30 = arith.constant dense<0.000000e+00> : vector<2x128xf32>
    %35 = tpu.matmul %33, %34, %cst_30 {dimension_numbers = #tpu.dot_dimension_numbers<[1], [0], [0], [1], [0, 0, 1, 1], [], []>} : vector<2x128xf32>, vector<128x128xf32>, vector<2x128xf32> -> vector<2x128xf32>
    %c0_31 = arith.constant 0 : index
    %c0_32 = arith.constant 0 : index
    %36 = vector.load %arg11[%c0_31, %c0_32] : memref<1x128xf32, #tpu.memory_space<vmem>>, vector<1x128xf32>
    %37 = vector.broadcast %36 : vector<1x128xf32> to vector<2x128xf32>
    %38 = arith.addf %35, %37 : vector<2x128xf32>
    %c0_33 = arith.constant 0 : index
    %c0_34 = arith.constant 0 : index
    %39 = vector.load %arg12[%c0_33, %c0_34] : memref<2x128xf32, #tpu.memory_space<vmem>>, vector<2x128xf32>
    tpu.vector_store %arg12[%c0_33, %c0_34], %38 {strides = array<i32>} : memref<2x128xf32, #tpu.memory_space<vmem>>, vector<2x128xf32>,
    return
  }
  func.func @transform_0(%arg0: i32) -> (i32, i32, i32) {
    %c0_i32 = arith.constant 0 : i32
    %c0_i32_0 = arith.constant 0 : i32
    %c0_i32_1 = arith.constant 0 : i32
    %c0_i32_2 = arith.constant 0 : i32
    return %c0_i32, %c0_i32_0, %c0_i32_1 : i32, i32, i32
  }
  func.func @transform_1(%arg0: i32) -> (i32, i32, i32) {
    %c0_i32 = arith.constant 0 : i32
    %c0_i32_0 = arith.constant 0 : i32
    %c0_i32_1 = arith.constant 0 : i32
    %c0_i32_2 = arith.constant 0 : i32
    return %c0_i32, %c0_i32_0, %c0_i32_1 : i32, i32, i32
  }
  func.func @transform_2(%arg0: i32) -> (i32, i32, i32) {
    %c0_i32 = arith.constant 0 : i32
    %c0_i32_0 = arith.constant 0 : i32
    %c0_i32_1 = arith.constant 0 : i32
    %c0_i32_2 = arith.constant 0 : i32
    return %c0_i32, %c0_i32_0, %c0_i32_1 : i32, i32, i32
  }
  func.func @transform_3(%arg0: i32) -> (i32, i32) {
    %c0_i32 = arith.constant 0 : i32
    %c0_i32_0 = arith.constant 0 : i32
    %c0_i32_1 = arith.constant 0 : i32
    return %c0_i32, %c0_i32_0 : i32, i32
  }
  func.func @transform_4(%arg0: i32) -> (i32, i32) {
    %c0_i32 = arith.constant 0 : i32
    %c0_i32_0 = arith.constant 0 : i32
    %c0_i32_1 = arith.constant 0 : i32
    return %c0_i32, %c0_i32_0 : i32, i32
  }
  func.func @transform_5(%arg0: i32) -> (i32, i32) {
    %c0_i32 = arith.constant 0 : i32
    %c0_i32_0 = arith.constant 0 : i32
    %c0_i32_1 = arith.constant 0 : i32
    return %c0_i32, %c0_i32_0 : i32, i32
  }
  func.func @transform_6(%arg0: i32) -> (i32, i32) {
    %c0_i32 = arith.constant 0 : i32
    %c0_i32_0 = arith.constant 0 : i32
    %c0_i32_1 = arith.constant 0 : i32
    return %c0_i32, %c0_i32_0 : i32, i32
  }
  func.func @transform_7(%arg0: i32) -> (i32, i32) {
    %c0_i32 = arith.constant 0 : i32
    %c0_i32_0 = arith.constant 0 : i32
    %c0_i32_1 = arith.constant 0 : i32
    return %c0_i32, %c0_i32_0 : i32, i32
  }
  func.func @transform_8(%arg0: i32) -> (i32, i32) {
    %c0_i32 = arith.constant 0 : i32
    %c0_i32_0 = arith.constant 0 : i32
    %c0_i32_1 = arith.constant 0 : i32
    return %c0_i32, %c0_i32_0 : i32, i32
  }
  func.func @transform_9(%arg0: i32) -> (i32, i32) {
    %c0_i32 = arith.constant 0 : i32
    %c0_i32_0 = arith.constant 0 : i32
    %c0_i32_1 = arith.constant 0 : i32
    return %c0_i32, %c0_i32_0 : i32, i32
  }
  func.func @transform_10(%arg0: i32) -> (i32, i32) {
    %c0_i32 = arith.constant 0 : i32
    %c0_i32_0 = arith.constant 0 : i32
    %c0_i32_1 = arith.constant 0 : i32
    return %c0_i32, %c0_i32_0 : i32, i32
  }
  func.func @transform_11(%arg0: i32) -> (i32, i32) {
    %c0_i32 = arith.constant 0 : i32
    %c0_i32_0 = arith.constant 0 : i32
    %c0_i32_1 = arith.constant 0 : i32
    return %c0_i32, %c0_i32_0 : i32, i32
  }
}

</mosaic_0001>

<bundles_post_ra>
// kernel: group_activity_classifier.3
= control target key start
LH: loop header
LB: loop body
LE: loop exit
PB: predicated region body
PF: predicated region fallthrough
CT: control target
= control target key end

     0   :  { %s1376_s12 = smov 0   ;;  %s1378_s13 = smov 0   ;;  %s1590_s0 = inlined_call_operand.vmem [shape: bf16[32,768], index: 0, kind: input, shape index: {}]   ;;  %s1591_s1 = inlined_call_operand.vmem [shape: bf16[768,256], index: 1, kind: input, shape index: {}]   ;;  %s1592_s2 = inlined_call_operand.vmem [shape: f32[1,256], index: 2, kind: input, shape index: {}]   ;;  %s1593_s3 = inlined_call_operand.vmem [shape: f32[32,256], index: 3, kind: output, shape index: {}]  }
   0x1   :  { %s1380_s14 = smov 0   ;;  %s1382_s15 = smov 0  }
   0x2   :  { %s1384_s16 = smov 0  }
   0x3 LB: > { %s25_s17 = sadd.s32 1, %s1349_s15  ;;  %p48_p1 = scmp.ne.s32.totalorder %s1341_s13, %s1337_s12  ;;  %s1353_s16 = sphi %s1384_s16, %s13_s16   ;;  %s1349_s15 = sphi %s1382_s15, %s1597_s15   ;;  %s1345_s14 = sphi %s1380_s14, %s1596_s14   ;;  %s1341_s13 = sphi %s1378_s13, %s1595_s13   ;;  %s1337_s12 = sphi %s1376_s12, %s1594_s12  }
   0x4   : > { %p26_p0 = scmp.ge.s32.totalorder %s25_s17, 2  ;;  %p49_p2 = scmp.eq.s32.totalorder %s1353_s16, 0 }
   0x5   : > { %s41_s19 = sadd.s32 1, %s1341_s13  ;;  %p965_p5 = scmp.ge.s32.totalorder %s1353_s16, 2 }
   0x6   : > { %s1599_s17 = smov (%p26_p0, %s25_s17), 0  ;;  %p50_p3 = por %p49_p2, %p48_p1 }
   0x7   : > { %s37_s18 = ssub.s32 %s1349_s15, %s1599_s17  ;;  %164 = sbr.rel (%p965_p5) target bundleno = 25 (0x19), region = 20 }
   0x8   : > { %p39_p4 = scmp.eq.s32.totalorder %s37_s18, 0 }
   0xa   : > { %s1411_s20 = scalar_select %p39_p4, %s1341_s13, %s41_s19  }
   0xc   : > { %167 = sbr.rel (!%p50_p3) target bundleno = 25 (0x19), region = 24  ;;  %s169_s21 = sand.u32 (%p50_p3), 1, %s1341_s13  }
   0xd   : > { %s1200_s22 = smul.u32 (%p50_p3), 12, %s1349_s15 }
   0xe   : > { %s1272_s23 = smul.u32 (%p50_p3), 48, %s169_s21 }
   0xf   : > { %s177_s26 = scalar_lea.vmem (%p50_p3), %s1590_s0, %s1200_s22 }
  0x10   : > { %v192_v0 = vld [vmem:[%s177_s26] sm:$0xff] (%p50_p3)  ;;  %v194_v1 = vld [vmem:[%s177_s26 + $0x18] sm:$0xff] (%p50_p3)  ;;  %v196_v2 = vld [vmem:[%s177_s26 + $0x30] sm:$0xff] (%p50_p3)  ;;  %s171_s27 = scalar_lea.vmem (%p50_p3), [#allocation3], %s1272_s23 }
  0x11   : > { %193 = vst [vmem:[%s171_s27] sm:$0xff] %v192_v0  ;;  %v198_v3 = vld [vmem:[%s177_s26 + $0x48] sm:$0xff]  ;;  %v969_v5 = vld [vmem:[%s177_s26 + $0x20] sm:$0xf]  ;;  %v971_v6 = vld [vmem:[%s177_s26 + $0x38] sm:$0xf] }
  0x12   : > { %195 = vst [vmem:[%s171_s27 + $0xc] sm:$0xff] %v194_v1  ;;  %v967_v4 = vld [vmem:[%s177_s26 + $0x8] sm:$0xf]  ;;  %v973_v7 = vld [vmem:[%s177_s26 + $0x50] sm:$0xf] }
  0x13   : > { %197 = vst [vmem:[%s171_s27 + $0x18] sm:$0xff] %v196_v2 }
  0x14   : > { %199 = vst [vmem:[%s171_s27 + $0x24] sm:$0xff] %v198_v3 }
  0x15   : > { %968 = vst [vmem:[%s171_s27 + $0x8] sm:$0xf] %v967_v4 }
  0x16   : > { %970 = vst [vmem:[%s171_s27 + $0x14] sm:$0xf] %v969_v5 }
  0x17   : > { %972 = vst [vmem:[%s171_s27 + $0x20] sm:$0xf] %v971_v6 }
  0x18   : > { %974 = vst [vmem:[%s171_s27 + $0x2c] sm:$0xf] %v973_v7 }
  0x19 PF: > { %p975_p6 = scmp.ge.s32.totalorder %s1353_s16, 1  ;;  %p235_p7 = scmp.lt.s32.totalorder %s1353_s16, 3 }
  0x1b   : > { %p236_p8 = pnand %p975_p6, %p235_p7 }
  0x1c   : > { %s242_s28 = sand.u32 (!%p236_p8), 1, %s1337_s12   ;;  %s286_s29 = smul.u32 (!%p236_p8), 48, %s1345_s14 }
  0x1d   : > { %239 = sbr.rel (%p236_p8) target bundleno = 278 (0x116), region = 54  ;;  %p978_p10 = scmp.ne.s32.totalorder (!%p236_p8), %s1345_s14, 0 }
  0x1e   : > { %s1273_s30 = smul.u32 (!%p236_p8), 48, %s242_s28  ;;  %p288_p9 = scmp.lt.s32.totalorder (!%p236_p8), %s286_s29, 95 }
  0x20   : > { %s1428_s8 = scalar_lea.vmem (!%p236_p8), [#allocation3], %s1273_s30 }
  0x22   : > { %s1601_s29 = smov (!%p288_p9, %s286_s29), 95  ;;  %318 = sbr.rel (%p978_p10) target bundleno = 48 (0x30), region = 62 }
  0x23   : > { %s1201_s4 = sshll.u32 %s1601_s29, 3 }
  0x24   : > { %s1426_s7 = scalar_lea.vmem %s1591_s1, %s1201_s4 }
  0x27   : > { %v1355_v8 = vmov 0.0  }
  0x28   : > { %319 = vst [vmem:[#allocation2 + $0x30] sm:$0xff] %v1355_v8 }
  0x29   : > { %320 = vst [vmem:[#allocation2] sm:$0xff] %v1355_v8 }
  0x2a   : > { %321 = vst [vmem:[#allocation2 + $0x18] sm:$0xff] %v1355_v8 }
  0x2b   : > { %322 = vst [vmem:[#allocation2 + $0x10] sm:$0xff] %v1355_v8 }
  0x2c   : > { %323 = vst [vmem:[#allocation2 + $0x8] sm:$0xff] %v1355_v8 }
  0x2d   : > { %324 = vst [vmem:[#allocation2 + $0x20] sm:$0xff] %v1355_v8 }
  0x2e   : > { %325 = vst [vmem:[#allocation2 + $0x28] sm:$0xff] %v1355_v8 }
  0x2f   : > { %326 = vst [vmem:[#allocation2 + $0x38] sm:$0xff] %v1355_v8 }
  0x30 PF: > { %v1061_v9 = vld [vmem:[%s1426_s7 + $0x70] sm:$0xf]  ;;  %v1223_v10 = vld [vmem:[%s1426_s7 + $0x74] sm:$0xf0]  ;;  %v1222_v18 = vld [vmem:[%s1426_s7 + $0x74] sm:$0xf] }
  0x31   : > { %v1125_v11 = vld [vmem:[%s1426_s7 + $0xf0] sm:$0xf]  ;;  %v1062_v12 = vor.u32 %v1223_v10, %v1061_v9  ;;  %v1239_v13 = vld [vmem:[%s1426_s7 + $0xf4] sm:$0xf0]  ;;  %v1063_v19 = vld [vmem:[%s1426_s7 + $0x78] sm:$0xf0] }
  0x32   : > { %v1189_v14 = vld [vmem:[%s1426_s7 + $0x170] sm:$0xf]  ;;  %v1255_v15 = vld [vmem:[%s1426_s7 + $0x174] sm:$0xf0]  ;;  %v1126_v16 = vor.u32 %v1239_v13, %v1125_v11  ;;  %v1053_v20 = vld [vmem:[%s1426_s7 + $0x60] sm:$0xf]  ;;  %v1066_v21 = vor.u32 %v1222_v18, %v1063_v19 }
  0x33   : > { %v1190_v17 = vor.u32 %v1255_v15, %v1189_v14  ;;  %663 = vmatpush.bf16.msra.mxu0 %v1062_v12  ;;  %v1221_v22 = vld [vmem:[%s1426_s7 + $0x64] sm:$0xf0]  ;;  %v1117_v23 = vld [vmem:[%s1426_s7 + $0xe0] sm:$0xf]  ;;  %v1220_v29 = vld [vmem:[%s1426_s7 + $0x64] sm:$0xf] }
  0x34   : > { %v1237_v24 = vld [vmem:[%s1426_s7 + $0xe4] sm:$0xf0]  ;;  %682 = vmatpush.bf16.msra.mxu1 %v1126_v16  ;;  %v1054_v25 = vor.u32 %v1221_v22, %v1053_v20  ;;  %v1181_v27 = vld [vmem:[%s1426_s7 + $0x160] sm:$0xf]  ;;  %720 = vmatpush.bf16.msra.mxu3 %v1066_v21  ;;  %v1055_v31 = vld [vmem:[%s1426_s7 + $0x68] sm:$0xf0] }
  0x35   : > { %701 = vmatpush.bf16.msra.mxu2 %v1190_v17  ;;  %v1118_v26 = vor.u32 %v1237_v24, %v1117_v23  ;;  %v1253_v28 = vld [vmem:[%s1426_s7 + $0x164] sm:$0xf0]  ;;  %v1045_v32 = vld [vmem:[%s1426_s7 + $0x50] sm:$0xf]  ;;  %v1219_v33 = vld [vmem:[%s1426_s7 + $0x54] sm:$0xf0]  ;;  %v1058_v34 = vor.u32 %v1220_v29, %v1055_v31 }
  0x36   : > { %v1182_v30 = vor.u32 %v1253_v28, %v1181_v27  ;;  %v1109_v35 = vld [vmem:[%s1426_s7 + $0xd0] sm:$0xf]  ;;  %v1235_v36 = vld [vmem:[%s1426_s7 + $0xd4] sm:$0xf0]  ;;  %v1046_v38 = vor.u32 %v1219_v33, %v1045_v32  ;;  %v1218_v40 = vld [vmem:[%s1426_s7 + $0x54] sm:$0xf] }
  0x37   : > { %v1173_v37 = vld [vmem:[%s1426_s7 + $0x150] sm:$0xf]  ;;  %664 = vmatpush.bf16.msra.mxu0 %v1054_v25  ;;  %v1251_v39 = vld [vmem:[%s1426_s7 + $0x154] sm:$0xf0]  ;;  %v1047_v41 = vld [vmem:[%s1426_s7 + $0x58] sm:$0xf0]  ;;  %v1110_v42 = vor.u32 %v1235_v36, %v1109_v35 }
  0x38   : > { %683 = vmatpush.bf16.msra.mxu1 %v1118_v26  ;;  %v1174_v43 = vor.u32 %v1251_v39, %v1173_v37  ;;  %v1037_v44 = vld [vmem:[%s1426_s7 + $0x40] sm:$0xf]  ;;  %v1217_v45 = vld [vmem:[%s1426_s7 + $0x44] sm:$0xf0]  ;;  %721 = vmatpush.bf16.msra.mxu3 %v1058_v34  ;;  %v1050_v47 = vor.u32 %v1218_v40, %v1047_v41  ;;  %v1216_v51 = vld [vmem:[%s1426_s7 + $0x44] sm:$0xf] }
  0x39   : > { %702 = vmatpush.bf16.msra.mxu2 %v1182_v30  ;;  %v1101_v46 = vld [vmem:[%s1426_s7 + $0xc0] sm:$0xf]  ;;  %v1233_v48 = vld [vmem:[%s1426_s7 + $0xc4] sm:$0xf0]  ;;  %v1039_v52 = vld [vmem:[%s1426_s7 + $0x48] sm:$0xf0]  ;;  %v1038_v53 = vor.u32 %v1217_v45, %v1037_v44 }
  0x3a   : > { %v1165_v49 = vld [vmem:[%s1426_s7 + $0x140] sm:$0xf]  ;;  %v1249_v50 = vld [vmem:[%s1426_s7 + $0x144] sm:$0xf0]  ;;  %v1102_v54 = vor.u32 %v1233_v48, %v1101_v46  ;;  %v1029_v56 = vld [vmem:[%s1426_s7 + $0x30] sm:$0xf]  ;;  %v1042_v59 = vor.u32 %v1216_v51, %v1039_v52 }
  0x3b   : > { %665 = vmatpush.bf16.msra.mxu0 %v1046_v38  ;;  %v1166_v55 = vor.u32 %v1249_v50, %v1165_v49  ;;  %v1215_v57 = vld [vmem:[%s1426_s7 + $0x34] sm:$0xf0]  ;;  %v1093_v58 = vld [vmem:[%s1426_s7 + $0xb0] sm:$0xf]  ;;  %v1214_v63 = vld [vmem:[%s1426_s7 + $0x34] sm:$0xf] }
  0x3c   : > { %684 = vmatpush.bf16.msra.mxu1 %v1110_v42  ;;  %722 = vmatpush.bf16.msra.mxu3 %v1050_v47  ;;  %v1231_v60 = vld [vmem:[%s1426_s7 + $0xb4] sm:$0xf0]  ;;  %v1157_v61 = vld [vmem:[%s1426_s7 + $0x130] sm:$0xf]  ;;  %v1031_v0 = vld [vmem:[%s1426_s7 + $0x38] sm:$0xf0]  ;;  %v1030_v1 = vor.u32 %v1215_v57, %v1029_v56 }
  0x3d   : > { %703 = vmatpush.bf16.msra.mxu2 %v1174_v43  ;;  %v1247_v62 = vld [vmem:[%s1426_s7 + $0x134] sm:$0xf0]  ;;  %v1094_v2 = vor.u32 %v1231_v60, %v1093_v58  ;;  %v1021_v4 = vld [vmem:[%s1426_s7 + $0x20] sm:$0xf]  ;;  %v1213_v5 = vld [vmem:[%s1426_s7 + $0x24] sm:$0xf0]  ;;  %v1034_v7 = vor.u32 %v1214_v63, %v1031_v0 }
  0x3e   : > { %v1158_v3 = vor.u32 %v1247_v62, %v1157_v61  ;;  %v1085_v6 = vld [vmem:[%s1426_s7 + $0xa0] sm:$0xf]  ;;  %v1229_v8 = vld [vmem:[%s1426_s7 + $0xa4] sm:$0xf0]  ;;  %v1212_v11 = vld [vmem:[%s1426_s7 + $0x24] sm:$0xf]  ;;  %v1022_v13 = vor.u32 %v1213_v5, %v1021_v4 }
  0x3f   : > { %666 = vmatpush.bf16.msra.mxu0 %v1038_v53  ;;  %v1149_v9 = vld [vmem:[%s1426_s7 + $0x120] sm:$0xf]  ;;  %v1245_v10 = vld [vmem:[%s1426_s7 + $0x124] sm:$0xf0]  ;;  %v1023_v12 = vld [vmem:[%s1426_s7 + $0x28] sm:$0xf0]  ;;  %v1086_v14 = vor.u32 %v1229_v8, %v1085_v6 }
  0x40   : > { %685 = vmatpush.bf16.msra.mxu1 %v1102_v54  ;;  %723 = vmatpush.bf16.msra.mxu3 %v1042_v59  ;;  %v1150_v15 = vor.u32 %v1245_v10, %v1149_v9  ;;  %v1013_v16 = vld [vmem:[%s1426_s7 + $0x10] sm:$0xf]  ;;  %v1211_v17 = vld [vmem:[%s1426_s7 + $0x14] sm:$0xf0]  ;;  %v1026_v19 = vor.u32 %v1212_v11, %v1023_v12  ;;  %v1210_v23 = vld [vmem:[%s1426_s7 + $0x14] sm:$0xf] }
  0x41   : > { %704 = vmatpush.bf16.msra.mxu2 %v1166_v55  ;;  %v1077_v18 = vld [vmem:[%s1426_s7 + $0x90] sm:$0xf]  ;;  %v1227_v20 = vld [vmem:[%s1426_s7 + $0x94] sm:$0xf0]  ;;  %v1015_v24 = vld [vmem:[%s1426_s7 + $0x18] sm:$0xf0]  ;;  %v1014_v25 = vor.u32 %v1211_v17, %v1013_v16 }
  0x42   : > { %v1141_v21 = vld [vmem:[%s1426_s7 + $0x110] sm:$0xf]  ;;  %v1243_v22 = vld [vmem:[%s1426_s7 + $0x114] sm:$0xf0]  ;;  %v1005_v26 = vld [vmem:[%s1426_s7] sm:$0xf]  ;;  %v1078_v29 = vor.u32 %v1227_v20, %v1077_v18  ;;  %v1018_v34 = vor.u32 %v1210_v23, %v1015_v24 }
  0x43   : > { %667 = vmatpush.bf16.msra.mxu0 %v1030_v1  ;;  %v1209_v27 = vld [vmem:[%s1426_s7 + $0x4] sm:$0xf0]  ;;  %v1069_v28 = vld [vmem:[%s1426_s7 + $0x80] sm:$0xf]  ;;  %v1142_v30 = vor.u32 %v1243_v22, %v1141_v21  ;;  %v1208_v35 = vld [vmem:[%s1426_s7 + $0x4] sm:$0xf] }
  0x44   : > { %686 = vmatpush.bf16.msra.mxu1 %v1094_v2  ;;  %724 = vmatpush.bf16.msra.mxu3 %v1034_v7  ;;  %v1225_v31 = vld [vmem:[%s1426_s7 + $0x84] sm:$0xf0]  ;;  %v1133_v32 = vld [vmem:[%s1426_s7 + $0x100] sm:$0xf]  ;;  %v1007_v36 = vld [vmem:[%s1426_s7 + $0x8] sm:$0xf0]  ;;  %v1006_v41 = vor.u32 %v1209_v27, %v1005_v26 }
  0x45   : > { %705 = vmatpush.bf16.msra.mxu2 %v1158_v3  ;;  %v1241_v33 = vld [vmem:[%s1426_s7 + $0x104] sm:$0xf0]  ;;  %v981_v37 = vld [vmem:[%s1428_s8] sm:$0xf]  ;;  %v1203_v38 = vld [vmem:[%s1428_s8 + $0x8] sm:$0xf0]  ;;  %v1070_v45 = vor.u32 %v1225_v31, %v1069_v28  ;;  %v1010_v50 = vor.u32 %v1208_v35, %v1007_v36 }
  0x46   : > { %v1238_v39 = vld [vmem:[%s1426_s7 + $0xf4] sm:$0xf]  ;;  %v1127_v40 = vld [vmem:[%s1426_s7 + $0xf8] sm:$0xf0]  ;;  %v1134_v46 = vor.u32 %v1241_v33, %v1133_v32  ;;  %v983_v47 = vld [vmem:[%s1428_s8 + $0xc] sm:$0xf0]  ;;  %v982_v52 = vor.u32 %v1203_v38, %v981_v37 }
  0x47   : > { %668 = vmatpush.bf16.msra.mxu0 %v1022_v13  ;;  %v1202_v42 = vld [vmem:[%s1428_s8 + $0x4] sm:$0xf]  ;;  %v1191_v44 = vld [vmem:[%s1426_s7 + $0x178] sm:$0xf0]  ;;  %v989_v48 = vld [vmem:[%s1428_s8 + $0x8] sm:$0xf]  ;;  %v1130_v51 = vor.u32 %v1238_v39, %v1127_v40 }
  0x48   : > { %687 = vmatpush.bf16.msra.mxu1 %v1086_v14  ;;  %725 = vmatpush.bf16.msra.mxu3 %v1026_v19  ;;  %v1254_v43 = vld [vmem:[%s1426_s7 + $0x174] sm:$0xf]  ;;  %v1236_v54 = vld [vmem:[%s1426_s7 + $0xe4] sm:$0xf]  ;;  %v1119_v55 = vld [vmem:[%s1426_s7 + $0xe8] sm:$0xf0]  ;;  %v1507_v56 = vor.u32 %v1202_v42, %v983_v47 }
  0x49   : > { %706 = vmatpush.bf16.msra.mxu2 %v1150_v15  ;;  %v1204_v49 = vld [vmem:[%s1428_s8 + $0x10] sm:$0xf0]  ;;  %v1194_v53 = vor.u32 %v1254_v43, %v1191_v44  ;;  %v1183_v59 = vld [vmem:[%s1426_s7 + $0x168] sm:$0xf0]  ;;  %v1122_v60 = vor.u32 %v1236_v54, %v1119_v55  ;;  %v1111_v63 = vld [vmem:[%s1426_s7 + $0xd8] sm:$0xf0] }
  0x4a   : > { %v1509_v57 = vor.u32 %v1204_v49, %v989_v48  ;;  %v1252_v58 = vld [vmem:[%s1426_s7 + $0x164] sm:$0xf]  ;;  %v1234_v62 = vld [vmem:[%s1426_s7 + $0xd4] sm:$0xf]  ;;  %v1175_v1 = vld [vmem:[%s1426_s7 + $0x158] sm:$0xf0] }
  0x4b   : > { %669 = vmatpush.bf16.msra.mxu0 %v1014_v25  ;;  %v1186_v61 = vor.u32 %v1252_v58, %v1183_v59  ;;  %v1250_v0 = vld [vmem:[%s1426_s7 + $0x154] sm:$0xf]  ;;  %v1114_v2 = vor.u32 %v1234_v62, %v1111_v63  ;;  %v1232_v4 = vld [vmem:[%s1426_s7 + $0xc4] sm:$0xf]  ;;  %v1103_v5 = vld [vmem:[%s1426_s7 + $0xc8] sm:$0xf0] }
  0x4c   : > { %688 = vmatpush.bf16.msra.mxu1 %v1078_v29  ;;  %726 = vmatpush.bf16.msra.mxu3 %v1018_v34  ;;  %v1178_v3 = vor.u32 %v1250_v0, %v1175_v1  ;;  %v1248_v6 = vld [vmem:[%s1426_s7 + $0x144] sm:$0xf]  ;;  %v1167_v7 = vld [vmem:[%s1426_s7 + $0x148] sm:$0xf0]  ;;  %v1106_v8 = vor.u32 %v1232_v4, %v1103_v5  ;;  %v993_v9 = vld [vmem:[%s1428_s8 + $0x18] sm:$0xf] }
  0x4d   : > { %707 = vmatpush.bf16.msra.mxu2 %v1142_v30  ;;  %v1170_v10 = vor.u32 %v1248_v6, %v1167_v7  ;;  %v1206_v11 = vld [vmem:[%s1428_s8 + $0x20] sm:$0xf0]  ;;  %v1095_v13 = vld [vmem:[%s1426_s7 + $0xb8] sm:$0xf0]  ;;  %v995_v17 = vld [vmem:[%s1428_s8 + $0x24] sm:$0xf0] }
  0x4e   : > { %v1230_v12 = vld [vmem:[%s1426_s7 + $0xb4] sm:$0xf]  ;;  %v1205_v14 = vld [vmem:[%s1428_s8 + $0x1c] sm:$0xf]  ;;  %v1001_v18 = vld [vmem:[%s1428_s8 + $0x20] sm:$0xf]  ;;  %v994_v21 = vor.u32 %v1206_v11, %v993_v9 }
  0x4f   : > { %670 = vmatpush.bf16.msra.mxu0 %v1006_v41  ;;  %v1246_v15 = vld [vmem:[%s1426_s7 + $0x134] sm:$0xf]  ;;  %v1159_v16 = vld [vmem:[%s1426_s7 + $0x138] sm:$0xf0]  ;;  %v1098_v20 = vor.u32 %v1230_v12, %v1095_v13  ;;  %v1228_v23 = vld [vmem:[%s1426_s7 + $0xa4] sm:$0xf]  ;;  %v998_v25 = vor.u32 %v1205_v14, %v995_v17 }
  0x50   : > { %689 = vmatpush.bf16.msra.mxu1 %v1070_v45  ;;  %727 = vmatpush.bf16.msra.mxu3 %v1010_v50  ;;  %v1207_v19 = vld [vmem:[%s1428_s8 + $0x28] sm:$0xf0]  ;;  %v1162_v22 = vor.u32 %v1246_v15, %v1159_v16  ;;  %v1244_v27 = vld [vmem:[%s1426_s7 + $0x124] sm:$0xf]  ;;  %v1226_v31 = vld [vmem:[%s1426_s7 + $0x94] sm:$0xf] }
  0x51   : > { %708 = vmatpush.bf16.msra.mxu2 %v1134_v46  ;;  %v1087_v24 = vld [vmem:[%s1426_s7 + $0xa8] sm:$0xf0]  ;;  %v1002_v26 = vor.u32 %v1207_v19, %v1001_v18  ;;  %v1079_v32 = vld [vmem:[%s1426_s7 + $0x98] sm:$0xf0]  ;;  %v1242_v33 = vld [vmem:[%s1426_s7 + $0x114] sm:$0xf] }
  0x52   : > { %671 = vmatmul.bf16.vlgmr.msra.gmra.mxu0 %v982_v52  ;;  %v1151_v28 = vld [vmem:[%s1426_s7 + $0x128] sm:$0xf0]  ;;  %v1090_v29 = vor.u32 %v1228_v23, %v1087_v24  ;;  %v1143_v34 = vld [vmem:[%s1426_s7 + $0x118] sm:$0xf0]  ;;  %v1082_v35 = vor.u32 %v1226_v31, %v1079_v32  ;;  %v1224_v37 = vld [vmem:[%s1426_s7 + $0x84] sm:$0xf] }
  0x53   : > { %690 = vmatmul.bf16.vlgmr.msra.gmra.mxu1 %v1507_v56  ;;  %728 = vmatmul.bf16.vlgmr.msra.gmra.mxu3 %v982_v52  ;;  %v1154_v30 = vor.u32 %v1244_v27, %v1151_v28  ;;  %v1146_v36 = vor.u32 %v1242_v33, %v1143_v34  ;;  %v1071_v38 = vld [vmem:[%s1426_s7 + $0x88] sm:$0xf0]  ;;  %v1240_v39 = vld [vmem:[%s1426_s7 + $0x104] sm:$0xf]  ;;  %v327_v46 = vld [vmem:[#allocation2 + $0x30] sm:$0xff]  ;;  %p1195_p11 = scmp.ne.s32.totalorder %s1345_s14, 1 }
  0x54   : > { %758 = vmatpush.bf16.msrb.mxu1 %v1194_v53  ;;  %709 = vmatmul.bf16.vlgmr.msra.gmra.mxu2 %v1509_v57  ;;  %v1135_v40 = vld [vmem:[%s1426_s7 + $0x108] sm:$0xf0]  ;;  %v1074_v41 = vor.u32 %v1224_v37, %v1071_v38  ;;  %v329_v54 = vld [vmem:[#allocation2 + $0x18] sm:$0xff]  ;;  %v328_v14 = vld [vmem:[#allocation2] sm:$0xff] }
  0x55   : > { %1256 = vmatpush.bf16.msrb.mxu2 %v1130_v51  ;;  %739 = vmatpush.bf16.msrb.mxu0 %v1130_v51  ;;  %v1138_v42 = vor.u32 %v1240_v39, %v1135_v40  ;;  %v331_v62 = vld [vmem:[#allocation2 + $0x8] sm:$0xff]  ;;  %v330_v24 = vld [vmem:[#allocation2 + $0x10] sm:$0xff]  ;;  %v334_v31 = vld [vmem:[#allocation2 + $0x38] sm:$0xff] }
  0x56   : > { %1264 = vmatpush.bf16.msrb.mxu3 %v1194_v53  ;;  %v333_v6 = vld [vmem:[#allocation2 + $0x28] sm:$0xff] }
  0x58   : > { %759 = vmatpush.bf16.msrb.mxu1 %v1186_v61 }
  0x59   : > { %1257 = vmatpush.bf16.msrb.mxu2 %v1122_v60  ;;  %740 = vmatpush.bf16.msrb.mxu0 %v1122_v60 }
  0x5a   : > { %1265 = vmatpush.bf16.msrb.mxu3 %v1186_v61 }
  0x5c   : > { %760 = vmatpush.bf16.msrb.mxu1 %v1178_v3 }
  0x5d   : > { %1258 = vmatpush.bf16.msrb.mxu2 %v1114_v2  ;;  %741 = vmatpush.bf16.msrb.mxu0 %v1114_v2 }
  0x5e   : > { %1266 = vmatpush.bf16.msrb.mxu3 %v1178_v3 }
  0x60   : > { %761 = vmatpush.bf16.msrb.mxu1 %v1170_v10 }
  0x61   : > { %1259 = vmatpush.bf16.msrb.mxu2 %v1106_v8  ;;  %742 = vmatpush.bf16.msrb.mxu0 %v1106_v8 }
  0x62   : > { %1267 = vmatpush.bf16.msrb.mxu3 %v1170_v10  ;;  %676 = vmatmul.bf16.gmra.mxu0 %v994_v21 }
  0x63   : > { %695 = vmatmul.bf16.gmra.mxu1 %v998_v25  ;;  %733 = vmatmul.bf16.gmra.mxu3 %v994_v21 }
  0x64   : > { %762 = vmatpush.bf16.msrb.mxu1 %v1162_v22  ;;  %714 = vmatmul.bf16.gmra.mxu2 %v1002_v26 }
  0x65   : > { %1260 = vmatpush.bf16.msrb.mxu2 %v1098_v20  ;;  %743 = vmatpush.bf16.msrb.mxu0 %v1098_v20  ;;  %v332_v20 = vld [vmem:[#allocation2 + $0x20] sm:$0xff] }
  0x66   : > { %1268 = vmatpush.bf16.msrb.mxu3 %v1162_v22 }
  0x68   : > { %763 = vmatpush.bf16.msrb.mxu1 %v1154_v30 }
  0x69   : > { %1261 = vmatpush.bf16.msrb.mxu2 %v1090_v29  ;;  %744 = vmatpush.bf16.msrb.mxu0 %v1090_v29 }
  0x6a   : > { %1269 = vmatpush.bf16.msrb.mxu3 %v1154_v30 }
  0x6c   : > { %764 = vmatpush.bf16.msrb.mxu1 %v1146_v36 }
  0x6d   : > { %1262 = vmatpush.bf16.msrb.mxu2 %v1082_v35  ;;  %745 = vmatpush.bf16.msrb.mxu0 %v1082_v35 }
  0x6e   : > { %1270 = vmatpush.bf16.msrb.mxu3 %v1146_v36 }
  0x70   : > { %765 = vmatpush.bf16.msrb.mxu1 %v1138_v42 }
  0x71   : > { %1263 = vmatpush.bf16.msrb.mxu2 %v1074_v41  ;;  %746 = vmatpush.bf16.msrb.mxu0 %v1074_v41 }
  0x72   : > { %1271 = vmatpush.bf16.msrb.mxu3 %v1138_v42 }
  0x73   : > { %766 = vmatmul.bf16.vlgmr.msrb.gmra.mxu1 %v1509_v57 }
  0x74   : > { %747 = vmatmul.bf16.vlgmr.msrb.gmra.mxu0 %v1507_v56  ;;  %752 = vmatmul.bf16.vlgmr.msrb.gmra.mxu2 %v998_v25 }
  0x75   : > { %771 = vmatmul.bf16.vlgmr.msrb.gmra.mxu3 %v1002_v26 }
  0xcf   : > { %v672_v43 = vpop.f32.mrf.mxu0 }
  0xd0   : > { %v691_v44 = vpop.f32.mrf.mxu1 }
  0xd1   : > { %v692_v45 = vadd.f32 %v691_v44, %v672_v43 }
  0xd6   : > { %v729_v49 = vpop.f32.mrf.mxu3 }
  0xd7   : > { %v710_v47 = vpop.f32.mrf.mxu2  ;;  %v674_v50 = vpop.f32.mrf.mxu0 }
  0xd8   : > { %v711_v48 = vadd.f32 %v710_v47, %v692_v45  ;;  %v693_v51 = vpop.f32.mrf.mxu1 }
  0xd9   : > { %v694_v53 = vadd.f32 %v693_v51, %v674_v50 }
  0xda   : > { %v777_v52 = vadd.f32 %v711_v48, %v327_v46 }
  0xdc   : > { %785 = vst [vmem:[#allocation2 + $0x30] sm:$0xff] %v777_v52 }
  0xde   : > { %v731_v56 = vpop.f32.mrf.mxu3 }
  0xdf   : > { %v712_v55 = vpop.f32.mrf.mxu2  ;;  %v677_v59 = vpop.f32.mrf.mxu0 }
  0xe0   : > { %v713_v58 = vadd.f32 %v712_v55, %v694_v53  ;;  %v696_v60 = vpop.f32.mrf.mxu1 }
  0xe1   : > { %v697_v61 = vadd.f32 %v696_v60, %v677_v59 }
  0xe2   : > { %v779_v57 = vadd.f32 %v713_v58, %v329_v54 }
  0xe4   : > { %787 = vst [vmem:[#allocation2 + $0x18] sm:$0xff] %v779_v57 }
  0xe6   : > { %v734_v1 = vpop.f32.mrf.mxu3 }
  0xe7   : > { %v715_v63 = vpop.f32.mrf.mxu2  ;;  %v679_v2 = vpop.f32.mrf.mxu0 }
  0xe8   : > { %v716_v0 = vadd.f32 %v715_v63, %v697_v61  ;;  %v698_v3 = vpop.f32.mrf.mxu1 }
  0xe9   : > { %v699_v5 = vadd.f32 %v698_v3, %v679_v2 }
  0xea   : > { %v781_v4 = vadd.f32 %v716_v0, %v331_v62 }
  0xec   : > { %789 = vst [vmem:[#allocation2 + $0x8] sm:$0xff] %v781_v4 }
  0xee   : > { %v736_v9 = vpop.f32.mrf.mxu3 }
  0xef   : > { %v717_v7 = vpop.f32.mrf.mxu2 }
  0xf0   : > { %v718_v8 = vadd.f32 %v717_v7, %v699_v5  ;;  %v767_v13 = vpop.f32.mrf.mxu1 }
  0xf1   : > { %v748_v10 = vpop.f32.mrf.mxu0 }
  0xf2   : > { %v783_v11 = vadd.f32 %v718_v8, %v333_v6  ;;  %v749_v12 = vadd.f32 %v748_v10, %v729_v49 }
  0xf4   : > { %791 = vst [vmem:[#allocation2 + $0x28] sm:$0xff] %v783_v11  ;;  %v768_v15 = vadd.f32 %v767_v13, %v749_v12 }
  0xf6   : > { %v778_v16 = vadd.f32 %v768_v15, %v328_v14 }
  0xf7   : > { %v753_v17 = vpop.f32.mrf.mxu2 }
  0xf8   : > { %786 = vst [vmem:[#allocation2] sm:$0xff] %v778_v16  ;;  %v754_v18 = vadd.f32 %v753_v17, %v734_v1  ;;  %v772_v19 = vpop.f32.mrf.mxu3  ;;  %v769_v25 = vpop.f32.mrf.mxu1 }
  0xf9   : > { %v750_v21 = vpop.f32.mrf.mxu0 }
  0xfa   : > { %v773_v22 = vadd.f32 %v772_v19, %v754_v18  ;;  %v751_v23 = vadd.f32 %v750_v21, %v731_v56 }
  0xfc   : > { %v782_v26 = vadd.f32 %v773_v22, %v332_v20  ;;  %v770_v27 = vadd.f32 %v769_v25, %v751_v23 }
  0xfe   : > { %790 = vst [vmem:[#allocation2 + $0x20] sm:$0xff] %v782_v26  ;;  %v780_v28 = vadd.f32 %v770_v27, %v330_v24 }
  0xff   : > { %v755_v29 = vpop.f32.mrf.mxu2 }
 0x100   : > { %788 = vst [vmem:[#allocation2 + $0x10] sm:$0xff] %v780_v28  ;;  %v756_v30 = vadd.f32 %v755_v29, %v736_v9  ;;  %v774_v32 = vpop.f32.mrf.mxu3 }
 0x102   : > { %v775_v33 = vadd.f32 %v774_v32, %v756_v30  ;;  %796 = sbr.rel (%p1195_p11) target bundleno = 278 (0x116), region = 66 }
 0x104   : > { %v784_v34 = vadd.f32 %v775_v33, %v334_v31 }
 0x106   : > { %792 = vst [vmem:[#allocation2 + $0x38] sm:$0xff] %v784_v34 }
 0x107   : > { %v797_v35 = vld [vmem:[#allocation2 + $0x30] sm:$0xff]  ;;  %v805_v36 = vld [vmem:[%s1592_s2] sm:$0x3]  ;;  %v799_v40 = vld [vmem:[#allocation2 + $0x18] sm:$0xff] }
 0x108   : > { %v798_v37 = vld [vmem:[#allocation2] sm:$0xff]  ;;  %v807_v38 = vperm.slane %v805_v36, 0  ;;  %v808_v39 = vperm.slane %v805_v36, 1  ;;  %v800_v41 = vld [vmem:[#allocation2 + $0x10] sm:$0xff]  ;;  %v801_v42 = vld [vmem:[#allocation2 + $0x8] sm:$0xff] }
 0x109   : > { %v802_v43 = vld [vmem:[#allocation2 + $0x20] sm:$0xff]  ;;  %v803_v44 = vld [vmem:[#allocation2 + $0x28] sm:$0xff] }
 0x10a   : > { %v811_v45 = vadd.f32 %v807_v38, %v797_v35  ;;  %v812_v46 = vadd.f32 %v808_v39, %v798_v37  ;;  %v813_v47 = vadd.f32 %v807_v38, %v799_v40  ;;  %v814_v48 = vadd.f32 %v808_v39, %v800_v41 }
 0x10b   : > { %v815_v50 = vadd.f32 %v807_v38, %v801_v42  ;;  %v816_v51 = vadd.f32 %v808_v39, %v802_v43  ;;  %v817_v55 = vadd.f32 %v807_v38, %v803_v44 }
 0x10c   : > { %v819_v52 = vmax.f32 %v811_v45, 0.0  ;;  %v820_v53 = vmax.f32 %v812_v46, 0.0  ;;  %v821_v54 = vmax.f32 %v813_v47, 0.0  ;;  %v822_v58 = vmax.f32 %v814_v48, 0.0 }
 0x10d   : > { %v804_v49 = vld [vmem:[#allocation2 + $0x38] sm:$0xff]  ;;  %v823_v59 = vmax.f32 %v815_v50, 0.0  ;;  %v824_v60 = vmax.f32 %v816_v51, 0.0  ;;  %v825_v57 = vmax.f32 %v817_v55, 0.0 }
 0x10e   : > { %v818_v56 = vadd.f32 %v808_v39, %v804_v49  ;;  %827 = vst [vmem:[%s1593_s3] sm:$0xff] %v819_v52 }
 0x10f   : > { %828 = vst [vmem:[%s1593_s3 + $0x8] sm:$0xff] %v820_v53 }
 0x110   : > { %829 = vst [vmem:[%s1593_s3 + $0x10] sm:$0xff] %v821_v54  ;;  %v826_v61 = vmax.f32 %v818_v56, 0.0 }
 0x111   : > { %830 = vst [vmem:[%s1593_s3 + $0x18] sm:$0xff] %v822_v58 }
 0x112   : > { %831 = vst [vmem:[%s1593_s3 + $0x20] sm:$0xff] %v823_v59 }
 0x113   : > { %832 = vst [vmem:[%s1593_s3 + $0x28] sm:$0xff] %v824_v60 }
 0x114   : > { %833 = vst [vmem:[%s1593_s3 + $0x30] sm:$0xff] %v825_v57 }
 0x115   : > { %834 = vst [vmem:[%s1593_s3 + $0x38] sm:$0xff] %v826_v61 }
 0x116 PF: > { %s13_s16 = sadd.s32 1, %s1353_s16   ;;  %s1594_s12 = smov %s1341_s13 }
 0x117   : > { %p10_p12 = scmp.ge.s32.totalorder %s13_s16, 4   ;;  %s1595_s13 = smov %s1411_s20 }
 0x118   : > { %s1596_s14 = smov %s1349_s15  ;;  %s1597_s15 = smov %s1599_s17 }
 0x119   :  { %12 = sbr.rel (!%p10_p12) target bundleno = 3 (0x3), region = 113 }

// kernel: group_activity_classifier.5
= control target key start
LH: loop header
LB: loop body
LE: loop exit
PB: predicated region body
PF: predicated region fallthrough
CT: control target
= control target key end

     0   :  { %vm54_vm0 = vcmask 1043456   ;;  %vm103_vm1 = vcmask 1041409   ;;  %s1683_s0 = inlined_call_operand.vmem [shape: f32[2,4,256], index: 0, kind: input, shape index: {}]   ;;  %s1684_s1 = inlined_call_operand.vmem [shape: f32[2,4,128], index: 1, kind: input, shape index: {}]   ;;  %s1685_s2 = inlined_call_operand.vmem [shape: f32[2,384,256], index: 2, kind: input, shape index: {}]   ;;  %s1686_s3 = inlined_call_operand.vmem [shape: f32[256,128], index: 3, kind: input, shape index: {}]   ;;  %s1687_s4 = inlined_call_operand.vmem [shape: f32[1,128], index: 4, kind: input, shape index: {}]   ;;  %s1688_s5 = inlined_call_operand.vmem [shape: f32[1,128], index: 5, kind: input, shape index: {}]   ;;  %s1689_s6 = inlined_call_operand.vmem [shape: f32[1,128], index: 6, kind: input, shape index: {}]   ;;  %s1690_s7 = inlined_call_operand.vmem [shape: f32[1,128], index: 7, kind: input, shape index: {}]   ;;  %s1691_s8 = inlined_call_operand.vmem [shape: f32[1,128], index: 8, kind: input, shape index: {}]   ;;  %s1692_s9 = inlined_call_operand.vmem [shape: f32[128,128], index: 9, kind: input, shape index: {}]   ;;  %s1693_s10 = inlined_call_operand.vmem [shape: f32[1,128], index: 10, kind: input, shape index: {}]   ;;  %s1694_s11 = inlined_call_operand.hbm [shape: f32[2,128], index: 11, kind: output, shape index: {}]  }
   0x1   :  { %v142_v0 = vld [vmem:[%s1685_s2 + $0xf0] sm:$0xff]  ;;  %v140_v2 = vld [vmem:[%s1685_s2 + $0xe0] sm:$0xff]  ;;  %v143_v4 = vld [vmem:[%s1685_s2 + $0xf8] sm:$0xff] }
   0x2   :  { %v206_v1 = vld [vmem:[%s1685_s2 + $0x2f0] sm:$0xff]  ;;  %208 = vmatpush.msra.mxu0 %v142_v0  ;;  %v204_v3 = vld [vmem:[%s1685_s2 + $0x2e0] sm:$0xff]  ;;  %268 = vmatpush.msra.mxu3 %v143_v4  ;;  %v141_v7 = vld [vmem:[%s1685_s2 + $0xe8] sm:$0xff] }
   0x3   :  { %248 = vmatpush.msra.mxu2 %v206_v1  ;;  %v138_v5 = vld [vmem:[%s1685_s2 + $0xd0] sm:$0xff]  ;;  %v139_v9 = vld [vmem:[%s1685_s2 + $0xd8] sm:$0xff]  ;;  %v136_v10 = vld [vmem:[%s1685_s2 + $0xc0] sm:$0xff] }
   0x4   :  { %v202_v6 = vld [vmem:[%s1685_s2 + $0x2d0] sm:$0xff]  ;;  %209 = vmatpush.msra.mxu0 %v140_v2  ;;  %269 = vmatpush.msra.mxu3 %v141_v7  ;;  %v200_v11 = vld [vmem:[%s1685_s2 + $0x2c0] sm:$0xff]  ;;  %v137_v13 = vld [vmem:[%s1685_s2 + $0xc8] sm:$0xff] }
   0x5   :  { %249 = vmatpush.msra.mxu2 %v204_v3  ;;  %v174_v8 = vld [vmem:[%s1685_s2 + $0x1f0] sm:$0xff]  ;;  %v172_v12 = vld [vmem:[%s1685_s2 + $0x1e0] sm:$0xff]  ;;  %v135_v17 = vld [vmem:[%s1685_s2 + $0xb8] sm:$0xff] }
   0x6   :  { %228 = vmatpush.msra.mxu1 %v174_v8  ;;  %210 = vmatpush.msra.mxu0 %v138_v5  ;;  %v170_v14 = vld [vmem:[%s1685_s2 + $0x1d0] sm:$0xff]  ;;  %v168_v18 = vld [vmem:[%s1685_s2 + $0x1c0] sm:$0xff]  ;;  %v133_v21 = vld [vmem:[%s1685_s2 + $0xa8] sm:$0xff] }
   0x7   :  { %250 = vmatpush.msra.mxu2 %v202_v6  ;;  %270 = vmatpush.msra.mxu3 %v139_v9  ;;  %v134_v15 = vld [vmem:[%s1685_s2 + $0xb0] sm:$0xff]  ;;  %v132_v19 = vld [vmem:[%s1685_s2 + $0xa0] sm:$0xff]  ;;  %v131_v25 = vld [vmem:[%s1685_s2 + $0x98] sm:$0xff] }
   0x8   :  { %229 = vmatpush.msra.mxu1 %v172_v12  ;;  %v198_v16 = vld [vmem:[%s1685_s2 + $0x2b0] sm:$0xff]  ;;  %211 = vmatpush.msra.mxu0 %v136_v10  ;;  %v196_v20 = vld [vmem:[%s1685_s2 + $0x2a0] sm:$0xff]  ;;  %v129_v29 = vld [vmem:[%s1685_s2 + $0x88] sm:$0xff] }
   0x9   :  { %251 = vmatpush.msra.mxu2 %v200_v11  ;;  %271 = vmatpush.msra.mxu3 %v137_v13  ;;  %v166_v22 = vld [vmem:[%s1685_s2 + $0x1b0] sm:$0xff]  ;;  %v164_v26 = vld [vmem:[%s1685_s2 + $0x1a0] sm:$0xff]  ;;  %v127_v33 = vld [vmem:[%s1685_s2 + $0x78] sm:$0xff] }
   0xa   :  { %230 = vmatpush.msra.mxu1 %v170_v14  ;;  %212 = vmatpush.msra.mxu0 %v134_v15  ;;  %v130_v23 = vld [vmem:[%s1685_s2 + $0x90] sm:$0xff]  ;;  %v128_v27 = vld [vmem:[%s1685_s2 + $0x80] sm:$0xff]  ;;  %v125_v37 = vld [vmem:[%s1685_s2 + $0x68] sm:$0xff] }
   0xb   :  { %252 = vmatpush.msra.mxu2 %v198_v16  ;;  %272 = vmatpush.msra.mxu3 %v135_v17  ;;  %v194_v24 = vld [vmem:[%s1685_s2 + $0x290] sm:$0xff]  ;;  %v192_v28 = vld [vmem:[%s1685_s2 + $0x280] sm:$0xff]  ;;  %v123_v41 = vld [vmem:[%s1685_s2 + $0x58] sm:$0xff] }
   0xc   :  { %231 = vmatpush.msra.mxu1 %v168_v18  ;;  %213 = vmatpush.msra.mxu0 %v132_v19  ;;  %v162_v30 = vld [vmem:[%s1685_s2 + $0x190] sm:$0xff]  ;;  %v160_v34 = vld [vmem:[%s1685_s2 + $0x180] sm:$0xff]  ;;  %v121_v45 = vld [vmem:[%s1685_s2 + $0x48] sm:$0xff] }
   0xd   :  { %253 = vmatpush.msra.mxu2 %v196_v20  ;;  %273 = vmatpush.msra.mxu3 %v133_v21  ;;  %v126_v31 = vld [vmem:[%s1685_s2 + $0x70] sm:$0xff]  ;;  %v124_v35 = vld [vmem:[%s1685_s2 + $0x60] sm:$0xff]  ;;  %v119_v49 = vld [vmem:[%s1685_s2 + $0x38] sm:$0xff] }
   0xe   :  { %232 = vmatpush.msra.mxu1 %v166_v22  ;;  %214 = vmatpush.msra.mxu0 %v130_v23  ;;  %v190_v32 = vld [vmem:[%s1685_s2 + $0x270] sm:$0xff]  ;;  %v188_v36 = vld [vmem:[%s1685_s2 + $0x260] sm:$0xff]  ;;  %v117_v53 = vld [vmem:[%s1685_s2 + $0x28] sm:$0xff] }
   0xf   :  { %254 = vmatpush.msra.mxu2 %v194_v24  ;;  %274 = vmatpush.msra.mxu3 %v131_v25  ;;  %v158_v38 = vld [vmem:[%s1685_s2 + $0x170] sm:$0xff]  ;;  %v156_v42 = vld [vmem:[%s1685_s2 + $0x160] sm:$0xff]  ;;  %v115_v57 = vld [vmem:[%s1685_s2 + $0x18] sm:$0xff] }
  0x10   :  { %233 = vmatpush.msra.mxu1 %v164_v26  ;;  %215 = vmatpush.msra.mxu0 %v128_v27  ;;  %v122_v39 = vld [vmem:[%s1685_s2 + $0x50] sm:$0xff]  ;;  %v120_v43 = vld [vmem:[%s1685_s2 + $0x40] sm:$0xff]  ;;  %v175_v61 = vld [vmem:[%s1685_s2 + $0x1f8] sm:$0xff] }
  0x11   :  { %255 = vmatpush.msra.mxu2 %v192_v28  ;;  %275 = vmatpush.msra.mxu3 %v129_v29  ;;  %v186_v40 = vld [vmem:[%s1685_s2 + $0x250] sm:$0xff]  ;;  %v184_v44 = vld [vmem:[%s1685_s2 + $0x240] sm:$0xff]  ;;  %v113_v63 = vld [vmem:[%s1685_s2 + $0x8] sm:$0xff] }
  0x12   :  { %234 = vmatpush.msra.mxu1 %v162_v30  ;;  %216 = vmatpush.msra.mxu0 %v126_v31  ;;  %v154_v46 = vld [vmem:[%s1685_s2 + $0x150] sm:$0xff]  ;;  %v152_v50 = vld [vmem:[%s1685_s2 + $0x140] sm:$0xff]  ;;  %v173_v1 = vld [vmem:[%s1685_s2 + $0x1e8] sm:$0xff] }
  0x13   :  { %256 = vmatpush.msra.mxu2 %v190_v32  ;;  %276 = vmatpush.msra.mxu3 %v127_v33  ;;  %v118_v47 = vld [vmem:[%s1685_s2 + $0x30] sm:$0xff]  ;;  %v116_v51 = vld [vmem:[%s1685_s2 + $0x20] sm:$0xff]  ;;  %v171_v5 = vld [vmem:[%s1685_s2 + $0x1d8] sm:$0xff] }
  0x14   :  { %235 = vmatpush.msra.mxu1 %v160_v34  ;;  %217 = vmatpush.msra.mxu0 %v124_v35  ;;  %v182_v48 = vld [vmem:[%s1685_s2 + $0x230] sm:$0xff]  ;;  %v180_v52 = vld [vmem:[%s1685_s2 + $0x220] sm:$0xff]  ;;  %v207_v8 = vld [vmem:[%s1685_s2 + $0x2f8] sm:$0xff] }
  0x15   :  { %257 = vmatpush.msra.mxu2 %v188_v36  ;;  %277 = vmatpush.msra.mxu3 %v125_v37  ;;  %v150_v54 = vld [vmem:[%s1685_s2 + $0x130] sm:$0xff]  ;;  %v148_v58 = vld [vmem:[%s1685_s2 + $0x120] sm:$0xff]  ;;  %v169_v9 = vld [vmem:[%s1685_s2 + $0x1c8] sm:$0xff] }
  0x16   :  { %236 = vmatpush.msra.mxu1 %v158_v38  ;;  %218 = vmatpush.msra.mxu0 %v122_v39  ;;  %v114_v55 = vld [vmem:[%s1685_s2 + $0x10] sm:$0xff]  ;;  %v112_v59 = vld [vmem:[%s1685_s2] sm:$0xff]  ;;  %v205_v12 = vld [vmem:[%s1685_s2 + $0x2e8] sm:$0xff] }
  0x17   :  { %258 = vmatpush.msra.mxu2 %v186_v40  ;;  %278 = vmatpush.msra.mxu3 %v123_v41  ;;  %v178_v56 = vld [vmem:[%s1685_s2 + $0x210] sm:$0xff]  ;;  %v176_v60 = vld [vmem:[%s1685_s2 + $0x200] sm:$0xff]  ;;  %v167_v13 = vld [vmem:[%s1685_s2 + $0x1b8] sm:$0xff] }
  0x18   :  { %237 = vmatpush.msra.mxu1 %v156_v42  ;;  %219 = vmatpush.msra.mxu0 %v120_v43  ;;  %v742_v62 = vld [vmem:[%s1685_s2 + $0x3f0] sm:$0xff]  ;;  %v740_v2 = vld [vmem:[%s1685_s2 + $0x3e0] sm:$0xff]  ;;  %v165_v16 = vld [vmem:[%s1685_s2 + $0x1a8] sm:$0xff] }
  0x19   :  { %259 = vmatpush.msra.mxu2 %v184_v44  ;;  %279 = vmatpush.msra.mxu3 %v121_v45  ;;  %v146_v0 = vld [vmem:[%s1685_s2 + $0x110] sm:$0xff]  ;;  %v144_v4 = vld [vmem:[%s1685_s2 + $0x100] sm:$0xff]  ;;  %v203_v17 = vld [vmem:[%s1685_s2 + $0x2d8] sm:$0xff] }
  0x1a   :  { %238 = vmatpush.msra.mxu1 %v154_v46  ;;  %220 = vmatpush.msra.mxu0 %v118_v47  ;;  %v774_v3 = vld [vmem:[%s1685_s2 + $0x4f0] sm:$0xff]  ;;  %v772_v7 = vld [vmem:[%s1685_s2 + $0x4e0] sm:$0xff]  ;;  %v163_v20 = vld [vmem:[%s1685_s2 + $0x198] sm:$0xff] }
  0x1b   :  { %260 = vmatpush.msra.mxu2 %v182_v48  ;;  %280 = vmatpush.msra.mxu3 %v119_v49  ;;  %v738_v6 = vld [vmem:[%s1685_s2 + $0x3d0] sm:$0xff]  ;;  %v736_v10 = vld [vmem:[%s1685_s2 + $0x3c0] sm:$0xff]  ;;  %v201_v21 = vld [vmem:[%s1685_s2 + $0x2c8] sm:$0xff] }
  0x1c   :  { %239 = vmatpush.msra.mxu1 %v152_v50  ;;  %221 = vmatpush.msra.mxu0 %v116_v51  ;;  %v770_v11 = vld [vmem:[%s1685_s2 + $0x4d0] sm:$0xff]  ;;  %v768_v15 = vld [vmem:[%s1685_s2 + $0x4c0] sm:$0xff]  ;;  %v199_v24 = vld [vmem:[%s1685_s2 + $0x2b8] sm:$0xff] }
  0x1d   :  { %261 = vmatpush.msra.mxu2 %v180_v52  ;;  %281 = vmatpush.msra.mxu3 %v117_v53  ;;  %v734_v14 = vld [vmem:[%s1685_s2 + $0x3b0] sm:$0xff]  ;;  %v732_v18 = vld [vmem:[%s1685_s2 + $0x3a0] sm:$0xff]  ;;  %v40_v26 = vld [vmem:[%s1683_s0 + $0x8] sm:$0xff] }
  0x1e   :  { %240 = vmatpush.msra.mxu1 %v150_v54  ;;  %222 = vmatpush.msra.mxu0 %v114_v55  ;;  %v766_v19 = vld [vmem:[%s1685_s2 + $0x4b0] sm:$0xff]  ;;  %v764_v23 = vld [vmem:[%s1685_s2 + $0x4a0] sm:$0xff]  ;;  %v161_v29 = vld [vmem:[%s1685_s2 + $0x188] sm:$0xff]  ;;  %47 = vst [vmem:[#allocation1 + $0x10] ss:$2 sm:$0xff] %v40_v26 }
  0x1f   :  { %262 = vmatpush.msra.mxu2 %v178_v56  ;;  %282 = vmatpush.msra.mxu3 %v115_v57  ;;  %v730_v22 = vld [vmem:[%s1685_s2 + $0x390] sm:$0xff]  ;;  %v39_v25 = vld [vmem:[%s1683_s0] sm:$0xff]  ;;  %v197_v34 = vld [vmem:[%s1685_s2 + $0x2a8] sm:$0xff] }
  0x20   :  { %241 = vmatpush.msra.mxu1 %v148_v58  ;;  %223 = vmatpush.msra.mxu0 %v112_v59  ;;  %43 = vst [vmem:[#allocation1] ss:$2 sm:$0xff] %v39_v25  ;;  %v83_v27 = vld [vmem:[%s1684_s1] sm:$0xf]  ;;  %v84_v28 = vld [vmem:[%s1684_s1 + $0x4] sm:$0xf] }
  0x21   :  { %263 = vmatpush.msra.mxu2 %v176_v60  ;;  %283 = vmatpush.msra.mxu3 %v113_v63  ;;  %v728_v30 = vld [vmem:[%s1685_s2 + $0x380] sm:$0xff]  ;;  %v85_v31 = vsel %vm54_vm0, %v83_v27, -inf  ;;  %v92_v32 = vsel %vm54_vm0, %v84_v28, -inf  ;;  %v762_v33 = vld [vmem:[%s1685_s2 + $0x490] sm:$0xff]  ;;  %v159_v37 = vld [vmem:[%s1685_s2 + $0x178] sm:$0xff] }
  0x22   :  { %288 = vmatpush.msrb.mxu0 %v175_v61  ;;  %242 = vmatpush.msra.mxu1 %v146_v0  ;;  %v86_v35 = vrot.slane %v85_v31, 4  ;;  %v93_v36 = vrot.slane %v92_v32, 4  ;;  %v726_v38 = vld [vmem:[%s1685_s2 + $0x370] sm:$0xff]  ;;  %v760_v39 = vld [vmem:[%s1685_s2 + $0x480] sm:$0xff]  ;;  %v157_v40 = vld [vmem:[%s1685_s2 + $0x168] sm:$0xff] }
  0x23   :  { %425 = vmatpush.msrb.mxu2 %v742_v62  ;;  %445 = vmatpush.msrb.mxu3 %v774_v3  ;;  %v195_v41 = vld [vmem:[%s1685_s2 + $0x298] sm:$0xff]  ;;  %v724_v42 = vld [vmem:[%s1685_s2 + $0x360] sm:$0xff]  ;;  %v758_v45 = vld [vmem:[%s1685_s2 + $0x470] sm:$0xff] }
  0x24   :  { %289 = vmatpush.msrb.mxu0 %v173_v1  ;;  %243 = vmatpush.msra.mxu1 %v144_v4  ;;  %v87_v43 = vmax.f32 %v85_v31, %v86_v35  ;;  %v94_v44 = vmax.f32 %v92_v32, %v93_v36  ;;  %v155_v46 = vld [vmem:[%s1685_s2 + $0x158] sm:$0xff]  ;;  %v193_v47 = vld [vmem:[%s1685_s2 + $0x288] sm:$0xff]  ;;  %v722_v48 = vld [vmem:[%s1685_s2 + $0x350] sm:$0xff] }
  0x25   :  { %426 = vmatpush.msrb.mxu2 %v740_v2  ;;  %446 = vmatpush.msrb.mxu3 %v772_v7  ;;  %v756_v49 = vld [vmem:[%s1685_s2 + $0x460] sm:$0xff]  ;;  %v191_v50 = vld [vmem:[%s1685_s2 + $0x278] sm:$0xff]  ;;  %v153_v53 = vld [vmem:[%s1685_s2 + $0x148] sm:$0xff] }
  0x26   :  { %290 = vmatpush.msrb.mxu0 %v171_v5  ;;  %308 = vmatpush.msrb.mxu1 %v207_v8  ;;  %v88_v51 = vrot.slane %v87_v43, 2  ;;  %v95_v52 = vrot.slane %v94_v44, 2  ;;  %v720_v56 = vld [vmem:[%s1685_s2 + $0x340] sm:$0xff]  ;;  %v48_v57 = vld.sshfl [vmem:[#allocation1 + $0x10] sm:$0xff pattern:$0x75316420] }
  0x27   :  { %427 = vmatpush.msrb.mxu2 %v738_v6  ;;  %447 = vmatpush.msrb.mxu3 %v770_v11  ;;  %v44_v54 = vld.sshfl [vmem:[#allocation1] sm:$0xff pattern:$0x75316420]  ;;  %v45_v55 = vld.sshfl [vmem:[#allocation1 + $0x8] sm:$0xff pattern:$0x75316420] }
  0x28   :  { %291 = vmatpush.msrb.mxu0 %v169_v9  ;;  %309 = vmatpush.msrb.mxu1 %v205_v12  ;;  %v55_v58 = vsel %vm54_vm0, %v44_v54, -inf  ;;  %v89_v59 = vmax.f32 %v87_v43, %v88_v51  ;;  %v96_v60 = vmax.f32 %v94_v44, %v95_v52  ;;  %v62_v61 = vsel %vm54_vm0, %v45_v55, -inf  ;;  %v49_v0 = vld.sshfl [vmem:[#allocation1 + $0x18] sm:$0xff pattern:$0x75316420]  ;;  %v754_v2 = vld [vmem:[%s1685_s2 + $0x450] sm:$0xff] }
  0x29   :  { %428 = vmatpush.msrb.mxu2 %v736_v10  ;;  %448 = vmatpush.msrb.mxu3 %v768_v15  ;;  %v56_v62 = vrot.slane %v55_v58, 4  ;;  %v69_v63 = vsel %vm54_vm0, %v48_v57, -inf  ;;  %v63_v1 = vrot.slane %v62_v61, 4  ;;  %v189_v3 = vld [vmem:[%s1685_s2 + $0x268] sm:$0xff]  ;;  %v76_v7 = vsel %vm54_vm0, %v49_v0, -inf  ;;  %v151_v8 = vld [vmem:[%s1685_s2 + $0x138] sm:$0xff] }
  0x2a   :  { %292 = vmatpush.msrb.mxu0 %v167_v13  ;;  %310 = vmatpush.msrb.mxu1 %v203_v17  ;;  %v70_v4 = vrot.slane %v69_v63, 4  ;;  %v90_v5 = vrot.slane %v89_v59, 1  ;;  %v97_v6 = vrot.slane %v96_v60, 1  ;;  %v718_v9 = vld [vmem:[%s1685_s2 + $0x330] sm:$0xff]  ;;  %v77_v12 = vrot.slane %v76_v7, 4  ;;  %v752_v13 = vld [vmem:[%s1685_s2 + $0x440] sm:$0xff] }
  0x2b   :  { %429 = vmatpush.msrb.mxu2 %v734_v14  ;;  %449 = vmatpush.msrb.mxu3 %v766_v19  ;;  %v57_v10 = vmax.f32 %v55_v58, %v56_v62  ;;  %v64_v11 = vmax.f32 %v62_v61, %v63_v1  ;;  %v187_v14 = vld [vmem:[%s1685_s2 + $0x258] sm:$0xff]  ;;  %v716_v17 = vld [vmem:[%s1685_s2 + $0x320] sm:$0xff]  ;;  %v714_v27 = vld [vmem:[%s1685_s2 + $0x310] sm:$0xff] }
  0x2c   :  { %293 = vmatpush.msrb.mxu0 %v165_v16  ;;  %311 = vmatpush.msrb.mxu1 %v201_v21  ;;  %v71_v15 = vmax.f32 %v69_v63, %v70_v4  ;;  %v149_v16 = vld [vmem:[%s1685_s2 + $0x128] sm:$0xff]  ;;  %v750_v21 = vld [vmem:[%s1685_s2 + $0x430] sm:$0xff]  ;;  %v98_v25 = vmax.f32 %v96_v60, %v97_v6  ;;  %v147_v26 = vld [vmem:[%s1685_s2 + $0x118] sm:$0xff] }
  0x2d   :  { %430 = vmatpush.msrb.mxu2 %v732_v18  ;;  %450 = vmatpush.msrb.mxu3 %v764_v23  ;;  %v58_v18 = vrot.slane %v57_v10, 2  ;;  %v65_v19 = vrot.slane %v64_v11, 2  ;;  %v748_v31 = vld [vmem:[%s1685_s2 + $0x420] sm:$0xff]  ;;  %v183_v32 = vld [vmem:[%s1685_s2 + $0x238] sm:$0xff]  ;;  %v181_v44 = vld [vmem:[%s1685_s2 + $0x228] sm:$0xff] }
  0x2e   :  { %294 = vmatpush.msrb.mxu0 %v163_v20  ;;  %312 = vmatpush.msrb.mxu1 %v199_v24  ;;  %v78_v20 = vmax.f32 %v76_v7, %v77_v12  ;;  %v72_v23 = vrot.slane %v71_v15, 2  ;;  %v91_v24 = vmax.f32 %v89_v59, %v90_v5  ;;  %v712_v35 = vld [vmem:[%s1685_s2 + $0x300] sm:$0xff]  ;;  %v775_v43 = vld [vmem:[%s1685_s2 + $0x4f8] sm:$0xff]  ;;  %v773_v52 = vld [vmem:[%s1685_s2 + $0x4e8] sm:$0xff] }
  0x2f   :  { %431 = vmatpush.msrb.mxu2 %v730_v22  ;;  %451 = vmatpush.msrb.mxu3 %v762_v33  ;;  %v185_v22 = vld [vmem:[%s1685_s2 + $0x248] sm:$0xff]  ;;  %v59_v28 = vmax.f32 %v57_v10, %v58_v18  ;;  %v804_v54 = vld [vmem:[%s1685_s2 + $0x5e0] sm:$0xff]  ;;  %v807_v55 = vld [vmem:[%s1685_s2 + $0x5f8] sm:$0xff] }
  0x30   :  { %295 = vmatpush.msrb.mxu0 %v161_v29  ;;  %313 = vmatpush.msrb.mxu1 %v197_v34  ;;  %v66_v29 = vmax.f32 %v64_v11, %v65_v19  ;;  %v73_v33 = vmax.f32 %v71_v15, %v72_v23  ;;  %v145_v34 = vld [vmem:[%s1685_s2 + $0x108] sm:$0xff]  ;;  %v802_v57 = vld [vmem:[%s1685_s2 + $0x5d0] sm:$0xff]  ;;  %v771_v58 = vld [vmem:[%s1685_s2 + $0x4d8] sm:$0xff] }
  0x31   :  { %432 = vmatpush.msrb.mxu2 %v728_v30  ;;  %452 = vmatpush.msrb.mxu3 %v760_v39  ;;  %v79_v30 = vrot.slane %v78_v20, 2  ;;  %v60_v36 = vrot.slane %v59_v28, 1  ;;  %v746_v39 = vld [vmem:[%s1685_s2 + $0x410] sm:$0xff]  ;;  %v805_v59 = vld [vmem:[%s1685_s2 + $0x5e8] sm:$0xff]  ;;  %v800_v61 = vld [vmem:[%s1685_s2 + $0x5c0] sm:$0xff] }
  0x32   :  { %296 = vmatpush.msrb.mxu0 %v159_v37  ;;  %314 = vmatpush.msrb.mxu1 %v195_v41  ;;  %v67_v37 = vrot.slane %v66_v29, 1  ;;  %v1294_v41 = vsel %vm103_vm1, %v98_v25, %v91_v24  ;;  %v177_v60 = vld [vmem:[%s1685_s2 + $0x208] sm:$0xff]  ;;  %v743_v62 = vld [vmem:[%s1685_s2 + $0x3f8] sm:$0xff] }
  0x33   :  { %433 = vmatpush.msrb.mxu2 %v726_v38  ;;  %453 = vmatpush.msrb.mxu3 %v758_v45  ;;  %v80_v38 = vmax.f32 %v78_v20, %v79_v30  ;;  %v769_v63 = vld [vmem:[%s1685_s2 + $0x4c8] sm:$0xff]  ;;  %v803_v0 = vld [vmem:[%s1685_s2 + $0x5d8] sm:$0xff] }
  0x34   :  { %297 = vmatpush.msrb.mxu0 %v157_v40  ;;  %315 = vmatpush.msrb.mxu1 %v193_v47  ;;  %v74_v40 = vrot.slane %v73_v33, 1  ;;  %v68_v45 = vmax.f32 %v66_v29, %v67_v37 }
  0x35   :  { %434 = vmatpush.msrb.mxu2 %v724_v42  ;;  %454 = vmatpush.msrb.mxu3 %v756_v49  ;;  %v61_v42 = vmax.f32 %v59_v28, %v60_v36  ;;  %v806_v49 = vld [vmem:[%s1685_s2 + $0x5f0] sm:$0xff] }
  0x36   :  { %298 = vmatpush.msrb.mxu0 %v155_v46  ;;  %316 = vmatpush.msrb.mxu1 %v191_v50  ;;  %v81_v46 = vrot.slane %v80_v38, 1  ;;  %v75_v47 = vmax.f32 %v73_v33, %v74_v40 }
  0x37   :  { %435 = vmatpush.msrb.mxu2 %v722_v48  ;;  %455 = vmatpush.msrb.mxu3 %v754_v2  ;;  %v744_v48 = vld [vmem:[%s1685_s2 + $0x400] sm:$0xff] }
  0x38   :  { %299 = vmatpush.msrb.mxu0 %v153_v53  ;;  %317 = vmatpush.msrb.mxu1 %v189_v3  ;;  %v82_v50 = vmax.f32 %v80_v38, %v81_v46  ;;  %v1310_v51 = vsel %vm103_vm1, %v75_v47, %v61_v42 }
  0x39   :  { %436 = vmatpush.msrb.mxu2 %v720_v56  ;;  %456 = vmatpush.msrb.mxu3 %v752_v13  ;;  %v179_v56 = vld [vmem:[%s1685_s2 + $0x218] sm:$0xff] }
  0x3a   :  { %300 = vmatpush.msrb.mxu0 %v151_v8  ;;  %318 = vmatpush.msrb.mxu1 %v187_v14  ;;  %v1317_v53 = vsel %vm103_vm1, %v82_v50, %v68_v45 }
  0x3b   :  { %437 = vmatpush.msrb.mxu2 %v718_v9  ;;  %457 = vmatpush.msrb.mxu3 %v750_v21 }
  0x3c   :  { %301 = vmatpush.msrb.mxu0 %v149_v16  ;;  %319 = vmatpush.msrb.mxu1 %v185_v22 }
  0x3d   :  { %438 = vmatpush.msrb.mxu2 %v716_v17  ;;  %458 = vmatpush.msrb.mxu3 %v748_v31 }
  0x3e   :  { %302 = vmatpush.msrb.mxu0 %v147_v26  ;;  %320 = vmatpush.msrb.mxu1 %v183_v32 }
  0x3f   :  { %439 = vmatpush.msrb.mxu2 %v714_v27  ;;  %459 = vmatpush.msrb.mxu3 %v746_v39 }
  0x40   :  { %303 = vmatpush.msrb.mxu0 %v145_v34  ;;  %264 = vmatmul.f32.vlgmr.msra.gmra.mxu2 %v1294_v41 }
  0x41   :  { %440 = vmatpush.msrb.mxu2 %v712_v35  ;;  %321 = vmatpush.msrb.mxu1 %v181_v44 }
  0x42   :  { %224 = vmatmul.f32.vlgmr.msra.gmra.mxu0 %v1310_v51  ;;  %460 = vmatpush.msrb.mxu3 %v744_v48 }
  0x43   :  { %505 = vmatpush.msra.mxu2 %v775_v43  ;;  %465 = vmatpush.msra.mxu0 %v806_v49 }
  0x44   :  { %244 = vmatmul.f32.vlgmr.msra.gmra.mxu1 %v1317_v53  ;;  %284 = vmatmul.f32.vlgmr.msra.gmra.mxu3 %v1310_v51 }
  0x45   :  { %506 = vmatpush.msra.mxu2 %v773_v52  ;;  %466 = vmatpush.msra.mxu0 %v804_v54 }
  0x46   :  { %525 = vmatpush.msra.mxu3 %v807_v55  ;;  %322 = vmatpush.msrb.mxu1 %v179_v56 }
  0x47   :  { %507 = vmatpush.msra.mxu2 %v771_v58  ;;  %467 = vmatpush.msra.mxu0 %v802_v57 }
  0x48   :  { %526 = vmatpush.msra.mxu3 %v805_v59 }
  0x49   :  { %16 = vsyncpa [#allocation3], 0  ;;  %323 = vmatpush.msrb.mxu1 %v177_v60  ;;  %508 = vmatpush.msra.mxu2 %v769_v63  ;;  %v798_v1 = vld [vmem:[%s1685_s2 + $0x5b0] sm:$0xff]  ;;  %v741_v2 = vld [vmem:[%s1685_s2 + $0x3e8] sm:$0xff]  ;;  %s703_s24 = sshll.u32 %s1694_s11, 4  ;;  %s704_s24 = int_to_ptr.hbm [resolvable:$true] %s703_s24 }
  0x4a   :  { %468 = vmatpush.msra.mxu0 %v800_v61  ;;  %v767_v3 = vld [vmem:[%s1685_s2 + $0x4b8] sm:$0xff]  ;;  %v801_v4 = vld [vmem:[%s1685_s2 + $0x5c8] sm:$0xff]  ;;  %527 = vmatpush.msra.mxu3 %v803_v0  ;;  %v796_v5 = vld [vmem:[%s1685_s2 + $0x5a0] sm:$0xff] }
  0x4b   :  { %485 = vmatpush.msra.mxu1 %v743_v62  ;;  %304 = vmatmul.f32.vlgmr.msrb.gmra.mxu0 %v1317_v53  ;;  %v739_v6 = vld [vmem:[%s1685_s2 + $0x3d8] sm:$0xff]  ;;  %v765_v7 = vld [vmem:[%s1685_s2 + $0x4a8] sm:$0xff]  ;;  %v794_v9 = vld [vmem:[%s1685_s2 + $0x590] sm:$0xff] }
  0x4c   :  { %469 = vmatpush.msra.mxu0 %v798_v1  ;;  %509 = vmatpush.msra.mxu2 %v767_v3  ;;  %v799_v8 = vld [vmem:[%s1685_s2 + $0x5b8] sm:$0xff]  ;;  %v737_v10 = vld [vmem:[%s1685_s2 + $0x3c8] sm:$0xff]  ;;  %v792_v13 = vld [vmem:[%s1685_s2 + $0x580] sm:$0xff] }
  0x4d   :  { %486 = vmatpush.msra.mxu1 %v741_v2  ;;  %528 = vmatpush.msra.mxu3 %v801_v4  ;;  %v763_v11 = vld [vmem:[%s1685_s2 + $0x498] sm:$0xff]  ;;  %v797_v12 = vld [vmem:[%s1685_s2 + $0x5a8] sm:$0xff]  ;;  %v790_v17 = vld [vmem:[%s1685_s2 + $0x570] sm:$0xff] }
  0x4e   :  { %324 = vmatmul.f32.vlgmr.msrb.gmra.mxu1 %v1294_v41  ;;  %470 = vmatpush.msra.mxu0 %v796_v5  ;;  %v735_v14 = vld [vmem:[%s1685_s2 + $0x3b8] sm:$0xff]  ;;  %v761_v15 = vld [vmem:[%s1685_s2 + $0x488] sm:$0xff]  ;;  %v788_v21 = vld [vmem:[%s1685_s2 + $0x560] sm:$0xff] }
  0x4f   :  { %487 = vmatpush.msra.mxu1 %v739_v6  ;;  %510 = vmatpush.msra.mxu2 %v765_v7  ;;  %v795_v16 = vld [vmem:[%s1685_s2 + $0x598] sm:$0xff]  ;;  %v733_v18 = vld [vmem:[%s1685_s2 + $0x3a8] sm:$0xff]  ;;  %v786_v25 = vld [vmem:[%s1685_s2 + $0x550] sm:$0xff] }
  0x50   :  { %529 = vmatpush.msra.mxu3 %v799_v8  ;;  %471 = vmatpush.msra.mxu0 %v794_v9  ;;  %v759_v19 = vld [vmem:[%s1685_s2 + $0x478] sm:$0xff]  ;;  %v793_v20 = vld [vmem:[%s1685_s2 + $0x588] sm:$0xff]  ;;  %v784_v29 = vld [vmem:[%s1685_s2 + $0x540] sm:$0xff] }
  0x51   :  { %488 = vmatpush.msra.mxu1 %v737_v10  ;;  %511 = vmatpush.msra.mxu2 %v763_v11  ;;  %v731_v22 = vld [vmem:[%s1685_s2 + $0x398] sm:$0xff]  ;;  %v757_v23 = vld [vmem:[%s1685_s2 + $0x468] sm:$0xff]  ;;  %v782_v33 = vld [vmem:[%s1685_s2 + $0x530] sm:$0xff] }
  0x52   :  { %530 = vmatpush.msra.mxu3 %v797_v12  ;;  %472 = vmatpush.msra.mxu0 %v792_v13  ;;  %v791_v24 = vld [vmem:[%s1685_s2 + $0x578] sm:$0xff]  ;;  %v729_v26 = vld [vmem:[%s1685_s2 + $0x388] sm:$0xff]  ;;  %v780_v37 = vld [vmem:[%s1685_s2 + $0x520] sm:$0xff] }
  0x53   :  { %489 = vmatpush.msra.mxu1 %v735_v14  ;;  %512 = vmatpush.msra.mxu2 %v761_v15  ;;  %v755_v27 = vld [vmem:[%s1685_s2 + $0x458] sm:$0xff]  ;;  %v789_v28 = vld [vmem:[%s1685_s2 + $0x568] sm:$0xff]  ;;  %v778_v42 = vld [vmem:[%s1685_s2 + $0x510] sm:$0xff] }
  0x54   :  { %531 = vmatpush.msra.mxu3 %v795_v16  ;;  %473 = vmatpush.msra.mxu0 %v790_v17  ;;  %v727_v30 = vld [vmem:[%s1685_s2 + $0x378] sm:$0xff]  ;;  %v753_v31 = vld [vmem:[%s1685_s2 + $0x448] sm:$0xff]  ;;  %v776_v46 = vld [vmem:[%s1685_s2 + $0x500] sm:$0xff] }
  0x55   :  { %490 = vmatpush.msra.mxu1 %v733_v18  ;;  %513 = vmatpush.msra.mxu2 %v759_v19  ;;  %v787_v32 = vld [vmem:[%s1685_s2 + $0x558] sm:$0xff]  ;;  %v725_v34 = vld [vmem:[%s1685_s2 + $0x368] sm:$0xff]  ;;  %v577_v59 = vld [vmem:[%s1686_s3 + $0xf0] sm:$0xff] }
  0x56   :  { %532 = vmatpush.msra.mxu3 %v793_v20  ;;  %474 = vmatpush.msra.mxu0 %v788_v21  ;;  %v751_v35 = vld [vmem:[%s1685_s2 + $0x438] sm:$0xff]  ;;  %v785_v36 = vld [vmem:[%s1685_s2 + $0x548] sm:$0xff]  ;;  %v557_v60 = vld [vmem:[%s1686_s3 + $0x50] sm:$0xff] }
  0x57   :  { %491 = vmatpush.msra.mxu1 %v731_v22  ;;  %514 = vmatpush.msra.mxu2 %v757_v23  ;;  %v723_v38 = vld [vmem:[%s1685_s2 + $0x358] sm:$0xff]  ;;  %v749_v39 = vld [vmem:[%s1685_s2 + $0x428] sm:$0xff]  ;;  %v575_v63 = vld [vmem:[%s1686_s3 + $0xe0] sm:$0xff] }
  0x58   :  { %533 = vmatpush.msra.mxu3 %v791_v24  ;;  %475 = vmatpush.msra.mxu0 %v786_v25  ;;  %v783_v40 = vld [vmem:[%s1685_s2 + $0x538] sm:$0xff]  ;;  %v721_v43 = vld [vmem:[%s1685_s2 + $0x348] sm:$0xff]  ;;  %v555_v0 = vld [vmem:[%s1686_s3 + $0x40] sm:$0xff] }
  0x59   :  { %492 = vmatpush.msra.mxu1 %v729_v26  ;;  %515 = vmatpush.msra.mxu2 %v755_v27  ;;  %v747_v44 = vld [vmem:[%s1685_s2 + $0x418] sm:$0xff]  ;;  %v781_v45 = vld [vmem:[%s1685_s2 + $0x528] sm:$0xff]  ;;  %v573_v3 = vld [vmem:[%s1686_s3 + $0xd0] sm:$0xff] }
  0x5a   :  { %534 = vmatpush.msra.mxu3 %v789_v28  ;;  %476 = vmatpush.msra.mxu0 %v784_v29  ;;  %v719_v47 = vld [vmem:[%s1685_s2 + $0x338] sm:$0xff]  ;;  %v745_v48 = vld [vmem:[%s1685_s2 + $0x408] sm:$0xff]  ;;  %v553_v4 = vld [vmem:[%s1686_s3 + $0x30] sm:$0xff] }
  0x5b   :  { %493 = vmatpush.msra.mxu1 %v727_v30  ;;  %516 = vmatpush.msra.mxu2 %v753_v31  ;;  %v779_v49 = vld [vmem:[%s1685_s2 + $0x518] sm:$0xff]  ;;  %v717_v50 = vld [vmem:[%s1685_s2 + $0x328] sm:$0xff]  ;;  %v571_v7 = vld [vmem:[%s1686_s3 + $0xc0] sm:$0xff] }
  0x5c   :  { %535 = vmatpush.msra.mxu3 %v787_v32  ;;  %441 = vmatmul.f32.vlgmr.msrb.gmra.mxu2 %v1310_v51  ;;  %v777_v52 = vld [vmem:[%s1685_s2 + $0x508] sm:$0xff]  ;;  %v715_v54 = vld [vmem:[%s1685_s2 + $0x318] sm:$0xff]  ;;  %v551_v8 = vld [vmem:[%s1686_s3 + $0x20] sm:$0xff] }
  0x5d   :  { %461 = vmatmul.f32.vlgmr.msrb.gmra.mxu3 %v1317_v53  ;;  %477 = vmatpush.msra.mxu0 %v782_v33  ;;  %v713_v55 = vld [vmem:[%s1685_s2 + $0x308] sm:$0xff]  ;;  %v562_v56 = vld [vmem:[%s1686_s3 + $0x78] sm:$0xff]  ;;  %v549_v11 = vld [vmem:[%s1686_s3 + $0x10] sm:$0xff] }
  0x5e   :  { %494 = vmatpush.msra.mxu1 %v725_v34  ;;  %517 = vmatpush.msra.mxu2 %v751_v35  ;;  %v560_v57 = vld [vmem:[%s1686_s3 + $0x68] sm:$0xff]  ;;  %v578_v58 = vld [vmem:[%s1686_s3 + $0xf8] sm:$0xff]  ;;  %v569_v12 = vld [vmem:[%s1686_s3 + $0xb0] sm:$0xff] }
  0x5f   :  { %536 = vmatpush.msra.mxu3 %v785_v36  ;;  %478 = vmatpush.msra.mxu0 %v780_v37  ;;  %v576_v61 = vld [vmem:[%s1686_s3 + $0xe8] sm:$0xff]  ;;  %v574_v1 = vld [vmem:[%s1686_s3 + $0xd8] sm:$0xff]  ;;  %v547_v15 = vld [vmem:[%s1686_s3] sm:$0xff] }
  0x60   :  { %495 = vmatpush.msra.mxu1 %v723_v38  ;;  %518 = vmatpush.msra.mxu2 %v749_v39  ;;  %v556_v62 = vld [vmem:[%s1686_s3 + $0x48] sm:$0xff]  ;;  %v554_v2 = vld [vmem:[%s1686_s3 + $0x38] sm:$0xff]  ;;  %v567_v16 = vld [vmem:[%s1686_s3 + $0xa0] sm:$0xff] }
  0x61   :  { %537 = vmatpush.msra.mxu3 %v783_v40  ;;  %479 = vmatpush.msra.mxu0 %v778_v42  ;;  %v572_v5 = vld [vmem:[%s1686_s3 + $0xc8] sm:$0xff]  ;;  %v550_v9 = vld [vmem:[%s1686_s3 + $0x18] sm:$0xff]  ;;  %v565_v18 = vld [vmem:[%s1686_s3 + $0x90] sm:$0xff] }
  0x62   :  { %496 = vmatpush.msra.mxu1 %v721_v43  ;;  %519 = vmatpush.msra.mxu2 %v747_v44  ;;  %v552_v6 = vld [vmem:[%s1686_s3 + $0x28] sm:$0xff]  ;;  %v570_v10 = vld [vmem:[%s1686_s3 + $0xb8] sm:$0xff]  ;;  %v563_v20 = vld [vmem:[%s1686_s3 + $0x80] sm:$0xff] }
  0x63   :  { %538 = vmatpush.msra.mxu3 %v781_v45  ;;  %480 = vmatpush.msra.mxu0 %v776_v46  ;;  %v548_v13 = vld [vmem:[%s1686_s3 + $0x8] sm:$0xff]  ;;  %v566_v17 = vld [vmem:[%s1686_s3 + $0x98] sm:$0xff]  ;;  %v669_v23 = vld [vmem:[%s1692_s9 + $0x70] sm:$0xff] }
  0x64   :  { %497 = vmatpush.msra.mxu1 %v719_v47  ;;  %520 = vmatpush.msra.mxu2 %v745_v48  ;;  %v568_v14 = vld [vmem:[%s1686_s3 + $0xa8] sm:$0xff]  ;;  %v670_v22 = vld [vmem:[%s1692_s9 + $0x78] sm:$0xff]  ;;  %v667_v25 = vld [vmem:[%s1692_s9 + $0x60] sm:$0xff] }
  0x65   :  { %539 = vmatpush.msra.mxu3 %v779_v49  ;;  %481 = vmatmul.f32.vlgmr.msra.gmra.mxu0 %v1294_v41  ;;  %v564_v19 = vld [vmem:[%s1686_s3 + $0x88] sm:$0xff]  ;;  %v666_v27 = vld [vmem:[%s1692_s9 + $0x58] sm:$0xff]  ;;  %v665_v49 = vld [vmem:[%s1692_s9 + $0x50] sm:$0xff] }
  0x66   :  { %521 = vmatmul.f32.vlgmr.msra.gmra.mxu2 %v1317_v53  ;;  %498 = vmatpush.msra.mxu1 %v717_v50  ;;  %v561_v53 = vld [vmem:[%s1686_s3 + $0x70] sm:$0xff]  ;;  %v668_v24 = vld [vmem:[%s1692_s9 + $0x68] sm:$0xff] }
  0x67   :  { %540 = vmatpush.msra.mxu3 %v777_v52  ;;  %583 = vmatpush.msrb.mxu0 %v562_v56  ;;  %v664_v50 = vld [vmem:[%s1692_s9 + $0x48] sm:$0xff]  ;;  %v663_v52 = vld [vmem:[%s1692_s9 + $0x40] sm:$0xff] }
  0x68   :  { %541 = vmatmul.f32.vlgmr.msra.gmra.mxu3 %v1294_v41  ;;  %499 = vmatpush.msra.mxu1 %v715_v54  ;;  %v559_v41 = vld [vmem:[%s1686_s3 + $0x60] sm:$0xff] }
  0x69   :  { %584 = vmatpush.msrb.mxu0 %v561_v53  ;;  %675 = vmatpush.msrb.mxu2 %v670_v22  ;;  %v628_v54 = vld [vmem:[%s1691_s8] sm:$0x1]  ;;  %v661_v53 = vld [vmem:[%s1692_s9 + $0x30] sm:$0xff] }
  0x6a   :  { %500 = vmatpush.msra.mxu1 %v713_v55  ;;  %v662_v55 = vld [vmem:[%s1692_s9 + $0x38] sm:$0xff]  ;;  %v629_v56 = vadd.f32 1e-05, %v628_v54 }
  0x6b   :  { %501 = vmatmul.f32.vlgmr.msra.gmra.mxu1 %v1310_v51  ;;  %585 = vmatpush.msrb.mxu0 %v560_v57  ;;  %v558_v51 = vld [vmem:[%s1686_s3 + $0x58] sm:$0xff]  ;;  %v660_v57 = vld [vmem:[%s1692_s9 + $0x28] sm:$0xff] }
  0x6c   :  { %603 = vmatpush.msrb.mxu1 %v578_v58  ;;  %676 = vmatpush.msrb.mxu2 %v669_v23  ;;  %814 = vrsqrt.f32 %v629_v56  ;;  %vm636_vm2 = vweird.f32 %v629_v56 }
  0x6d   :  { %586 = vmatpush.msrb.mxu0 %v559_v41  ;;  %v659_v41 = vld [vmem:[%s1692_s9 + $0x20] sm:$0xff] }
  0x6e   :  { %604 = vmatpush.msrb.mxu1 %v577_v59  ;;  %677 = vmatpush.msrb.mxu2 %v668_v24  ;;  %v657_v59 = vld [vmem:[%s1692_s9 + $0x10] sm:$0xff] }
  0x6f   :  { %587 = vmatpush.msrb.mxu0 %v558_v51  ;;  %v658_v51 = vld [vmem:[%s1692_s9 + $0x18] sm:$0xff] }
  0x70   :  { %605 = vmatpush.msrb.mxu1 %v576_v61  ;;  %678 = vmatpush.msrb.mxu2 %v667_v25  ;;  %v655_v61 = vld [vmem:[%s1692_s9] sm:$0xff] }
  0x71   :  { %588 = vmatpush.msrb.mxu0 %v557_v60  ;;  %v656_v60 = vld [vmem:[%s1692_s9 + $0x8] sm:$0xff] }
  0x72   :  { %606 = vmatpush.msrb.mxu1 %v575_v63  ;;  %679 = vmatpush.msrb.mxu2 %v666_v27  ;;  %v815_v58 = vpop.eup %814 }
  0x73   :  { %589 = vmatpush.msrb.mxu0 %v556_v62  ;;  %v631_v62 = vmul.f32 %v815_v58, %v629_v56  ;;  %vm637_vm3 = vweird.f32 %v815_v58 }
  0x74   :  { %607 = vmatpush.msrb.mxu1 %v574_v1  ;;  %680 = vmatpush.msrb.mxu2 %v665_v49  ;;  %vm638_vm4 = vmor %vm636_vm2, %vm637_vm3 }
  0x75   :  { %590 = vmatpush.msrb.mxu0 %v555_v0  ;;  %v632_v63 = vmul.f32 %v815_v58, %v631_v62 }
  0x76   :  { %608 = vmatpush.msrb.mxu1 %v573_v3  ;;  %681 = vmatpush.msrb.mxu2 %v664_v50  ;;  %v809_v3 = vld [vmem:[%s1687_s4] ss:$0 sm:$0xff] }
  0x77   :  { %591 = vmatpush.msrb.mxu0 %v554_v2  ;;  %v633_v0 = vmul.f32 0.5, %v632_v63 }
  0x78   :  { %609 = vmatpush.msrb.mxu1 %v572_v5  ;;  %682 = vmatpush.msrb.mxu2 %v663_v52 }
  0x79   :  { %592 = vmatpush.msrb.mxu0 %v553_v4  ;;  %v634_v1 = vsub.f32 1.5, %v633_v0 }
  0x7a   :  { %610 = vmatpush.msrb.mxu1 %v571_v7  ;;  %683 = vmatpush.msrb.mxu2 %v662_v55  ;;  %v810_v7 = vld [vmem:[%s1690_s7] ss:$0 sm:$0xff]  ;;  %s842_s7 = smov [#allocation2]  }
  0x7b   :  { %593 = vmatpush.msrb.mxu0 %v552_v6  ;;  %v635_v2 = vmul.f32 %v815_v58, %v634_v1  ;;  %s701_s21 = sshll.u32 %s842_s7, 4  ;;  %s702_s21 = int_to_ptr.vmem [resolvable:$true] %s701_s21 }
  0x7c   :  { %611 = vmatpush.msrb.mxu1 %v570_v10  ;;  %684 = vmatpush.msrb.mxu2 %v661_v53 }
  0x7d   :  { %594 = vmatpush.msrb.mxu0 %v551_v8  ;;  %v639_v5 = vsel %vm638_vm4, %v815_v58, %v635_v2 }
  0x7e   :  { %612 = vmatpush.msrb.mxu1 %v569_v12  ;;  %685 = vmatpush.msrb.mxu2 %v660_v57  ;;  %v641_v10 = vperm.slane %v639_v5, 0  ;;  %v811_v12 = vld [vmem:[%s1688_s5] ss:$0 sm:$0xff] }
  0x7f   :  { %595 = vmatpush.msrb.mxu0 %v550_v9 }
  0x80   :  { %613 = vmatpush.msrb.mxu1 %v568_v14  ;;  %686 = vmatpush.msrb.mxu2 %v659_v41  ;;  %v812_v14 = vld [vmem:[%s1689_s6] ss:$0 sm:$0xff] }
  0x81   :  { %596 = vmatpush.msrb.mxu0 %v549_v11 }
  0x82   :  { %614 = vmatpush.msrb.mxu1 %v567_v16  ;;  %687 = vmatpush.msrb.mxu2 %v658_v51 }
  0x83   :  { %597 = vmatpush.msrb.mxu0 %v548_v13 }
  0x84   :  { %615 = vmatpush.msrb.mxu1 %v566_v17  ;;  %688 = vmatpush.msrb.mxu2 %v657_v59 }
  0x85   :  { %598 = vmatpush.msrb.mxu0 %v547_v15 }
  0x86   :  { %616 = vmatpush.msrb.mxu1 %v565_v18  ;;  %689 = vmatpush.msrb.mxu2 %v656_v60  ;;  %v813_v18 = vld [vmem:[%s1693_s10] ss:$0 sm:$0xff] }
  0x88   :  { %617 = vmatpush.msrb.mxu1 %v564_v19  ;;  %690 = vmatpush.msrb.mxu2 %v655_v61 }
  0x8a   :  { %618 = vmatpush.msrb.mxu1 %v563_v20 }
  0xbf   :  { %v225_v21 = vpop.f32.mrf.mxu0 }
  0xc1   :  { %v245_v26 = vpop.f32.mrf.mxu1 }
  0xc2   :  { %v246_v31 = vadd.f32 %v245_v26, %v225_v21 }
  0xc3   :  { %v265_v28 = vpop.f32.mrf.mxu2 }
  0xc4   :  { %v266_v37 = vadd.f32 %v265_v28, %v246_v31 }
  0xc7   :  { %v285_v29 = vpop.f32.mrf.mxu3 }
  0xc8   :  { %v305_v30 = vpop.f32.mrf.mxu0 }
  0xc9   :  { %v306_v40 = vadd.f32 %v305_v30, %v285_v29 }
  0xcb   :  { %v325_v33 = vpop.f32.mrf.mxu1 }
  0xcc   :  { %v326_v46 = vadd.f32 %v325_v33, %v306_v40 }
  0xdf   :  { %v442_v32 = vpop.f32.mrf.mxu2 }
  0xe0   :  { %v462_v34 = vpop.f32.mrf.mxu3 }
  0xe1   :  { %v463_v35 = vadd.f32 %v462_v34, %v442_v32 }
  0xe2   :  { %v482_v36 = vpop.f32.mrf.mxu0 }
  0xe3   :  { %v483_v38 = vadd.f32 %v482_v36, %v463_v35 }
  0xe5   :  { %v545_v39 = vmax.f32 %v266_v37, %v483_v38 }
  0xe7   :  { %599 = vmatmul.f32.vlgmr.msrb.gmra.mxu0 %v545_v39 }
  0xe8   :  { %v502_v42 = vpop.f32.mrf.mxu1 }
  0xe9   :  { %v522_v43 = vpop.f32.mrf.mxu2 }
  0xea   :  { %v523_v44 = vadd.f32 %v522_v43, %v502_v42 }
  0xeb   :  { %v542_v45 = vpop.f32.mrf.mxu3 }
  0xec   :  { %v543_v47 = vadd.f32 %v542_v45, %v523_v44 }
  0xee   :  { %v546_v48 = vmax.f32 %v326_v46, %v543_v47 }
  0xf0   :  { %619 = vmatmul.f32.vlgmr.msrb.gmra.mxu1 %v546_v48 }
 0x164   :  { %v600_v4 = vpop.f32.mrf.mxu0 }
 0x165   :  { %v601_v6 = vadd.f32 %v809_v3, %v600_v4 }
 0x16d   :  { %v620_v8 = vpop.f32.mrf.mxu1 }
 0x16e   :  { %v621_v9 = vadd.f32 %v620_v8, %v601_v6 }
 0x170   :  { %v627_v11 = vsub.f32 %v621_v9, %v810_v7 }
 0x172   :  { %v643_v13 = vmul.f32 %v641_v10, %v627_v11 }
 0x174   :  { %v648_v15 = vmul.f32 %v811_v12, %v643_v13 }
 0x176   :  { %v653_v16 = vadd.f32 %v812_v14, %v648_v15 }
 0x178   :  { %v654_v17 = vmax.f32 %v653_v16, 0.0 }
 0x17a   :  { %691 = vmatmul.f32.vlgmr.msrb.gmra.mxu2 %v654_v17 }
 0x1fd   :  { %v692_v19 = vpop.f32.mrf.mxu2 }
 0x1fe   :  { %v693_v20 = vadd.f32 %v813_v18, %v692_v19 }
 0x200   :  { %695 = vst [vmem:[#allocation2] sm:$0x3] %v693_v20 }
 0x201   :  { %706 = dma.vmem_to_hbm [thread:$0]  %s702_s21, 32, %s704_s24, [#allocation3]  }
 0x202   :  { %840 = dma.done.wait [#allocation3], 32  }
 0x203   :  { %841 = vsyncadd [#allocation3], 4294967264 }
 0x204   :  { %711 = vsyncpa [#allocation3], 1 }

// kernel: group_activity_classifier.4
= control target key start
LH: loop header
LB: loop body
LE: loop exit
PB: predicated region body
PF: predicated region fallthrough
CT: control target
= control target key end

     0   :  { %s3420_s1 = inlined_call_operand.vmem [shape: bf16[384,512], index: 1, kind: input, shape index: {}]   ;;  %s3421_s0 = inlined_call_operand.vmem [shape: f32[8,1024], index: 0, kind: input, shape index: {}]   ;;  %s3422_s2 = inlined_call_operand.vmem [shape: f32[1,512], index: 2, kind: input, shape index: {}]   ;;  %s3423_s3 = inlined_call_operand.vmem [shape: f32[8,256], index: 3, kind: output, shape index: {0}]   ;;  %s3424_s4 = inlined_call_operand.vmem [shape: f32[8,128], index: 4, kind: output, shape index: {1}]  }
   0x1   :  { %v1623_v0 = vld [vmem:[%s3420_s1 + $0xe0] sm:$0xf]  ;;  %v1935_v1 = vld [vmem:[%s3420_s1 + $0xec] sm:$0xf0]  ;;  %v1933_v9 = vld [vmem:[%s3420_s1 + $0xe4] sm:$0xf] }
   0x2   :  { %v1751_v2 = vld [vmem:[%s3420_s1 + $0x1e0] sm:$0xf]  ;;  %v2101_v3 = vor.u32 %v1935_v1, %v1623_v0  ;;  %v1967_v4 = vld [vmem:[%s3420_s1 + $0x1ec] sm:$0xf0]  ;;  %v1625_v10 = vld [vmem:[%s3420_s1 + $0xf0] sm:$0xf0] }
   0x3   :  { %v1879_v5 = vld [vmem:[%s3420_s1 + $0x2e0] sm:$0xf]  ;;  %v1999_v6 = vld [vmem:[%s3420_s1 + $0x2ec] sm:$0xf0]  ;;  %v2112_v7 = vor.u32 %v1967_v4, %v1751_v2  ;;  %v2126_v12 = vor.u32 %v1933_v9, %v1625_v10  ;;  %v1929_v20 = vld [vmem:[%s3420_s1 + $0xc4] sm:$0xf] }
   0x4   :  { %v2114_v8 = vor.u32 %v1999_v6, %v1879_v5  ;;  %v1607_v11 = vld [vmem:[%s3420_s1 + $0xc0] sm:$0xf]  ;;  %607 = vmatpush.bf16.msra.mxu0 %v2101_v3  ;;  %v1931_v13 = vld [vmem:[%s3420_s1 + $0xcc] sm:$0xf0]  ;;  %v1609_v22 = vld [vmem:[%s3420_s1 + $0xd0] sm:$0xf0] }
   0x5   :  { %v1735_v14 = vld [vmem:[%s3420_s1 + $0x1c0] sm:$0xf]  ;;  %v1963_v15 = vld [vmem:[%s3420_s1 + $0x1cc] sm:$0xf0]  ;;  %620 = vmatpush.bf16.msra.mxu1 %v2112_v7  ;;  %v2139_v16 = vor.u32 %v1931_v13, %v1607_v11  ;;  %646 = vmatpush.bf16.msra.mxu3 %v2126_v12  ;;  %v2164_v25 = vor.u32 %v1929_v20, %v1609_v22  ;;  %v1925_v31 = vld [vmem:[%s3420_s1 + $0xa4] sm:$0xf] }
   0x6   :  { %3573 = vst [vmem:[#allocation2_spill] sm:$0xff] %v2114_v8  ;;  %633 = vmatpush.bf16.msra.mxu2 %v2114_v8  ;;  %v2141_v17 = vor.u32 %v1963_v15, %v1735_v14  ;;  %v1863_v18 = vld [vmem:[%s3420_s1 + $0x2c0] sm:$0xf]  ;;  %v1995_v19 = vld [vmem:[%s3420_s1 + $0x2cc] sm:$0xf0] }
   0x7   :  { %v2153_v21 = vor.u32 %v1995_v19, %v1863_v18  ;;  %v1591_v23 = vld [vmem:[%s3420_s1 + $0xa0] sm:$0xf]  ;;  %v1927_v24 = vld [vmem:[%s3420_s1 + $0xac] sm:$0xf0]  ;;  %v1593_v32 = vld [vmem:[%s3420_s1 + $0xb0] sm:$0xf0] }
   0x8   :  { %v1719_v26 = vld [vmem:[%s3420_s1 + $0x1a0] sm:$0xf]  ;;  %v1959_v27 = vld [vmem:[%s3420_s1 + $0x1ac] sm:$0xf0]  ;;  %608 = vmatpush.bf16.msra.mxu0 %v2139_v16  ;;  %v2176_v29 = vor.u32 %v1927_v24, %v1591_v23  ;;  %v2203_v38 = vor.u32 %v1925_v31, %v1593_v32  ;;  %v1921_v42 = vld [vmem:[%s3420_s1 + $0x84] sm:$0xf] }
   0x9   :  { %3574 = vst [vmem:[#allocation3_spill] sm:$0xff] %v2153_v21  ;;  %v1847_v28 = vld [vmem:[%s3420_s1 + $0x2a0] sm:$0xf]  ;;  %v1991_v30 = vld [vmem:[%s3420_s1 + $0x2ac] sm:$0xf0]  ;;  %621 = vmatpush.bf16.msra.mxu1 %v2141_v17  ;;  %v2189_v33 = vor.u32 %v1959_v27, %v1719_v26  ;;  %647 = vmatpush.bf16.msra.mxu3 %v2164_v25 }
   0xa   :  { %634 = vmatpush.bf16.msra.mxu2 %v2153_v21  ;;  %v2191_v34 = vor.u32 %v1991_v30, %v1847_v28  ;;  %v1575_v35 = vld [vmem:[%s3420_s1 + $0x80] sm:$0xf]  ;;  %v1923_v36 = vld [vmem:[%s3420_s1 + $0x8c] sm:$0xf0]  ;;  %v1577_v43 = vld [vmem:[%s3420_s1 + $0x90] sm:$0xf0] }
   0xb   :  { %v1703_v37 = vld [vmem:[%s3420_s1 + $0x180] sm:$0xf]  ;;  %v1955_v39 = vld [vmem:[%s3420_s1 + $0x18c] sm:$0xf0]  ;;  %v2221_v44 = vor.u32 %v1923_v36, %v1575_v35  ;;  %v2239_v50 = vor.u32 %v1921_v42, %v1577_v43  ;;  %v1917_v54 = vld [vmem:[%s3420_s1 + $0x64] sm:$0xf] }
   0xc   :  { %3575 = vst [vmem:[#allocation4_spill] sm:$0xff] %v2191_v34  ;;  %v1831_v40 = vld [vmem:[%s3420_s1 + $0x280] sm:$0xf]  ;;  %v1987_v41 = vld [vmem:[%s3420_s1 + $0x28c] sm:$0xf0]  ;;  %609 = vmatpush.bf16.msra.mxu0 %v2176_v29  ;;  %v2225_v45 = vor.u32 %v1955_v39, %v1703_v37 }
   0xd   :  { %622 = vmatpush.bf16.msra.mxu1 %v2189_v33  ;;  %v2227_v46 = vor.u32 %v1987_v41, %v1831_v40  ;;  %v1559_v47 = vld [vmem:[%s3420_s1 + $0x60] sm:$0xf]  ;;  %v1919_v48 = vld [vmem:[%s3420_s1 + $0x6c] sm:$0xf0]  ;;  %648 = vmatpush.bf16.msra.mxu3 %v2203_v38  ;;  %v1561_v55 = vld [vmem:[%s3420_s1 + $0x70] sm:$0xf0] }
   0xe   :  { %635 = vmatpush.bf16.msra.mxu2 %v2191_v34  ;;  %v1687_v49 = vld [vmem:[%s3420_s1 + $0x160] sm:$0xf]  ;;  %v1951_v51 = vld [vmem:[%s3420_s1 + $0x16c] sm:$0xf0]  ;;  %v2257_v56 = vor.u32 %v1919_v48, %v1559_v47  ;;  %v2275_v62 = vor.u32 %v1917_v54, %v1561_v55  ;;  %v1913_v2 = vld [vmem:[%s3420_s1 + $0x44] sm:$0xf] }
   0xf   :  { %3576 = vst [vmem:[#allocation5_spill] sm:$0xff] %v2227_v46  ;;  %v1815_v52 = vld [vmem:[%s3420_s1 + $0x260] sm:$0xf]  ;;  %v1983_v53 = vld [vmem:[%s3420_s1 + $0x26c] sm:$0xf0]  ;;  %v2261_v57 = vor.u32 %v1951_v51, %v1687_v49 }
  0x10   :  { %610 = vmatpush.bf16.msra.mxu0 %v2221_v44  ;;  %v2263_v58 = vor.u32 %v1983_v53, %v1815_v52  ;;  %v1543_v59 = vld [vmem:[%s3420_s1 + $0x40] sm:$0xf]  ;;  %v1915_v60 = vld [vmem:[%s3420_s1 + $0x4c] sm:$0xf0]  ;;  %v1545_v4 = vld [vmem:[%s3420_s1 + $0x50] sm:$0xf0] }
  0x11   :  { %623 = vmatpush.bf16.msra.mxu1 %v2225_v45  ;;  %3577 = vst [vmem:[#allocation6_spill] sm:$0xff] %v2261_v57  ;;  %v1671_v61 = vld [vmem:[%s3420_s1 + $0x140] sm:$0xf]  ;;  %649 = vmatpush.bf16.msra.mxu3 %v2239_v50  ;;  %v1947_v63 = vld [vmem:[%s3420_s1 + $0x14c] sm:$0xf0]  ;;  %v2293_v5 = vor.u32 %v1915_v60, %v1543_v59  ;;  %v2311_v14 = vor.u32 %v1913_v2, %v1545_v4 }
  0x12   :  { %636 = vmatpush.bf16.msra.mxu2 %v2227_v46  ;;  %3578 = vst [vmem:[#allocation7_spill] sm:$0xff] %v2263_v58  ;;  %v1799_v0 = vld [vmem:[%s3420_s1 + $0x240] sm:$0xf]  ;;  %v1979_v1 = vld [vmem:[%s3420_s1 + $0x24c] sm:$0xf0]  ;;  %v2297_v6 = vor.u32 %v1947_v63, %v1671_v61 }
  0x13   :  { %v2299_v9 = vor.u32 %v1979_v1, %v1799_v0  ;;  %v1527_v10 = vld [vmem:[%s3420_s1 + $0x20] sm:$0xf]  ;;  %v1911_v11 = vld [vmem:[%s3420_s1 + $0x2c] sm:$0xf0]  ;;  %v1909_v20 = vld [vmem:[%s3420_s1 + $0x24] sm:$0xf] }
  0x14   :  { %611 = vmatpush.bf16.msra.mxu0 %v2257_v56  ;;  %3579 = vst [vmem:[#allocation8_spill] sm:$0xff] %v2297_v6  ;;  %v1655_v13 = vld [vmem:[%s3420_s1 + $0x120] sm:$0xf]  ;;  %v1943_v15 = vld [vmem:[%s3420_s1 + $0x12c] sm:$0xf0]  ;;  %v2329_v23 = vor.u32 %v1911_v11, %v1527_v10 }
  0x15   :  { %624 = vmatpush.bf16.msra.mxu1 %v2261_v57  ;;  %3580 = vst [vmem:[#allocation9_spill] sm:$0xff] %v2299_v9  ;;  %650 = vmatpush.bf16.msra.mxu3 %v2275_v62  ;;  %v1783_v18 = vld [vmem:[%s3420_s1 + $0x220] sm:$0xf]  ;;  %v1975_v19 = vld [vmem:[%s3420_s1 + $0x22c] sm:$0xf0]  ;;  %v2339_v27 = vor.u32 %v1943_v15, %v1655_v13 }
  0x16   :  { %637 = vmatpush.bf16.msra.mxu2 %v2263_v58  ;;  %v1529_v22 = vld [vmem:[%s3420_s1 + $0x30] sm:$0xf0]  ;;  %v1511_v24 = vld [vmem:[%s3420_s1] sm:$0xf]  ;;  %v1907_v26 = vld [vmem:[%s3420_s1 + $0xc] sm:$0xf0]  ;;  %v2341_v28 = vor.u32 %v1975_v19, %v1783_v18 }
  0x17   :  { %3581 = vst [vmem:[#allocation10_spill] sm:$0xff] %v2339_v27  ;;  %v1639_v30 = vld [vmem:[%s3420_s1 + $0x100] sm:$0xf]  ;;  %v1939_v31 = vld [vmem:[%s3420_s1 + $0x10c] sm:$0xf0]  ;;  %v2353_v35 = vor.u32 %v1909_v20, %v1529_v22  ;;  %v2374_v43 = vor.u32 %v1907_v26, %v1511_v24 }
  0x18   :  { %612 = vmatpush.bf16.msra.mxu0 %v2293_v5  ;;  %3582 = vst [vmem:[#allocation11_spill] sm:$0xff] %v2341_v28  ;;  %v1767_v32 = vld [vmem:[%s3420_s1 + $0x200] sm:$0xf]  ;;  %v1971_v36 = vld [vmem:[%s3420_s1 + $0x20c] sm:$0xf0]  ;;  %v2387_v51 = vor.u32 %v1939_v31, %v1639_v30 }
  0x19   :  { %625 = vmatpush.bf16.msra.mxu1 %v2297_v6  ;;  %651 = vmatpush.bf16.msra.mxu3 %v2311_v14  ;;  %v1905_v37 = vld [vmem:[%s3420_s1 + $0x4] sm:$0xf]  ;;  %v1513_v39 = vld [vmem:[%s3420_s1 + $0x10] sm:$0xf0]  ;;  %v1631_v48 = vld [vmem:[%s3420_s1 + $0xe8] sm:$0xf]  ;;  %v2389_v52 = vor.u32 %v1971_v36, %v1767_v32 }
  0x1a   :  { %638 = vmatpush.bf16.msra.mxu2 %v2299_v9  ;;  %v1965_v40 = vld [vmem:[%s3420_s1 + $0x1e4] sm:$0xf]  ;;  %v1753_v41 = vld [vmem:[%s3420_s1 + $0x1f0] sm:$0xf0]  ;;  %v1936_v49 = vld [vmem:[%s3420_s1 + $0xf4] sm:$0xf0]  ;;  %v2398_v55 = vor.u32 %v1905_v37, %v1513_v39 }
  0x1b   :  { %v1997_v42 = vld [vmem:[%s3420_s1 + $0x2e4] sm:$0xf]  ;;  %v1881_v47 = vld [vmem:[%s3420_s1 + $0x2f0] sm:$0xf0]  ;;  %3583 = vst [vmem:[#allocation12_spill] sm:$0xff] %v2387_v51  ;;  %v2400_v59 = vor.u32 %v1965_v40, %v1753_v41  ;;  %v2404_v61 = vor.u32 %v1936_v49, %v1631_v48  ;;  %v114_v40 = vld [vmem:[%s3421_s0 + $0x8] sm:$0xff] }
  0x1c   :  { %613 = vmatpush.bf16.msra.mxu0 %v2329_v23  ;;  %3584 = vst [vmem:[#allocation13_spill] sm:$0xff] %v2389_v52  ;;  %v1759_v53 = vld [vmem:[%s3420_s1 + $0x1e8] sm:$0xf]  ;;  %v1968_v54 = vld [vmem:[%s3420_s1 + $0x1f4] sm:$0xf0]  ;;  %v2402_v60 = vor.u32 %v1997_v42, %v1881_v47  ;;  %v113_v18 = vld [vmem:[%s3421_s0] sm:$0xff]  ;;  %v2482_v48 = vpack.c.bf16 %v114_v40, %v114_v40 }
  0x1d   :  { %626 = vmatpush.bf16.msra.mxu1 %v2339_v27  ;;  %652 = vmatpush.bf16.msra.mxu3 %v2353_v35  ;;  %3586 = vst [vmem:[#allocation15_spill] sm:$0xff] %v2404_v61  ;;  %v1961_v63 = vld [vmem:[%s3420_s1 + $0x1c4] sm:$0xf]  ;;  %v1737_v0 = vld [vmem:[%s3420_s1 + $0x1d0] sm:$0xf0]  ;;  %v2416_v2 = vor.u32 %v1968_v54, %v1759_v53  ;;  %v2445_v22 = vpack.c.bf16 %v113_v18, %v113_v18  ;;  %v3425_v47 = vmov 0.0|0.0  }
  0x1e   :  { %639 = vmatpush.bf16.msra.mxu2 %v2341_v28  ;;  %3585 = vst [vmem:[#allocation14_spill] sm:$0xff] %v2402_v60  ;;  %v1993_v1 = vld [vmem:[%s3420_s1 + $0x2c4] sm:$0xf]  ;;  %v1865_v4 = vld [vmem:[%s3420_s1 + $0x2d0] sm:$0xf0]  ;;  %v2440_v19 = vor.u32 %v1961_v63, %v1737_v0 }
  0x1f   :  { %v1615_v10 = vld [vmem:[%s3420_s1 + $0xc8] sm:$0xf]  ;;  %v1932_v11 = vld [vmem:[%s3420_s1 + $0xd4] sm:$0xf0]  ;;  %v1957_v20 = vld [vmem:[%s3420_s1 + $0x1a4] sm:$0xf]  ;;  %v2449_v24 = vor.u32 %v1993_v1, %v1865_v4 }
  0x20   :  { %614 = vmatpush.bf16.msra.mxu0 %v2374_v43  ;;  %v1743_v13 = vld [vmem:[%s3420_s1 + $0x1c8] sm:$0xf]  ;;  %v1964_v15 = vld [vmem:[%s3420_s1 + $0x1d4] sm:$0xf0]  ;;  %v2451_v26 = vor.u32 %v1932_v11, %v1615_v10  ;;  %v1721_v30 = vld [vmem:[%s3420_s1 + $0x1b0] sm:$0xf0] }
  0x21   :  { %627 = vmatpush.bf16.msra.mxu1 %v2387_v51  ;;  %653 = vmatpush.bf16.msra.mxu3 %v2398_v55  ;;  %3587 = vst [vmem:[#allocation16_spill] sm:$0xff] %v2449_v24  ;;  %v1989_v31 = vld [vmem:[%s3420_s1 + $0x2a4] sm:$0xf]  ;;  %v1849_v32 = vld [vmem:[%s3420_s1 + $0x2b0] sm:$0xf0]  ;;  %v2463_v36 = vor.u32 %v1964_v15, %v1743_v13  ;;  %v2486_v49 = vor.u32 %v1957_v20, %v1721_v30 }
  0x22   :  { %640 = vmatpush.bf16.msra.mxu2 %v2389_v52  ;;  %3588 = vst [vmem:[#allocation17_spill] sm:$0xff] %v2451_v26  ;;  %v1599_v37 = vld [vmem:[%s3420_s1 + $0xa8] sm:$0xf]  ;;  %v1928_v39 = vld [vmem:[%s3420_s1 + $0xb4] sm:$0xf0]  ;;  %v2490_v53 = vor.u32 %v1989_v31, %v1849_v32 }
  0x23   :  { %615 = vmatmul.bf16.vlgmr.msra.gmra.mxu0 %v2445_v22  ;;  %v1727_v41 = vld [vmem:[%s3420_s1 + $0x1a8] sm:$0xf]  ;;  %v1960_v42 = vld [vmem:[%s3420_s1 + $0x1b4] sm:$0xf0]  ;;  %v2492_v54 = vor.u32 %v1928_v39, %v1599_v37  ;;  %v1953_v63 = vld [vmem:[%s3420_s1 + $0x184] sm:$0xf] }
  0x24   :  { %659 = vmatpush.bf16.msrb.mxu0 %v2400_v59  ;;  %654 = vmatmul.bf16.vlgmr.msra.gmra.mxu3 %v2445_v22  ;;  %3589 = vst [vmem:[#allocation18_spill] sm:$0xff] %v2490_v53  ;;  %v1705_v0 = vld [vmem:[%s3420_s1 + $0x190] sm:$0xf0]  ;;  %v1985_v1 = vld [vmem:[%s3420_s1 + $0x284] sm:$0xf]  ;;  %v2504_v4 = vor.u32 %v1960_v42, %v1727_v41 }
  0x25   :  { %672 = vmatpush.bf16.msrb.mxu1 %v2402_v60  ;;  %698 = vmatpush.bf16.msrb.mxu3 %v2416_v2  ;;  %3590 = vst [vmem:[#allocation19_spill] sm:$0xff] %v2492_v54  ;;  %v1833_v10 = vld [vmem:[%s3420_s1 + $0x290] sm:$0xf0]  ;;  %v1583_v11 = vld [vmem:[%s3420_s1 + $0x88] sm:$0xf]  ;;  %v2523_v20 = vor.u32 %v1953_v63, %v1705_v0 }
  0x26   :  { %685 = vmatpush.bf16.msrb.mxu2 %v2404_v61  ;;  %3591 = vst [vmem:[#allocation20_spill] sm:$0xff] %v2504_v4  ;;  %v1924_v13 = vld [vmem:[%s3420_s1 + $0x94] sm:$0xf0]  ;;  %628 = vmatmul.bf16.vlgmr.msra.gmra.mxu1 %v2482_v48  ;;  %v1711_v15 = vld [vmem:[%s3420_s1 + $0x188] sm:$0xf]  ;;  %v2527_v30 = vor.u32 %v1985_v1, %v1833_v10 }
  0x27   :  { %641 = vmatmul.bf16.vlgmr.msra.gmra.mxu2 %v3425_v47  ;;  %v1956_v18 = vld [vmem:[%s3420_s1 + $0x194] sm:$0xf0]  ;;  %3592 = vst [vmem:[#allocation21_spill] sm:$0xff] %v2523_v20  ;;  %v2529_v31 = vor.u32 %v1924_v13, %v1583_v11  ;;  %v1949_v32 = vld [vmem:[%s3420_s1 + $0x164] sm:$0xf] }
  0x28   :  { %660 = vmatpush.bf16.msrb.mxu0 %v2440_v19  ;;  %3593 = vst [vmem:[#allocation22_spill] sm:$0xff] %v2527_v30  ;;  %v1689_v37 = vld [vmem:[%s3420_s1 + $0x170] sm:$0xf0]  ;;  %v1981_v39 = vld [vmem:[%s3420_s1 + $0x264] sm:$0xf]  ;;  %v2541_v40 = vor.u32 %v1956_v18, %v1711_v15 }
  0x29   :  { %673 = vmatpush.bf16.msrb.mxu1 %v2449_v24  ;;  %699 = vmatpush.bf16.msrb.mxu3 %v2463_v36  ;;  %3594 = vst [vmem:[#allocation23_spill] sm:$0xff] %v2529_v31  ;;  %v1817_v41 = vld [vmem:[%s3420_s1 + $0x270] sm:$0xf0]  ;;  %v1567_v42 = vld [vmem:[%s3420_s1 + $0x68] sm:$0xf]  ;;  %v2559_v10 = vor.u32 %v1949_v32, %v1689_v37 }
  0x2a   :  { %686 = vmatpush.bf16.msrb.mxu2 %v2451_v26  ;;  %3595 = vst [vmem:[#allocation24_spill] sm:$0xff] %v2541_v40  ;;  %v1920_v63 = vld [vmem:[%s3420_s1 + $0x74] sm:$0xf0]  ;;  %v1695_v0 = vld [vmem:[%s3420_s1 + $0x168] sm:$0xf]  ;;  %v2563_v11 = vor.u32 %v1981_v39, %v1817_v41 }
  0x2b   :  { %v1952_v1 = vld [vmem:[%s3420_s1 + $0x174] sm:$0xf0]  ;;  %3596 = vst [vmem:[#allocation25_spill] sm:$0xff] %v2559_v10  ;;  %v2565_v13 = vor.u32 %v1920_v63, %v1567_v42  ;;  %v1945_v15 = vld [vmem:[%s3420_s1 + $0x144] sm:$0xf] }
  0x2c   :  { %661 = vmatpush.bf16.msrb.mxu0 %v2486_v49  ;;  %3597 = vst [vmem:[#allocation26_spill] sm:$0xff] %v2563_v11  ;;  %v1673_v18 = vld [vmem:[%s3420_s1 + $0x150] sm:$0xf0]  ;;  %v1977_v32 = vld [vmem:[%s3420_s1 + $0x244] sm:$0xf]  ;;  %v2577_v37 = vor.u32 %v1952_v1, %v1695_v0 }
  0x2d   :  { %674 = vmatpush.bf16.msrb.mxu1 %v2490_v53  ;;  %700 = vmatpush.bf16.msrb.mxu3 %v2504_v4  ;;  %3598 = vst [vmem:[#allocation27_spill] sm:$0xff] %v2565_v13  ;;  %v1801_v39 = vld [vmem:[%s3420_s1 + $0x250] sm:$0xf0]  ;;  %v1551_v41 = vld [vmem:[%s3420_s1 + $0x48] sm:$0xf]  ;;  %v2595_v1 = vor.u32 %v1945_v15, %v1673_v18 }
  0x2e   :  { %687 = vmatpush.bf16.msrb.mxu2 %v2492_v54  ;;  %3599 = vst [vmem:[#allocation28_spill] sm:$0xff] %v2577_v37  ;;  %v1916_v42 = vld [vmem:[%s3420_s1 + $0x54] sm:$0xf0]  ;;  %v1679_v63 = vld [vmem:[%s3420_s1 + $0x148] sm:$0xf]  ;;  %v2599_v47 = vor.u32 %v1977_v32, %v1801_v39 }
  0x2f   :  { %v1948_v0 = vld [vmem:[%s3420_s1 + $0x154] sm:$0xf0]  ;;  %3600 = vst [vmem:[#allocation29_spill] sm:$0xff] %v2595_v1  ;;  %v1973_v15 = vld [vmem:[%s3420_s1 + $0x224] sm:$0xf] }
  0x30   :  { %662 = vmatpush.bf16.msrb.mxu0 %v2523_v20  ;;  %3601 = vst [vmem:[#allocation30_spill] sm:$0xff] %v2599_v47  ;;  %v2613_v18 = vor.u32 %v1948_v0, %v1679_v63  ;;  %v1785_v32 = vld [vmem:[%s3420_s1 + $0x230] sm:$0xf0]  ;;  %v1535_v39 = vld [vmem:[%s3420_s1 + $0x28] sm:$0xf] }
  0x31   :  { %675 = vmatpush.bf16.msrb.mxu1 %v2527_v30  ;;  %701 = vmatpush.bf16.msrb.mxu3 %v2541_v40  ;;  %v1941_v30 = vld [vmem:[%s3420_s1 + $0x124] sm:$0xf]  ;;  %v1657_v40 = vld [vmem:[%s3420_s1 + $0x130] sm:$0xf0]  ;;  %v1944_v63 = vld [vmem:[%s3420_s1 + $0x134] sm:$0xf0] }
  0x32   :  { %688 = vmatpush.bf16.msrb.mxu2 %v2529_v31  ;;  %v2601_v31 = vor.u32 %v1916_v42, %v1551_v41  ;;  %3603 = vst [vmem:[#allocation32_spill] sm:$0xff] %v2613_v18  ;;  %v1912_v41 = vld [vmem:[%s3420_s1 + $0x34] sm:$0xf0]  ;;  %v1663_v42 = vld [vmem:[%s3420_s1 + $0x128] sm:$0xf]  ;;  %v2631_v0 = vor.u32 %v1941_v30, %v1657_v40 }
  0x33   :  { %v1969_v30 = vld [vmem:[%s3420_s1 + $0x204] sm:$0xf]  ;;  %v1769_v40 = vld [vmem:[%s3420_s1 + $0x210] sm:$0xf0]  ;;  %v1966_v54 = vld [vmem:[%s3420_s1 + $0x1ec] sm:$0xf] }
  0x34   :  { %663 = vmatpush.bf16.msrb.mxu0 %v2559_v10  ;;  %3602 = vst [vmem:[#allocation31_spill] sm:$0xff] %v2601_v31  ;;  %v2643_v10 = vor.u32 %v1912_v41, %v1535_v39  ;;  %v1940_v39 = vld [vmem:[%s3420_s1 + $0x114] sm:$0xf0]  ;;  %v1887_v41 = vld [vmem:[%s3420_s1 + $0x2e8] sm:$0xf]  ;;  %v2689_v53 = vor.u32 %v1969_v30, %v1769_v40 }
  0x35   :  { %676 = vmatpush.bf16.msrb.mxu1 %v2563_v11  ;;  %702 = vmatpush.bf16.msrb.mxu3 %v2577_v37  ;;  %3604 = vst [vmem:[#allocation33_spill] sm:$0xff] %v2631_v0  ;;  %v1641_v11 = vld [vmem:[%s3420_s1 + $0x110] sm:$0xf0]  ;;  %v2641_v37 = vor.u32 %v1973_v15, %v1785_v32  ;;  %v1908_v15 = vld [vmem:[%s3420_s1 + $0x14] sm:$0xf0] }
  0x36   :  { %689 = vmatpush.bf16.msrb.mxu2 %v2565_v13  ;;  %v1937_v13 = vld [vmem:[%s3420_s1 + $0x104] sm:$0xf]  ;;  %3606 = vst [vmem:[#allocation35_spill] sm:$0xff] %v2643_v10  ;;  %v1647_v32 = vld [vmem:[%s3420_s1 + $0x108] sm:$0xf] }
  0x37   :  { %3605 = vst [vmem:[#allocation34_spill] sm:$0xff] %v2641_v37  ;;  %v1761_v20 = vld [vmem:[%s3420_s1 + $0x1f8] sm:$0xf0]  ;;  %v2700_v4 = vor.u32 %v1940_v39, %v1647_v32  ;;  %v1996_v40 = vld [vmem:[%s3420_s1 + $0x2d4] sm:$0xf0] }
  0x38   :  { %664 = vmatpush.bf16.msrb.mxu0 %v2595_v1  ;;  %v1519_v1 = vld [vmem:[%s3420_s1 + $0x8] sm:$0xf]  ;;  %3609 = vst [vmem:[#allocation38_spill] sm:$0xff] %v2689_v53  ;;  %v2706_v30 = vor.u32 %v1966_v54, %v1761_v20  ;;  %v1617_v54 = vld [vmem:[%s3420_s1 + $0xd8] sm:$0xf0] }
  0x39   :  { %677 = vmatpush.bf16.msrb.mxu1 %v2599_v47  ;;  %703 = vmatpush.bf16.msrb.mxu3 %v2613_v18  ;;  %v2655_v47 = vor.u32 %v1944_v63, %v1663_v42  ;;  %v2000_v42 = vld [vmem:[%s3420_s1 + $0x2f4] sm:$0xf0]  ;;  %v1934_v63 = vld [vmem:[%s3420_s1 + $0xec] sm:$0xf]  ;;  %v1633_v18 = vld [vmem:[%s3420_s1 + $0xf8] sm:$0xf0] }
  0x3a   :  { %690 = vmatpush.bf16.msrb.mxu2 %v2601_v31  ;;  %v2676_v31 = vor.u32 %v1937_v13, %v1641_v11  ;;  %v2691_v11 = vor.u32 %v1908_v15, %v1519_v1  ;;  %v1998_v13 = vld [vmem:[%s3420_s1 + $0x2ec] sm:$0xf]  ;;  %3611 = vst [vmem:[#allocation40_spill] sm:$0xff] %v2700_v4  ;;  %v2702_v26 = vor.u32 %v2000_v42, %v1887_v41  ;;  %v1871_v1 = vld [vmem:[%s3420_s1 + $0x2c8] sm:$0xf] }
  0x3b   :  { %3607 = vst [vmem:[#allocation36_spill] sm:$0xff] %v2655_v47  ;;  %v1930_v15 = vld [vmem:[%s3420_s1 + $0xcc] sm:$0xf]  ;;  %v1873_v39 = vld [vmem:[%s3420_s1 + $0x2d8] sm:$0xf0]  ;;  %v2739_v41 = vor.u32 %v1996_v40, %v1871_v1 }
  0x3c   :  { %665 = vmatpush.bf16.msrb.mxu0 %v2631_v0  ;;  %3608 = vst [vmem:[#allocation37_spill] sm:$0xff] %v2676_v31  ;;  %v1889_v0 = vld [vmem:[%s3420_s1 + $0x2f8] sm:$0xf0]  ;;  %v1962_v20 = vld [vmem:[%s3420_s1 + $0x1cc] sm:$0xf]  ;;  %v2743_v42 = vor.u32 %v1930_v15, %v1617_v54 }
  0x3d   :  { %678 = vmatpush.bf16.msrb.mxu1 %v2641_v37  ;;  %3610 = vst [vmem:[#allocation39_spill] sm:$0xff] %v2691_v11  ;;  %704 = vmatpush.bf16.msrb.mxu3 %v2655_v47  ;;  %v2704_v37 = vor.u32 %v1934_v63, %v1633_v18  ;;  %v2718_v32 = vor.u32 %v1998_v13, %v1889_v0  ;;  %v1745_v18 = vld [vmem:[%s3420_s1 + $0x1d8] sm:$0xf0]  ;;  %v1994_v0 = vld [vmem:[%s3420_s1 + $0x2cc] sm:$0xf] }
  0x3e   :  { %691 = vmatpush.bf16.msrb.mxu2 %v2643_v10  ;;  %3612 = vst [vmem:[#allocation41_spill] sm:$0xff] %v2702_v26  ;;  %v2745_v63 = vor.u32 %v1962_v20, %v1745_v18  ;;  %v1855_v13 = vld [vmem:[%s3420_s1 + $0x2a8] sm:$0xf]  ;;  %v1926_v1 = vld [vmem:[%s3420_s1 + $0xac] sm:$0xf]  ;;  %v2758_v40 = vor.u32 %v1994_v0, %v1873_v39  ;;  %v3620_v18 = vmov 0.0|0.0  }
  0x3f   :  { %3613 = vst [vmem:[#allocation42_spill] sm:$0xff] %v2704_v37  ;;  %v1601_v15 = vld [vmem:[%s3420_s1 + $0xb8] sm:$0xf0]  ;;  %v1958_v54 = vld [vmem:[%s3420_s1 + $0x1ac] sm:$0xf] }
  0x40   :  { %3614 = vst [vmem:[#allocation43_spill] sm:$0xff] %v2706_v30  ;;  %666 = vmatpush.bf16.msrb.mxu0 %v2676_v31  ;;  %v1729_v20 = vld [vmem:[%s3420_s1 + $0x1b8] sm:$0xf0]  ;;  %v1990_v0 = vld [vmem:[%s3420_s1 + $0x2ac] sm:$0xf] }
  0x41   :  { %3615 = vst [vmem:[#allocation44_spill] sm:$0xff] %v2718_v32  ;;  %679 = vmatpush.bf16.msrb.mxu1 %v2689_v53  ;;  %705 = vmatpush.bf16.msrb.mxu3 %v2700_v4  ;;  %v1857_v39 = vld [vmem:[%s3420_s1 + $0x2b8] sm:$0xf0]  ;;  %v1984_v53 = vld [vmem:[%s3420_s1 + $0x274] sm:$0xf0] }
  0x42   :  { %692 = vmatpush.bf16.msrb.mxu2 %v2691_v11  ;;  %3616 = vst [vmem:[#allocation45_spill] sm:$0xff] %v2739_v41  ;;  %v1992_v11 = vld [vmem:[%s3420_s1 + $0x2b4] sm:$0xf0] }
  0x43   :  { %3617 = vst [vmem:[#allocation46_spill] sm:$0xff] %v2743_v42  ;;  %667 = vmatmul.bf16.vlgmr.msrb.gmra.mxu0 %v2482_v48 }
  0x44   :  { %711 = vmatpush.bf16.msra.mxu0 %v2702_v26  ;;  %3618 = vst [vmem:[#allocation47_spill] sm:$0xff] %v2745_v63  ;;  %680 = vmatmul.bf16.vlgmr.msrb.gmra.mxu1 %v3620_v18  ;;  %v1839_v26 = vld [vmem:[%s3420_s1 + $0x288] sm:$0xf] }
  0x45   :  { %724 = vmatpush.bf16.msra.mxu1 %v2704_v37  ;;  %750 = vmatpush.bf16.msra.mxu3 %v2718_v32  ;;  %3619 = vst [vmem:[#allocation48_spill] sm:$0xff] %v2758_v40  ;;  %v2783_v37 = vor.u32 %v1926_v1, %v1601_v15  ;;  %v2785_v32 = vor.u32 %v1958_v54, %v1729_v20  ;;  %v1585_v1 = vld [vmem:[%s3420_s1 + $0x98] sm:$0xf0]  ;;  %v1954_v15 = vld [vmem:[%s3420_s1 + $0x18c] sm:$0xf] }
  0x46   :  { %737 = vmatpush.bf16.msra.mxu2 %v2706_v30  ;;  %v2778_v30 = vor.u32 %v1992_v11, %v1855_v13  ;;  %706 = vmatmul.bf16.vlgmr.msrb.gmra.mxu3 %v2482_v48  ;;  %v1922_v11 = vld [vmem:[%s3420_s1 + $0x8c] sm:$0xf]  ;;  %v2797_v13 = vor.u32 %v1990_v0, %v1857_v39  ;;  %v1713_v54 = vld [vmem:[%s3420_s1 + $0x198] sm:$0xf0] }
  0x47   :  { %693 = vmatmul.bf16.vlgmr.msrb.gmra.mxu2 %v2445_v22  ;;  %3622 = vst [vmem:[#allocation50_spill] sm:$0xff] %v2783_v37  ;;  %v1986_v20 = vld [vmem:[%s3420_s1 + $0x28c] sm:$0xf]  ;;  %v1841_v0 = vld [vmem:[%s3420_s1 + $0x298] sm:$0xf0] }
  0x48   :  { %712 = vmatpush.bf16.msra.mxu0 %v2739_v41  ;;  %3621 = vst [vmem:[#allocation49_spill] sm:$0xff] %v2778_v30  ;;  %v1988_v41 = vld [vmem:[%s3420_s1 + $0x294] sm:$0xf0] }
  0x49   :  { %725 = vmatpush.bf16.msra.mxu1 %v2743_v42  ;;  %3623 = vst [vmem:[#allocation51_spill] sm:$0xff] %v2785_v32  ;;  %751 = vmatpush.bf16.msra.mxu3 %v2758_v40  ;;  %v2815_v39 = vor.u32 %v1988_v41, %v1839_v26  ;;  %v2821_v42 = vor.u32 %v1954_v15, %v1713_v54  ;;  %v1823_v40 = vld [vmem:[%s3420_s1 + $0x268] sm:$0xf]  ;;  %v1918_v26 = vld [vmem:[%s3420_s1 + $0x6c] sm:$0xf] }
  0x4a   :  { %738 = vmatpush.bf16.msra.mxu2 %v2745_v63  ;;  %3624 = vst [vmem:[#allocation52_spill] sm:$0xff] %v2797_v13  ;;  %v2819_v63 = vor.u32 %v1922_v11, %v1585_v1  ;;  %v2833_v41 = vor.u32 %v1986_v20, %v1841_v0  ;;  %v1569_v11 = vld [vmem:[%s3420_s1 + $0x78] sm:$0xf0]  ;;  %v1950_v1 = vld [vmem:[%s3420_s1 + $0x16c] sm:$0xf]  ;;  %v2851_v0 = vor.u32 %v1984_v53, %v1823_v40 }
  0x4b   :  { %3625 = vst [vmem:[#allocation53_spill] sm:$0xff] %v2815_v39  ;;  %v1697_v15 = vld [vmem:[%s3420_s1 + $0x178] sm:$0xf0]  ;;  %v1982_v54 = vld [vmem:[%s3420_s1 + $0x26c] sm:$0xf] }
  0x4c   :  { %713 = vmatpush.bf16.msra.mxu0 %v2778_v30  ;;  %3626 = vst [vmem:[#allocation54_spill] sm:$0xff] %v2819_v63  ;;  %v1825_v20 = vld [vmem:[%s3420_s1 + $0x278] sm:$0xf0]  ;;  %v1980_v30 = vld [vmem:[%s3420_s1 + $0x254] sm:$0xf0] }
  0x4d   :  { %726 = vmatpush.bf16.msra.mxu1 %v2783_v37  ;;  %3627 = vst [vmem:[#allocation55_spill] sm:$0xff] %v2821_v42  ;;  %752 = vmatpush.bf16.msra.mxu3 %v2797_v13  ;;  %v2857_v37 = vor.u32 %v1950_v1, %v1697_v15  ;;  %v1807_v13 = vld [vmem:[%s3420_s1 + $0x248] sm:$0xf]  ;;  %v1914_v53 = vld [vmem:[%s3420_s1 + $0x4c] sm:$0xf]  ;;  %v2869_v40 = vor.u32 %v1982_v54, %v1825_v20 }
  0x4e   :  { %739 = vmatpush.bf16.msra.mxu2 %v2785_v32  ;;  %3628 = vst [vmem:[#allocation56_spill] sm:$0xff] %v2833_v41  ;;  %v2855_v32 = vor.u32 %v1918_v26, %v1569_v11  ;;  %v1553_v26 = vld [vmem:[%s3420_s1 + $0x58] sm:$0xf0]  ;;  %v1946_v11 = vld [vmem:[%s3420_s1 + $0x14c] sm:$0xf]  ;;  %v2887_v20 = vor.u32 %v1980_v30, %v1807_v13 }
  0x4f   :  { %3629 = vst [vmem:[#allocation57_spill] sm:$0xff] %v2851_v0  ;;  %v1681_v1 = vld [vmem:[%s3420_s1 + $0x158] sm:$0xf0]  ;;  %v1978_v15 = vld [vmem:[%s3420_s1 + $0x24c] sm:$0xf] }
  0x50   :  { %714 = vmatpush.bf16.msra.mxu0 %v2815_v39  ;;  %3630 = vst [vmem:[#allocation58_spill] sm:$0xff] %v2855_v32  ;;  %v1809_v54 = vld [vmem:[%s3420_s1 + $0x258] sm:$0xf0]  ;;  %v1976_v39 = vld [vmem:[%s3420_s1 + $0x234] sm:$0xf0] }
  0x51   :  { %727 = vmatpush.bf16.msra.mxu1 %v2819_v63  ;;  %3631 = vst [vmem:[#allocation59_spill] sm:$0xff] %v2857_v37  ;;  %753 = vmatpush.bf16.msra.mxu3 %v2833_v41  ;;  %v2893_v63 = vor.u32 %v1946_v11, %v1681_v1  ;;  %v1791_v41 = vld [vmem:[%s3420_s1 + $0x228] sm:$0xf]  ;;  %v1910_v30 = vld [vmem:[%s3420_s1 + $0x2c] sm:$0xf]  ;;  %v2905_v13 = vor.u32 %v1978_v15, %v1809_v54 }
  0x52   :  { %740 = vmatpush.bf16.msra.mxu2 %v2821_v42  ;;  %3632 = vst [vmem:[#allocation60_spill] sm:$0xff] %v2869_v40  ;;  %v2891_v42 = vor.u32 %v1914_v53, %v1553_v26  ;;  %v1537_v53 = vld [vmem:[%s3420_s1 + $0x38] sm:$0xf0]  ;;  %v1942_v26 = vld [vmem:[%s3420_s1 + $0x12c] sm:$0xf]  ;;  %v2923_v54 = vor.u32 %v1976_v39, %v1791_v41 }
  0x53   :  { %3633 = vst [vmem:[#allocation61_spill] sm:$0xff] %v2887_v20  ;;  %v1665_v11 = vld [vmem:[%s3420_s1 + $0x138] sm:$0xf0]  ;;  %v1974_v1 = vld [vmem:[%s3420_s1 + $0x22c] sm:$0xf] }
  0x54   :  { %715 = vmatpush.bf16.msra.mxu0 %v2851_v0  ;;  %3634 = vst [vmem:[#allocation62_spill] sm:$0xff] %v2891_v42  ;;  %v1793_v15 = vld [vmem:[%s3420_s1 + $0x238] sm:$0xf0]  ;;  %v1972_v0 = vld [vmem:[%s3420_s1 + $0x214] sm:$0xf0] }
  0x55   :  { %728 = vmatpush.bf16.msra.mxu1 %v2855_v32  ;;  %3635 = vst [vmem:[#allocation63_spill] sm:$0xff] %v2893_v63  ;;  %754 = vmatpush.bf16.msra.mxu3 %v2869_v40  ;;  %v2929_v32 = vor.u32 %v1942_v26, %v1665_v11  ;;  %v1775_v40 = vld [vmem:[%s3420_s1 + $0x208] sm:$0xf]  ;;  %v1906_v39 = vld [vmem:[%s3420_s1 + $0xc] sm:$0xf]  ;;  %v2941_v41 = vor.u32 %v1974_v1, %v1793_v15 }
  0x56   :  { %741 = vmatpush.bf16.msra.mxu2 %v2857_v37  ;;  %3636 = vst [vmem:[#allocation64_spill] sm:$0xff] %v2905_v13  ;;  %v2927_v37 = vor.u32 %v1910_v30, %v1537_v53  ;;  %v1521_v30 = vld [vmem:[%s3420_s1 + $0x18] sm:$0xf0]  ;;  %v1938_v53 = vld [vmem:[%s3420_s1 + $0x10c] sm:$0xf]  ;;  %v2959_v15 = vor.u32 %v1972_v0, %v1775_v40 }
  0x57   :  { %3637 = vst [vmem:[#allocation65_spill] sm:$0xff] %v2923_v54  ;;  %v1649_v26 = vld [vmem:[%s3420_s1 + $0x118] sm:$0xf0]  ;;  %v1970_v11 = vld [vmem:[%s3420_s1 + $0x20c] sm:$0xf] }
  0x58   :  { %716 = vmatpush.bf16.msra.mxu0 %v2887_v20  ;;  %3638 = vst [vmem:[#allocation66_spill] sm:$0xff] %v2929_v32  ;;  %v1777_v1 = vld [vmem:[%s3420_s1 + $0x218] sm:$0xf0]  ;;  %v3644_v40 = vld [vmem:[#allocation19_spill] sm:$0xff] }
  0x59   :  { %729 = vmatpush.bf16.msra.mxu1 %v2891_v42  ;;  %755 = vmatpush.bf16.msra.mxu3 %v2905_v13  ;;  %v2965_v42 = vor.u32 %v1938_v53, %v1649_v26  ;;  %v2968_v13 = vor.u32 %v1970_v11, %v1777_v1  ;;  %v3643_v0 = vld [vmem:[#allocation21_spill] sm:$0xff]  ;;  %v3648_v26 = vld [vmem:[#allocation23_spill] sm:$0xff]  ;;  %v3649_v11 = vld [vmem:[#allocation28_spill] sm:$0xff] }
  0x5a   :  { %742 = vmatpush.bf16.msra.mxu2 %v2893_v63  ;;  %v2963_v63 = vor.u32 %v1906_v39, %v1521_v30  ;;  %v3645_v39 = vld [vmem:[#allocation24_spill] sm:$0xff]  ;;  %v3646_v30 = vld [vmem:[#allocation22_spill] sm:$0xff]  ;;  %v3647_v53 = vld [vmem:[#allocation25_spill] sm:$0xff] }
  0x5b   :  { %3639 = vst [vmem:[#allocation67_spill] sm:$0xff] %v2965_v42  ;;  %v3650_v1 = vld [vmem:[#allocation26_spill] sm:$0xff] }
  0x5c   :  { %717 = vmatpush.bf16.msra.mxu0 %v2923_v54 }
  0x5d   :  { %730 = vmatpush.bf16.msra.mxu1 %v2927_v37  ;;  %756 = vmatpush.bf16.msra.mxu3 %v2941_v41 }
  0x5e   :  { %743 = vmatpush.bf16.msra.mxu2 %v2929_v32 }
  0x60   :  { %718 = vmatpush.bf16.msra.mxu0 %v2959_v15 }
  0x61   :  { %731 = vmatpush.bf16.msra.mxu1 %v2963_v63  ;;  %757 = vmatpush.bf16.msra.mxu3 %v2968_v13 }
  0x62   :  { %744 = vmatpush.bf16.msra.mxu2 %v2965_v42 }
  0x63   :  { %719 = vmatmul.bf16.vlgmr.msra.gmra.mxu0 %v3620_v18 }
  0x64   :  { %831 = vmatpush.bf16.msrb.mxu0 %v2101_v3  ;;  %732 = vmatmul.bf16.vlgmr.msra.gmra.mxu1 %v2445_v22  ;;  %v3640_v22 = vld [vmem:[#allocation17_spill] sm:$0xff] }
  0x65   :  { %870 = vmatpush.bf16.msrb.mxu3 %v2126_v12  ;;  %745 = vmatmul.bf16.vlgmr.msra.gmra.mxu2 %v2482_v48  ;;  %v3641_v48 = vld [vmem:[#allocation20_spill] sm:$0xff] }
  0x66   :  { %758 = vmatmul.bf16.vlgmr.msra.gmra.mxu3 %v3620_v18  ;;  %844 = vmatpush.bf16.msrb.mxu1 %v2112_v7  ;;  %v3642_v18 = vld [vmem:[#allocation18_spill] sm:$0xff] }
  0x67   :  { %857 = vmatpush.bf16.msrb.mxu2 %v2114_v8 }
  0x68   :  { %832 = vmatpush.bf16.msrb.mxu0 %v2139_v16 }
  0x69   :  { %871 = vmatpush.bf16.msrb.mxu3 %v2164_v25 }
  0x6a   :  { %845 = vmatpush.bf16.msrb.mxu1 %v2141_v17 }
  0x6b   :  { %858 = vmatpush.bf16.msrb.mxu2 %v2153_v21 }
  0x6c   :  { %833 = vmatpush.bf16.msrb.mxu0 %v2176_v29 }
  0x6d   :  { %872 = vmatpush.bf16.msrb.mxu3 %v2203_v38 }
  0x6e   :  { %846 = vmatpush.bf16.msrb.mxu1 %v2189_v33 }
  0x6f   :  { %859 = vmatpush.bf16.msrb.mxu2 %v2191_v34 }
  0x70   :  { %834 = vmatpush.bf16.msrb.mxu0 %v2221_v44 }
  0x71   :  { %873 = vmatpush.bf16.msrb.mxu3 %v2239_v50 }
  0x72   :  { %847 = vmatpush.bf16.msrb.mxu1 %v2225_v45 }
  0x73   :  { %860 = vmatpush.bf16.msrb.mxu2 %v2227_v46 }
  0x74   :  { %835 = vmatpush.bf16.msrb.mxu0 %v2257_v56 }
  0x75   :  { %874 = vmatpush.bf16.msrb.mxu3 %v2275_v62 }
  0x76   :  { %848 = vmatpush.bf16.msrb.mxu1 %v2261_v57 }
  0x77   :  { %861 = vmatpush.bf16.msrb.mxu2 %v2263_v58  ;;  %v3657_v58 = vld [vmem:[#allocation34_spill] sm:$0xff] }
  0x78   :  { %836 = vmatpush.bf16.msrb.mxu0 %v2293_v5 }
  0x79   :  { %875 = vmatpush.bf16.msrb.mxu3 %v2311_v14 }
  0x7a   :  { %849 = vmatpush.bf16.msrb.mxu1 %v2297_v6 }
  0x7b   :  { %862 = vmatpush.bf16.msrb.mxu2 %v2299_v9  ;;  %v3656_v9 = vld [vmem:[#allocation31_spill] sm:$0xff] }
  0x7c   :  { %837 = vmatpush.bf16.msrb.mxu0 %v2329_v23 }
  0x7d   :  { %876 = vmatpush.bf16.msrb.mxu3 %v2353_v35 }
  0x7e   :  { %850 = vmatpush.bf16.msrb.mxu1 %v2339_v27 }
  0x7f   :  { %863 = vmatpush.bf16.msrb.mxu2 %v2341_v28  ;;  %v3654_v28 = vld [vmem:[#allocation30_spill] sm:$0xff] }
  0x80   :  { %838 = vmatpush.bf16.msrb.mxu0 %v2374_v43 }
  0x81   :  { %877 = vmatpush.bf16.msrb.mxu3 %v2398_v55 }
  0x82   :  { %851 = vmatpush.bf16.msrb.mxu1 %v2387_v51 }
  0x83   :  { %864 = vmatpush.bf16.msrb.mxu2 %v2389_v52  ;;  %v3653_v52 = vld [vmem:[#allocation32_spill] sm:$0xff] }
  0x84   :  { %883 = vmatpush.bf16.msra.mxu0 %v2400_v59 }
  0x85   :  { %922 = vmatpush.bf16.msra.mxu3 %v2416_v2 }
  0x86   :  { %896 = vmatpush.bf16.msra.mxu1 %v2402_v60 }
  0x87   :  { %909 = vmatpush.bf16.msra.mxu2 %v2404_v61  ;;  %v3652_v61 = vld [vmem:[#allocation27_spill] sm:$0xff] }
  0x88   :  { %884 = vmatpush.bf16.msra.mxu0 %v2440_v19 }
  0x89   :  { %923 = vmatpush.bf16.msra.mxu3 %v2463_v36 }
  0x8a   :  { %897 = vmatpush.bf16.msra.mxu1 %v2449_v24 }
  0x8b   :  { %910 = vmatpush.bf16.msra.mxu2 %v3640_v22  ;;  %v3651_v22 = vld [vmem:[#allocation29_spill] sm:$0xff] }
  0x8c   :  { %885 = vmatpush.bf16.msra.mxu0 %v2486_v49 }
  0x8d   :  { %924 = vmatpush.bf16.msra.mxu3 %v3641_v48 }
  0x8e   :  { %898 = vmatpush.bf16.msra.mxu1 %v3642_v18 }
  0x8f   :  { %911 = vmatpush.bf16.msra.mxu2 %v3644_v40  ;;  %v3655_v40 = vld [vmem:[#allocation33_spill] sm:$0xff] }
  0x90   :  { %886 = vmatpush.bf16.msra.mxu0 %v3643_v0 }
  0x91   :  { %925 = vmatpush.bf16.msra.mxu3 %v3645_v39 }
  0x92   :  { %899 = vmatpush.bf16.msra.mxu1 %v3646_v30 }
  0x93   :  { %912 = vmatpush.bf16.msra.mxu2 %v3648_v26  ;;  %v3658_v26 = vld [vmem:[#allocation38_spill] sm:$0xff] }
  0x94   :  { %887 = vmatpush.bf16.msra.mxu0 %v3647_v53 }
  0x95   :  { %926 = vmatpush.bf16.msra.mxu3 %v3649_v11 }
  0x96   :  { %900 = vmatpush.bf16.msra.mxu1 %v3650_v1 }
  0x97   :  { %913 = vmatpush.bf16.msra.mxu2 %v3652_v61  ;;  %v3659_v61 = vld [vmem:[#allocation39_spill] sm:$0xff] }
  0x98   :  { %888 = vmatpush.bf16.msra.mxu0 %v3651_v22 }
  0x99   :  { %927 = vmatpush.bf16.msra.mxu3 %v3653_v52 }
  0x9a   :  { %901 = vmatpush.bf16.msra.mxu1 %v3654_v28 }
  0x9b   :  { %914 = vmatpush.bf16.msra.mxu2 %v3656_v9 }
  0x9c   :  { %889 = vmatpush.bf16.msra.mxu0 %v3655_v40 }
  0x9d   :  { %928 = vmatpush.bf16.msra.mxu3 %v2655_v47 }
  0x9e   :  { %902 = vmatpush.bf16.msra.mxu1 %v3657_v58  ;;  %v112_v58 = vld [vmem:[%s3422_s2] sm:$0xf] }
  0x9f   :  { %915 = vmatpush.bf16.msra.mxu2 %v2643_v10  ;;  %v3045_v21 = vperm.slane %v112_v58, 0  ;;  %v3047_v10 = vperm.slane %v112_v58, 1 }
  0xa0   :  { %890 = vmatpush.bf16.msra.mxu0 %v2676_v31  ;;  %v616_v1 = vpop.f32.mrf.mxu0 }
  0xa1   :  { %929 = vmatpush.bf16.msra.mxu3 %v2700_v4  ;;  %3660 = vst [vmem:[#allocation20_spill] sm:$0xff] %v3045_v21 }
  0xa2   :  { %903 = vmatpush.bf16.msra.mxu1 %v3658_v26  ;;  %3661 = vst [vmem:[#allocation21_spill] sm:$0xff] %v3047_v10  ;;  %v617_v26 = vadd.f32 %v616_v1, %v3045_v21 }
  0xa3   :  { %916 = vmatpush.bf16.msra.mxu2 %v3659_v61  ;;  %v629_v28 = vpop.f32.mrf.mxu1 }
  0xa4   :  { %v630_v4 = vadd.f32 %v629_v28, %v617_v26  ;;  %v3663_v28 = vld [vmem:[#allocation44_spill] sm:$0xff] }
  0xa5   :  { %v3667_v26 = vld [vmem:[#allocation52_spill] sm:$0xff] }
  0xa7   :  { %v655_v46 = vpop.f32.mrf.mxu3 }
  0xa8   :  { %v618_v18 = vpop.f32.mrf.mxu0  ;;  %v656_v61 = vadd.f32 %v655_v46, %v3047_v10  ;;  %v3662_v46 = vld [vmem:[#allocation41_spill] sm:$0xff] }
  0xaa   :  { %v642_v30 = vpop.f32.mrf.mxu2 }
  0xab   :  { %v631_v9 = vpop.f32.mrf.mxu1  ;;  %v643_v18 = vadd.f32 %v642_v30, %v630_v4  ;;  %v3666_v30 = vld [vmem:[#allocation49_spill] sm:$0xff] }
  0xad   :  { %v1893_v51 = vmul.f32 -1.442695, %v643_v18 }
  0xaf   :  { %v657_v24 = vpop.f32.mrf.mxu3  ;;  %2002 = vpow2.f32 %v1893_v51  ;;  %v3669_v51 = vld [vmem:[#allocation56_spill] sm:$0xff] }
  0xb0   :  { %v826_v24 = vld [vmem:[%s3421_s0 + $0x10] sm:$0xff] }
  0xb1   :  { %v3054_v40 = vpack.c.bf16 %v826_v24, %v826_v24  ;;  %v3668_v24 = vld [vmem:[#allocation53_spill] sm:$0xff] }
  0xb2   :  { %v644_v34 = vpop.f32.mrf.mxu2 }
  0xb3   :  { %839 = vmatmul.bf16.vlgmr.msrb.gmra.mxu0 %v3054_v40  ;;  %878 = vmatmul.bf16.vlgmr.msrb.gmra.mxu3 %v3054_v40 }
  0xb4   :  { %935 = vmatpush.bf16.msrb.mxu0 %v3662_v46  ;;  %974 = vmatpush.bf16.msrb.mxu3 %v3663_v28 }
  0xb5   :  { %v2003_v4 = vpop.eup %2002 }
  0xb6   :  { %v3064_v18 = vadd.f32 1.0, %v2003_v4  ;;  %v3673_v4 = vld [vmem:[#allocation42_spill] sm:$0xff] }
  0xb8   :  { %vm772_vm0 = vweird.f32 %v3064_v18 }
  0xc0   :  { %v668_v60 = vpop.f32.mrf.mxu0 }
  0xc1   :  { %v669_v31 = vadd.f32 %v668_v60, %v656_v61  ;;  %v681_v8 = vpop.f32.mrf.mxu1  ;;  %v3664_v60 = vld [vmem:[#allocation45_spill] sm:$0xff]  ;;  %v3665_v61 = vld [vmem:[#allocation48_spill] sm:$0xff] }
  0xc2   :  { %936 = vmatpush.bf16.msrb.mxu0 %v3664_v60  ;;  %975 = vmatpush.bf16.msrb.mxu3 %v3665_v61  ;;  %v3676_v61 = vld [vmem:[#allocation64_spill] sm:$0xff]  ;;  %v3677_v60 = vld [vmem:[#allocation46_spill] sm:$0xff] }
  0xc3   :  { %v682_v9 = vadd.f32 %v681_v8, %v669_v31 }
  0xc5   :  { %v1894_v27 = vmul.f32 -1.442695, %v682_v9 }
  0xc6   :  { %937 = vmatpush.bf16.msrb.mxu0 %v3666_v30  ;;  %976 = vmatpush.bf16.msrb.mxu3 %v3667_v26  ;;  %v3090_v30 = vperm.slane %v112_v58, 2 }
  0xc7   :  { %2004 = vpow2.f32 %v1894_v27  ;;  %v827_v27 = vld [vmem:[%s3421_s0 + $0x18] sm:$0xff] }
  0xc8   :  { %v670_v47 = vpop.f32.mrf.mxu0  ;;  %2006 = vrcp.f32 %v3064_v18  ;;  %3675 = vst [vmem:[#allocation69_spill] sm:$0xff] %v3090_v30 }
  0xc9   :  { %v707_v42 = vpop.f32.mrf.mxu3  ;;  %v683_v1 = vpop.f32.mrf.mxu1 }
  0xca   :  { %v694_v34 = vpop.f32.mrf.mxu2  ;;  %938 = vmatpush.bf16.msrb.mxu0 %v3668_v24  ;;  %977 = vmatpush.bf16.msrb.mxu3 %v3669_v51  ;;  %v3073_v1 = vpack.c.bf16 %v827_v27, %v827_v27  ;;  %v3083_v51 = vperm.slane %v112_v58, 3  ;;  %v3678_v58 = vld [vmem:[#allocation50_spill] sm:$0xff] }
  0xcc   :  { %3670 = vst [vmem:[#allocation24_spill] sm:$0xff] %v3073_v1  ;;  %852 = vmatmul.bf16.vlgmr.msrb.gmra.mxu1 %v3073_v1  ;;  %891 = vmatmul.bf16.vlgmr.msra.gmra.mxu0 %v3073_v1 }
  0xcd   :  { %v2005_v31 = vpop.eup %2004  ;;  %930 = vmatmul.bf16.vlgmr.msra.gmra.mxu3 %v3073_v1  ;;  %948 = vmatpush.bf16.msrb.mxu1 %v3673_v4  ;;  %3674 = vst [vmem:[#allocation68_spill] sm:$0xff] %v3083_v51 }
  0xce   :  { %v3066_v9 = vadd.f32 1.0, %v2005_v31  ;;  %v3085_v24 = vpop.eup %2006 }
  0xcf   :  { %v768_v4 = vmul.f32 %v3085_v24, %v3064_v18  ;;  %vm773_vm1 = vweird.f32 %v3085_v24 }
  0xd0   :  { %2008 = vrcp.f32 %v3066_v9  ;;  %vm791_vm2 = vweird.f32 %v3066_v9  ;;  %vm3122_vm4 = vmor %vm772_vm0, %vm773_vm1 }
  0xd1   :  { %v709_v47 = vpop.f32.mrf.mxu3  ;;  %949 = vmatpush.bf16.msrb.mxu1 %v3677_v60 }
  0xd2   :  { %v696_v8 = vpop.f32.mrf.mxu2  ;;  %v3672_v47 = vld [vmem:[#allocation60_spill] sm:$0xff] }
  0xd3   :  { %v3671_v8 = vld [vmem:[#allocation57_spill] sm:$0xff]  ;;  %978 = vmatpush.bf16.msrb.mxu3 %v3672_v47 }
  0xd4   :  { %939 = vmatpush.bf16.msrb.mxu0 %v3671_v8 }
  0xd5   :  { %950 = vmatpush.bf16.msrb.mxu1 %v3678_v58 }
  0xd6   :  { %v3088_v26 = vpop.eup %2008 }
  0xd7   :  { %979 = vmatpush.bf16.msrb.mxu3 %v3676_v61  ;;  %v787_v8 = vmul.f32 %v3088_v26, %v3066_v9  ;;  %vm792_vm3 = vweird.f32 %v3088_v26 }
  0xd8   :  { %940 = vmatpush.bf16.msrb.mxu0 %v2887_v20  ;;  %v695_v20 = vadd.f32 %v694_v34, %v3090_v30  ;;  %vm793_vm5 = vmor %vm791_vm2, %vm792_vm3 }
  0xda   :  { %v708_v1 = vadd.f32 %v707_v42, %v695_v20  ;;  %v778_v20 = vand.u32 2147483648, %v3064_v18 }
  0xdb   :  { %980 = vmatpush.bf16.msrb.mxu3 %v2941_v41 }
  0xdc   :  { %941 = vmatpush.bf16.msrb.mxu0 %v2923_v54  ;;  %v3679_v54 = vld [vmem:[#allocation54_spill] sm:$0xff] }
  0xdd   :  { %951 = vmatpush.bf16.msrb.mxu1 %v3679_v54 }
  0xdf   :  { %981 = vmatpush.bf16.msrb.mxu3 %v2968_v13 }
  0xe0   :  { %v720_v31 = vpop.f32.mrf.mxu0  ;;  %942 = vmatpush.bf16.msrb.mxu0 %v2959_v15 }
  0xe1   :  { %v733_v27 = vpop.f32.mrf.mxu1  ;;  %v721_v58 = vadd.f32 %v720_v31, %v708_v1  ;;  %v797_v1 = vand.u32 2147483648, %v3066_v9  ;;  %v779_v31 = vor.u32 1.1754944e-38, %v778_v20 }
  0xe2   :  { %v734_v47 = vadd.f32 %v733_v27, %v3083_v51  ;;  %v769_v27 = vsub.f32 1.0, %v768_v4  ;;  %v788_v51 = vsub.f32 1.0, %v787_v8  ;;  %v795_v4 = vand.u32 2147483647, %v3066_v9 }
  0xe3   :  { %1094 = vmatpush.bf16.msra.mxu3 %v2126_v12 }
  0xe4   :  { %1055 = vmatpush.bf16.msra.mxu0 %v2101_v3  ;;  %vm796_vm7 = vcmp.eq.f32.partialorder %v795_v4, 8.507059e+37 }
  0xe7   :  { %1095 = vmatpush.bf16.msra.mxu3 %v2164_v25 }
  0xe8   :  { %v746_v28 = vpop.f32.mrf.mxu2  ;;  %v722_v60 = vpop.f32.mrf.mxu0  ;;  %1056 = vmatpush.bf16.msra.mxu0 %v2139_v16 }
  0xe9   :  { %v747_v61 = vadd.f32 %v746_v28, %v734_v47  ;;  %v759_v46 = vpop.f32.mrf.mxu3  ;;  %v735_v10 = vpop.f32.mrf.mxu1  ;;  %v789_v28 = vmul.f32 %v3088_v26, %v788_v51  ;;  %v3683_v47 = vld [vmem:[#allocation62_spill] sm:$0xff] }
  0xea   :  { %v770_v10 = vmul.f32 %v3085_v24, %v769_v27 }
  0xeb   :  { %v760_v21 = vadd.f32 %v759_v46, %v747_v61  ;;  %v3680_v46 = vld [vmem:[#allocation58_spill] sm:$0xff]  ;;  %v790_v51 = vadd.f32 %v3088_v26, %v789_v28  ;;  %1096 = vmatpush.bf16.msra.mxu3 %v2203_v38 }
  0xec   :  { %952 = vmatpush.bf16.msrb.mxu1 %v3680_v46  ;;  %v771_v61 = vadd.f32 %v3085_v24, %v770_v10  ;;  %1057 = vmatpush.bf16.msra.mxu0 %v2176_v29  ;;  %v798_v10 = vor.u32 1.1754944e-38, %v797_v1 }
  0xed   :  { %v1895_v34 = vmul.f32 -1.442695, %v760_v21  ;;  %v776_v21 = vand.u32 2147483647, %v3064_v18  ;;  %v794_v27 = vsel %vm793_vm5, %v3088_v26, %v790_v51 }
  0xef   :  { %2010 = vpow2.f32 %v1895_v34  ;;  %vm777_vm6 = vcmp.eq.f32.partialorder %v776_v21, 8.507059e+37  ;;  %1097 = vmatpush.bf16.msra.mxu3 %v2239_v50 }
  0xf0   :  { %v748_v60 = vpop.f32.mrf.mxu2  ;;  %2012 = vtanh.f32 %v721_v58  ;;  %953 = vmatpush.bf16.msrb.mxu1 %v3683_v47  ;;  %v775_v58 = vsel %vm3122_vm4, %v3085_v24, %v771_v61  ;;  %1058 = vmatpush.bf16.msra.mxu0 %v2221_v44 }
  0xf1   :  { %v761_v42 = vpop.f32.mrf.mxu3  ;;  %v780_v9 = vsel %vm777_vm6, %v779_v31, %v775_v58  ;;  %v799_v60 = vsel %vm796_vm7, %v798_v10, %v794_v27 }
  0xf2   :  { %v821_v24 = vmul.f32 0.0, %v799_v60  ;;  %v3686_v60 = vld [vmem:[#allocation51_spill] sm:$0xff] }
  0xf3   :  { %1098 = vmatpush.bf16.msra.mxu3 %v2275_v62 }
  0xf4   :  { %954 = vmatpush.bf16.msrb.mxu1 %v2927_v37  ;;  %1059 = vmatpush.bf16.msra.mxu0 %v2257_v56 }
  0xf5   :  { %v2011_v18 = vpop.eup %2010 }
  0xf6   :  { %v805_v34 = vadd.f32 1.0, %v2011_v18  ;;  %v2013_v28 = vpop.eup %2012 }
  0xf7   :  { %v822_v42 = vmul.f32 %v2013_v28, %v780_v9  ;;  %1099 = vmatpush.bf16.msra.mxu3 %v2311_v14  ;;  %v3684_v9 = vld [vmem:[#allocation43_spill] sm:$0xff] }
  0xf8   :  { %2014 = vrcp.f32 %v805_v34  ;;  %955 = vmatpush.bf16.msrb.mxu1 %v2963_v63  ;;  %1060 = vmatpush.bf16.msra.mxu0 %v2293_v5  ;;  %v817_v51 = vand.u32 2147483648, %v805_v34  ;;  %v815_v8 = vand.u32 2147483647, %v805_v34  ;;  %vm811_vm9 = vweird.f32 %v805_v34 }
  0xf9   :  { %v3140_v21 = vadd.f32 %v822_v42, %v821_v24  ;;  %v3687_v42 = vld [vmem:[#allocation55_spill] sm:$0xff] }
  0xfa   :  { %v818_v18 = vor.u32 1.1754944e-38, %v817_v51  ;;  %vm816_vm11 = vcmp.eq.f32.partialorder %v815_v8, 8.507059e+37  ;;  %v3688_v24 = vld [vmem:[#allocation59_spill] sm:$0xff]  ;;  %v3695_v8 = vld [vmem:[#allocation2_spill] sm:$0xff] }
  0xfb   :  { %2016 = vtanh.f32 %v3140_v21  ;;  %1100 = vmatpush.bf16.msra.mxu3 %v2353_v35  ;;  %v3693_v51 = vld [vmem:[#allocation67_spill] sm:$0xff] }
  0xfc   :  { %1061 = vmatpush.bf16.msra.mxu0 %v2329_v23 }
  0xfe   :  { %v2015_v26 = vpop.eup %2014 }
  0xff   :  { %v807_v20 = vmul.f32 %v2015_v26, %v805_v34  ;;  %vm812_vm8 = vweird.f32 %v2015_v26  ;;  %1101 = vmatpush.bf16.msra.mxu3 %v2398_v55  ;;  %v3685_v34 = vld [vmem:[#allocation47_spill] sm:$0xff] }
 0x100   :  { %vm813_vm10 = vmor %vm811_vm9, %vm812_vm8  ;;  %1062 = vmatpush.bf16.msra.mxu0 %v2374_v43 }
 0x101   :  { %v808_v61 = vsub.f32 1.0, %v807_v20  ;;  %v2017_v58 = vpop.eup %2016  ;;  %v3690_v20 = vld [vmem:[#allocation10_spill] sm:$0xff] }
 0x103   :  { %v809_v1 = vmul.f32 %v2015_v26, %v808_v61  ;;  %v3692_v61 = vld [vmem:[#allocation36_spill] sm:$0xff] }
 0x105   :  { %v810_v4 = vadd.f32 %v2015_v26, %v809_v1  ;;  %v3694_v1 = vld [vmem:[#allocation12_spill] sm:$0xff] }
 0x107   :  { %v814_v31 = vsel %vm813_vm10, %v2015_v26, %v810_v4  ;;  %v3689_v26 = vld [vmem:[#allocation63_spill] sm:$0xff]  ;;  %v3696_v4 = vld [vmem:[#allocation37_spill] sm:$0xff] }
 0x108   :  { %v819_v27 = vsel %vm816_vm11, %v818_v18, %v814_v31  ;;  %v3697_v18 = vld [vmem:[#allocation14_spill] sm:$0xff]  ;;  %v3698_v31 = vld [vmem:[#allocation40_spill] sm:$0xff] }
 0x109   :  { %v825_v28 = vmul.f32 %v2017_v58, %v819_v27  ;;  %v3699_v58 = vld [vmem:[#allocation24_spill] sm:$0xff]  ;;  %v3700_v27 = vld [vmem:[#allocation3_spill] sm:$0xff] }
 0x10b   :  { %v830_v10 = vpack.c.bf16 %v825_v28, %v825_v28  ;;  %v3701_v28 = vld [vmem:[#allocation16_spill] sm:$0xff] }
 0x10d   :  { %865 = vmatmul.bf16.vlgmr.msrb.gmra.mxu2 %v830_v10  ;;  %904 = vmatmul.bf16.vlgmr.msra.gmra.mxu1 %v830_v10 }
 0x10e   :  { %943 = vmatmul.bf16.vlgmr.msrb.gmra.mxu0 %v830_v10  ;;  %982 = vmatmul.bf16.vlgmr.msrb.gmra.mxu3 %v830_v10  ;;  %v3702_v10 = vld [vmem:[#allocation4_spill] sm:$0xff] }
 0x10f   :  { %961 = vmatpush.bf16.msrb.mxu2 %v3684_v9  ;;  %1068 = vmatpush.bf16.msra.mxu1 %v2112_v7 }
 0x110   :  { %1107 = vmatpush.bf16.msrb.mxu0 %v2400_v59  ;;  %1146 = vmatpush.bf16.msrb.mxu3 %v2416_v2 }
 0x113   :  { %962 = vmatpush.bf16.msrb.mxu2 %v3685_v34  ;;  %1069 = vmatpush.bf16.msra.mxu1 %v2141_v17 }
 0x114   :  { %1108 = vmatpush.bf16.msrb.mxu0 %v2440_v19  ;;  %1147 = vmatpush.bf16.msrb.mxu3 %v2463_v36 }
 0x117   :  { %963 = vmatpush.bf16.msrb.mxu2 %v3686_v60  ;;  %1070 = vmatpush.bf16.msra.mxu1 %v2189_v33 }
 0x118   :  { %1109 = vmatpush.bf16.msrb.mxu0 %v2486_v49  ;;  %1148 = vmatpush.bf16.msrb.mxu3 %v3641_v48 }
 0x11b   :  { %964 = vmatpush.bf16.msrb.mxu2 %v3687_v42  ;;  %1071 = vmatpush.bf16.msra.mxu1 %v2225_v45 }
 0x11c   :  { %1110 = vmatpush.bf16.msrb.mxu0 %v3643_v0  ;;  %1149 = vmatpush.bf16.msrb.mxu3 %v3645_v39 }
 0x11d   :  { %917 = vmatmul.bf16.vlgmr.msra.gmra.mxu2 %v3054_v40  ;;  %956 = vmatmul.bf16.vlgmr.msrb.gmra.mxu1 %v3054_v40  ;;  %v3691_v40 = vld [vmem:[#allocation33_spill] sm:$0xff] }
 0x11f   :  { %965 = vmatpush.bf16.msrb.mxu2 %v3688_v24  ;;  %1072 = vmatpush.bf16.msra.mxu1 %v2261_v57  ;;  %v3731_v57 = vld [vmem:[#allocation53_spill] sm:$0xff] }
 0x120   :  { %1111 = vmatpush.bf16.msrb.mxu0 %v3647_v53  ;;  %1150 = vmatpush.bf16.msrb.mxu3 %v3649_v11  ;;  %v3723_v11 = vld [vmem:[#allocation39_spill] sm:$0xff] }
 0x123   :  { %966 = vmatpush.bf16.msrb.mxu2 %v3689_v26  ;;  %1073 = vmatpush.bf16.msra.mxu1 %v2297_v6  ;;  %v3721_v6 = vld [vmem:[#allocation31_spill] sm:$0xff] }
 0x124   :  { %1112 = vmatpush.bf16.msrb.mxu0 %v3651_v22  ;;  %1151 = vmatpush.bf16.msrb.mxu3 %v3653_v52  ;;  %v3720_v52 = vld [vmem:[#allocation27_spill] sm:$0xff] }
 0x125   :  { %v3722_v26 = vld [vmem:[#allocation35_spill] sm:$0xff] }
 0x127   :  { %967 = vmatpush.bf16.msrb.mxu2 %v2929_v32  ;;  %1074 = vmatpush.bf16.msra.mxu1 %v3690_v20 }
 0x128   :  { %1113 = vmatpush.bf16.msrb.mxu0 %v3691_v40  ;;  %1152 = vmatpush.bf16.msrb.mxu3 %v3692_v61  ;;  %v3703_v61 = vld [vmem:[#allocation18_spill] sm:$0xff]  ;;  %v3716_v40 = vld [vmem:[#allocation19_spill] sm:$0xff] }
 0x12b   :  { %968 = vmatpush.bf16.msrb.mxu2 %v3693_v51  ;;  %1075 = vmatpush.bf16.msra.mxu1 %v3694_v1  ;;  %v3704_v51 = vld [vmem:[#allocation5_spill] sm:$0xff]  ;;  %v3705_v1 = vld [vmem:[#allocation22_spill] sm:$0xff] }
 0x12c   :  { %1114 = vmatpush.bf16.msrb.mxu0 %v3696_v4  ;;  %1153 = vmatpush.bf16.msrb.mxu3 %v3698_v31  ;;  %v3707_v4 = vld [vmem:[#allocation26_spill] sm:$0xff] }
 0x12d   :  { %v3709_v31 = vld [vmem:[#allocation30_spill] sm:$0xff] }
 0x12e   :  { %969 = vmatmul.bf16.vlgmr.msrb.gmra.mxu2 %v3699_v58  ;;  %v3710_v58 = vld [vmem:[#allocation11_spill] sm:$0xff] }
 0x12f   :  { %1081 = vmatpush.bf16.msra.mxu2 %v3695_v8  ;;  %1120 = vmatpush.bf16.msrb.mxu1 %v3697_v18  ;;  %v3706_v8 = vld [vmem:[#allocation7_spill] sm:$0xff]  ;;  %v3708_v18 = vld [vmem:[#allocation9_spill] sm:$0xff] }
 0x133   :  { %1082 = vmatpush.bf16.msra.mxu2 %v3700_v27  ;;  %1121 = vmatpush.bf16.msrb.mxu1 %v3701_v28  ;;  %v3711_v27 = vld [vmem:[#allocation34_spill] sm:$0xff]  ;;  %v3712_v28 = vld [vmem:[#allocation13_spill] sm:$0xff] }
 0x137   :  { %1083 = vmatpush.bf16.msra.mxu2 %v3702_v10  ;;  %1122 = vmatpush.bf16.msrb.mxu1 %v3703_v61  ;;  %v3713_v10 = vld [vmem:[#allocation15_spill] sm:$0xff]  ;;  %v3714_v61 = vld [vmem:[#allocation38_spill] sm:$0xff] }
 0x13b   :  { %1084 = vmatpush.bf16.msra.mxu2 %v3704_v51  ;;  %1123 = vmatpush.bf16.msrb.mxu1 %v3705_v1  ;;  %v840_v51 = vpop.f32.mrf.mxu0  ;;  %v3715_v1 = vld [vmem:[#allocation17_spill] sm:$0xff] }
 0x13f   :  { %1085 = vmatpush.bf16.msra.mxu2 %v3706_v8  ;;  %1124 = vmatpush.bf16.msrb.mxu1 %v3707_v4  ;;  %v879_v8 = vpop.f32.mrf.mxu3 }
 0x143   :  { %1086 = vmatpush.bf16.msra.mxu2 %v3708_v18  ;;  %1125 = vmatpush.bf16.msrb.mxu1 %v3709_v31  ;;  %v842_v4 = vpop.f32.mrf.mxu0  ;;  %v3717_v18 = vld [vmem:[#allocation23_spill] sm:$0xff]  ;;  %v3718_v31 = vld [vmem:[#allocation20_spill] sm:$0xff] }
 0x144   :  { %v841_v20 = vadd.f32 %v840_v51, %v3718_v31 }
 0x147   :  { %1087 = vmatpush.bf16.msra.mxu2 %v3710_v58  ;;  %1126 = vmatpush.bf16.msrb.mxu1 %v3711_v27  ;;  %v3719_v58 = vld [vmem:[#allocation21_spill] sm:$0xff]  ;;  %v881_v27 = vpop.f32.mrf.mxu3 }
 0x148   :  { %v880_v32 = vadd.f32 %v879_v8, %v3719_v58 }
 0x14b   :  { %1088 = vmatpush.bf16.msra.mxu2 %v3712_v28  ;;  %1127 = vmatpush.bf16.msrb.mxu1 %v3714_v61  ;;  %v853_v28 = vpop.f32.mrf.mxu1 }
 0x14c   :  { %v854_v22 = vadd.f32 %v853_v28, %v841_v20 }
 0x14f   :  { %1133 = vmatpush.bf16.msrb.mxu2 %v3713_v10  ;;  %v892_v10 = vpop.f32.mrf.mxu0 }
 0x150   :  { %v893_v61 = vadd.f32 %v892_v10, %v880_v32 }
 0x153   :  { %1134 = vmatpush.bf16.msrb.mxu2 %v3715_v1  ;;  %v931_v1 = vpop.f32.mrf.mxu3 }
 0x157   :  { %1135 = vmatpush.bf16.msrb.mxu2 %v3716_v40  ;;  %v855_v40 = vpop.f32.mrf.mxu1  ;;  %v894_v4 = vpop.f32.mrf.mxu0 }
 0x158   :  { %v1050_v40 = vld [vmem:[%s3421_s0 + $0x20] sm:$0xff] }
 0x159   :  { %v3215_v10 = vpack.c.bf16 %v1050_v40, %v1050_v40 }
 0x15b   :  { %1136 = vmatpush.bf16.msrb.mxu2 %v3717_v18  ;;  %v933_v18 = vpop.f32.mrf.mxu3  ;;  %3724 = vst [vmem:[#allocation54_spill] sm:$0xff] %v3215_v10  ;;  %1063 = vmatmul.bf16.vlgmr.msra.gmra.mxu0 %v3215_v10 }
 0x15c   :  { %1102 = vmatmul.bf16.vlgmr.msra.gmra.mxu3 %v3215_v10 }
 0x15f   :  { %1137 = vmatpush.bf16.msrb.mxu2 %v3720_v52 }
 0x163   :  { %1138 = vmatpush.bf16.msrb.mxu2 %v3721_v6 }
 0x167   :  { %1139 = vmatpush.bf16.msrb.mxu2 %v3722_v26 }
 0x16b   :  { %1140 = vmatpush.bf16.msrb.mxu2 %v3723_v11  ;;  %v3730_v11 = vld [vmem:[#allocation52_spill] sm:$0xff] }
 0x18a   :  { %v905_v51 = vpop.f32.mrf.mxu1 }
 0x18b   :  { %v906_v31 = vadd.f32 %v905_v51, %v893_v61  ;;  %v944_v8 = vpop.f32.mrf.mxu0  ;;  %v3725_v61 = vld [vmem:[#allocation41_spill] sm:$0xff] }
 0x18c   :  { %1159 = vmatpush.bf16.msra.mxu0 %v3725_v61 }
 0x18d   :  { %v1897_v27 = vmul.f32 -1.442695, %v906_v31 }
 0x18f   :  { %2018 = vpow2.f32 %v1897_v27  ;;  %v3727_v27 = vld [vmem:[#allocation45_spill] sm:$0xff] }
 0x190   :  { %v866_v52 = vpop.f32.mrf.mxu2  ;;  %1160 = vmatpush.bf16.msra.mxu0 %v3727_v27  ;;  %v3732_v27 = vld [vmem:[#allocation56_spill] sm:$0xff] }
 0x191   :  { %v867_v58 = vadd.f32 %v866_v52, %v854_v22  ;;  %v3210_v53 = vpop.f32.mrf.mxu3  ;;  %v3726_v52 = vld [vmem:[#allocation44_spill] sm:$0xff] }
 0x192   :  { %v907_v32 = vpop.f32.mrf.mxu1  ;;  %1198 = vmatpush.bf16.msra.mxu3 %v3726_v52 }
 0x193   :  { %v1896_v20 = vmul.f32 -1.442695, %v867_v58  ;;  %v946_v28 = vpop.f32.mrf.mxu0  ;;  %v3728_v32 = vld [vmem:[#allocation48_spill] sm:$0xff] }
 0x195   :  { %v2019_v4 = vpop.eup %2018  ;;  %2020 = vpow2.f32 %v1896_v20 }
 0x196   :  { %v1009_v18 = vadd.f32 1.0, %v2019_v4  ;;  %1199 = vmatpush.bf16.msra.mxu3 %v3728_v32  ;;  %v3729_v4 = vld [vmem:[#allocation49_spill] sm:$0xff] }
 0x197   :  { %1161 = vmatpush.bf16.msra.mxu0 %v3729_v4 }
 0x198   :  { %2022 = vrcp.f32 %v1009_v18  ;;  %v868_v22 = vpop.f32.mrf.mxu2  ;;  %v1021_v10 = vand.u32 2147483648, %v1009_v18  ;;  %vm1015_vm13 = vweird.f32 %v1009_v18 }
 0x199   :  { %v985_v31 = vpop.f32.mrf.mxu3 }
 0x19a   :  { %v957_v58 = vpop.f32.mrf.mxu1  ;;  %1200 = vmatpush.bf16.msra.mxu3 %v3730_v11 }
 0x19b   :  { %v2021_v51 = vpop.eup %2020  ;;  %1162 = vmatpush.bf16.msra.mxu0 %v3731_v57 }
 0x19c   :  { %v990_v28 = vadd.f32 1.0, %v2021_v51  ;;  %v1051_v51 = vld [vmem:[%s3421_s0 + $0x28] sm:$0xff] }
 0x19d   :  { %v3231_v24 = vpack.c.bf16 %v1051_v51, %v1051_v51 }
 0x19e   :  { %v2023_v20 = vpop.eup %2022  ;;  %2024 = vrcp.f32 %v990_v28  ;;  %1201 = vmatpush.bf16.msra.mxu3 %v3732_v27  ;;  %vm996_vm1 = vweird.f32 %v990_v28  ;;  %v3739_v27 = vld [vmem:[#allocation61_spill] sm:$0xff] }
 0x19f   :  { %v1011_v40 = vmul.f32 %v2023_v20, %v1009_v18  ;;  %3733 = vst [vmem:[#allocation58_spill] sm:$0xff] %v3231_v24  ;;  %vm1016_vm12 = vweird.f32 %v2023_v20  ;;  %1076 = vmatmul.bf16.vlgmr.msra.gmra.mxu1 %v3231_v24  ;;  %1115 = vmatmul.bf16.vlgmr.msrb.gmra.mxu0 %v3231_v24 }
 0x1a0   :  { %v918_v61 = vpop.f32.mrf.mxu2  ;;  %1154 = vmatmul.bf16.vlgmr.msrb.gmra.mxu3 %v3231_v24  ;;  %vm3237_vm14 = vmor %vm1015_vm13, %vm1016_vm12 }
 0x1a1   :  { %v1012_v26 = vsub.f32 1.0, %v1011_v40  ;;  %v919_v52 = vadd.f32 %v918_v61, %v3090_v30  ;;  %v3734_v61 = vld [vmem:[#allocation57_spill] sm:$0xff] }
 0x1a2   :  { %v959_v22 = vpop.f32.mrf.mxu1  ;;  %1163 = vmatpush.bf16.msra.mxu0 %v3734_v61 }
 0x1a3   :  { %v1013_v31 = vmul.f32 %v2023_v20, %v1012_v26  ;;  %v932_v6 = vadd.f32 %v931_v1, %v919_v52  ;;  %v1019_v26 = vand.u32 2147483647, %v1009_v18  ;;  %v1002_v22 = vand.u32 2147483648, %v990_v28  ;;  %v3744_v52 = vld [vmem:[#allocation50_spill] sm:$0xff] }
 0x1a4   :  { %v2025_v32 = vpop.eup %2024 }
 0x1a5   :  { %v1014_v4 = vadd.f32 %v2023_v20, %v1013_v31  ;;  %v992_v11 = vmul.f32 %v2025_v32, %v990_v28  ;;  %v945_v40 = vadd.f32 %v944_v8, %v932_v6  ;;  %v3737_v6 = vld [vmem:[#allocation60_spill] sm:$0xff]  ;;  %v3738_v8 = vld [vmem:[#allocation42_spill] sm:$0xff]  ;;  %vm997_vm15 = vweird.f32 %v2025_v32 }
 0x1a6   :  { %1202 = vmatpush.bf16.msra.mxu3 %v3737_v6  ;;  %1172 = vmatpush.bf16.msra.mxu1 %v3738_v8  ;;  %vm1020_vm0 = vcmp.eq.f32.partialorder %v1019_v26, 8.507059e+37  ;;  %vm998_vm2 = vmor %vm996_vm1, %vm997_vm15  ;;  %v1003_v57 = vor.u32 1.1754944e-38, %v1002_v22  ;;  %v3741_v6 = vld [vmem:[#allocation46_spill] sm:$0xff] }
 0x1a7   :  { %v993_v1 = vsub.f32 1.0, %v992_v11  ;;  %2026 = vtanh.f32 %v945_v40  ;;  %v1018_v51 = vsel %vm3237_vm14, %v2023_v20, %v1014_v4  ;;  %v1000_v11 = vand.u32 2147483647, %v990_v28  ;;  %1164 = vmatpush.bf16.msra.mxu0 %v3739_v27  ;;  %v3742_v4 = vld [vmem:[#allocation68_spill] sm:$0xff]  ;;  %v3743_v28 = vld [vmem:[#allocation65_spill] sm:$0xff] }
 0x1a8   :  { %v920_v31 = vpop.f32.mrf.mxu2  ;;  %v1022_v40 = vor.u32 1.1754944e-38, %v1021_v10 }
 0x1a9   :  { %v994_v18 = vmul.f32 %v2025_v32, %v993_v1  ;;  %v3740_v31 = vld [vmem:[#allocation64_spill] sm:$0xff]  ;;  %vm1001_vm3 = vcmp.eq.f32.partialorder %v1000_v11, 8.507059e+37  ;;  %v958_v1 = vadd.f32 %v957_v58, %v3742_v4  ;;  %v3761_v58 = vld [vmem:[#allocation37_spill] sm:$0xff]  ;;  %v3764_v11 = vld [vmem:[#allocation58_spill] sm:$0xff] }
 0x1aa   :  { %v1023_v30 = vsel %vm1020_vm0, %v1022_v40, %v1018_v51  ;;  %1203 = vmatpush.bf16.msra.mxu3 %v3740_v31  ;;  %1173 = vmatpush.bf16.msra.mxu1 %v3741_v6  ;;  %v3765_v40 = vld [vmem:[#allocation3_spill] sm:$0xff] }
 0x1ab   :  { %v995_v61 = vadd.f32 %v2025_v32, %v994_v18  ;;  %v1045_v10 = vmul.f32 %v1023_v30, %v3140_v21  ;;  %1165 = vmatpush.bf16.msra.mxu0 %v3743_v28 }
 0x1ad   :  { %v2027_v8 = vpop.eup %2026  ;;  %v999_v24 = vsel %vm998_vm2, %v2025_v32, %v995_v61  ;;  %v3762_v61 = vld [vmem:[#allocation14_spill] sm:$0xff] }
 0x1ae   :  { %v1004_v20 = vsel %vm1001_vm3, %v1003_v57, %v999_v24  ;;  %1204 = vmatpush.bf16.msra.mxu3 %v2941_v41  ;;  %1174 = vmatpush.bf16.msra.mxu1 %v3744_v52 }
 0x1af   :  { %v1046_v26 = vmul.f32 %v2027_v8, %v1004_v20  ;;  %1166 = vmatpush.bf16.msra.mxu0 %v2959_v15  ;;  %v3763_v8 = vld [vmem:[#allocation40_spill] sm:$0xff] }
 0x1b0   :  { %v3766_v20 = vld [vmem:[#allocation16_spill] sm:$0xff] }
 0x1b1   :  { %v3253_v22 = vadd.f32 %v1046_v26, %v1045_v10  ;;  %v970_v51 = vpop.f32.mrf.mxu2  ;;  %v3768_v10 = vld [vmem:[#allocation18_spill] sm:$0xff]  ;;  %v3769_v26 = vld [vmem:[#allocation5_spill] sm:$0xff] }
 0x1b2   :  { %v971_v18 = vadd.f32 %v970_v51, %v958_v1  ;;  %1205 = vmatpush.bf16.msra.mxu3 %v2968_v13  ;;  %1175 = vmatpush.bf16.msra.mxu1 %v3679_v54  ;;  %v3767_v1 = vld [vmem:[#allocation4_spill] sm:$0xff]  ;;  %v3770_v51 = vld [vmem:[#allocation22_spill] sm:$0xff] }
 0x1b3   :  { %1279 = vmatpush.bf16.msrb.mxu0 %v2101_v3 }
 0x1b4   :  { %v984_v32 = vadd.f32 %v3210_v53, %v971_v18  ;;  %v3771_v18 = vld [vmem:[#allocation7_spill] sm:$0xff] }
 0x1b6   :  { %1318 = vmatpush.bf16.msrb.mxu3 %v2126_v12  ;;  %v1898_v57 = vmul.f32 -1.442695, %v984_v32  ;;  %1176 = vmatpush.bf16.msra.mxu1 %v3680_v46  ;;  %v3772_v32 = vld [vmem:[#allocation26_spill] sm:$0xff] }
 0x1b7   :  { %1280 = vmatpush.bf16.msrb.mxu0 %v2139_v16 }
 0x1b8   :  { %2028 = vpow2.f32 %v1898_v57  ;;  %v3773_v57 = vld [vmem:[#allocation9_spill] sm:$0xff] }
 0x1b9   :  { %v972_v30 = vpop.f32.mrf.mxu2 }
 0x1ba   :  { %1319 = vmatpush.bf16.msrb.mxu3 %v2164_v25  ;;  %1177 = vmatpush.bf16.msra.mxu1 %v3683_v47  ;;  %v3774_v30 = vld [vmem:[#allocation30_spill] sm:$0xff] }
 0x1bb   :  { %1281 = vmatpush.bf16.msrb.mxu0 %v2176_v29 }
 0x1be   :  { %1320 = vmatpush.bf16.msrb.mxu3 %v2203_v38  ;;  %v2029_v53 = vpop.eup %2028  ;;  %1178 = vmatpush.bf16.msra.mxu1 %v2927_v37 }
 0x1bf   :  { %v1029_v21 = vadd.f32 1.0, %v2029_v53  ;;  %1282 = vmatpush.bf16.msrb.mxu0 %v2221_v44  ;;  %v3775_v53 = vld [vmem:[#allocation11_spill] sm:$0xff] }
 0x1c1   :  { %2030 = vrcp.f32 %v1029_v21  ;;  %v1041_v25 = vand.u32 2147483648, %v1029_v21  ;;  %v1039_v38 = vand.u32 2147483647, %v1029_v21  ;;  %vm1035_vm5 = vweird.f32 %v1029_v21 }
 0x1c2   :  { %1321 = vmatpush.bf16.msrb.mxu3 %v2239_v50  ;;  %1179 = vmatpush.bf16.msra.mxu1 %v2963_v63  ;;  %2032 = vtanh.f32 %v3253_v22 }
 0x1c3   :  { %1283 = vmatpush.bf16.msrb.mxu0 %v2257_v56  ;;  %v1042_v50 = vor.u32 1.1754944e-38, %v1041_v25  ;;  %vm1040_vm7 = vcmp.eq.f32.partialorder %v1039_v38, 8.507059e+37 }
 0x1c6   :  { %1322 = vmatpush.bf16.msrb.mxu3 %v2275_v62 }
 0x1c7   :  { %v2031_v3 = vpop.eup %2030  ;;  %1284 = vmatpush.bf16.msrb.mxu0 %v2293_v5 }
 0x1c8   :  { %v1031_v12 = vmul.f32 %v2031_v3, %v1029_v21  ;;  %vm1036_vm4 = vweird.f32 %v2031_v3  ;;  %v2033_v62 = vpop.eup %2032  ;;  %v3776_v21 = vld [vmem:[#allocation34_spill] sm:$0xff] }
 0x1c9   :  { %vm1037_vm6 = vmor %vm1035_vm5, %vm1036_vm4 }
 0x1ca   :  { %1323 = vmatpush.bf16.msrb.mxu3 %v2311_v14  ;;  %v1032_v16 = vsub.f32 1.0, %v1031_v12  ;;  %v3778_v12 = vld [vmem:[#allocation15_spill] sm:$0xff] }
 0x1cb   :  { %1285 = vmatpush.bf16.msrb.mxu0 %v2329_v23  ;;  %v3747_v23 = vld [vmem:[#allocation6_spill] sm:$0xff] }
 0x1cc   :  { %v1033_v29 = vmul.f32 %v2031_v3, %v1032_v16  ;;  %v3779_v16 = vld [vmem:[#allocation38_spill] sm:$0xff] }
 0x1ce   :  { %1324 = vmatpush.bf16.msrb.mxu3 %v2353_v35  ;;  %v1034_v44 = vadd.f32 %v2031_v3, %v1033_v29  ;;  %v3749_v35 = vld [vmem:[#allocation28_spill] sm:$0xff]  ;;  %v3780_v29 = vld [vmem:[#allocation17_spill] sm:$0xff] }
 0x1cf   :  { %1286 = vmatpush.bf16.msrb.mxu0 %v2374_v43  ;;  %v3750_v43 = vld [vmem:[#allocation63_spill] sm:$0xff] }
 0x1d0   :  { %v1038_v56 = vsel %vm1037_vm6, %v2031_v3, %v1034_v44  ;;  %v3777_v3 = vld [vmem:[#allocation13_spill] sm:$0xff]  ;;  %v3781_v44 = vld [vmem:[#allocation19_spill] sm:$0xff] }
 0x1d1   :  { %v1043_v5 = vsel %vm1040_vm7, %v1042_v50, %v1038_v56  ;;  %v3782_v56 = vld [vmem:[#allocation23_spill] sm:$0xff] }
 0x1d2   :  { %1325 = vmatpush.bf16.msrb.mxu3 %v2398_v55  ;;  %v1049_v14 = vmul.f32 %v2033_v62, %v1043_v5  ;;  %v3751_v55 = vld [vmem:[#allocation8_spill] sm:$0xff] }
 0x1d3   :  { %v3783_v62 = vld [vmem:[#allocation20_spill] sm:$0xff] }
 0x1d4   :  { %v1054_v24 = vpack.c.bf16 %v1049_v14, %v1049_v14  ;;  %v3784_v14 = vld [vmem:[#allocation21_spill] sm:$0xff] }
 0x1d6   :  { %1089 = vmatmul.bf16.vlgmr.msra.gmra.mxu2 %v1054_v24  ;;  %1128 = vmatmul.bf16.vlgmr.msrb.gmra.mxu1 %v1054_v24 }
 0x1d7   :  { %1167 = vmatmul.bf16.vlgmr.msra.gmra.mxu0 %v1054_v24  ;;  %1206 = vmatmul.bf16.vlgmr.msra.gmra.mxu3 %v1054_v24 }
 0x1d8   :  { %1185 = vmatpush.bf16.msra.mxu2 %v3684_v9  ;;  %1292 = vmatpush.bf16.msrb.mxu1 %v2112_v7  ;;  %v3745_v7 = vld [vmem:[#allocation54_spill] sm:$0xff]  ;;  %v1064_v25 = vpop.f32.mrf.mxu0 }
 0x1d9   :  { %1331 = vmatpush.bf16.msra.mxu0 %v2400_v59  ;;  %1370 = vmatpush.bf16.msra.mxu3 %v2416_v2  ;;  %v3753_v59 = vld [vmem:[#allocation32_spill] sm:$0xff]  ;;  %v3754_v2 = vld [vmem:[#allocation66_spill] sm:$0xff]  ;;  %v1065_v5 = vadd.f32 %v1064_v25, %v3783_v62 }
 0x1dc   :  { %1186 = vmatpush.bf16.msra.mxu2 %v3685_v34  ;;  %1293 = vmatpush.bf16.msrb.mxu1 %v2141_v17  ;;  %v3746_v17 = vld [vmem:[#allocation59_spill] sm:$0xff] }
 0x1dd   :  { %1332 = vmatpush.bf16.msra.mxu0 %v2440_v19  ;;  %1371 = vmatpush.bf16.msra.mxu3 %v2463_v36  ;;  %v3755_v19 = vld [vmem:[#allocation10_spill] sm:$0xff]  ;;  %v3756_v36 = vld [vmem:[#allocation33_spill] sm:$0xff] }
 0x1df   :  { %v1103_v38 = vpop.f32.mrf.mxu3 }
 0x1e0   :  { %1187 = vmatpush.bf16.msra.mxu2 %v3686_v60  ;;  %1294 = vmatpush.bf16.msrb.mxu1 %v2189_v33  ;;  %v3748_v33 = vld [vmem:[#allocation25_spill] sm:$0xff]  ;;  %v1066_v50 = vpop.f32.mrf.mxu0  ;;  %v1104_v24 = vadd.f32 %v1103_v38, %v3784_v14 }
 0x1e1   :  { %1333 = vmatpush.bf16.msra.mxu0 %v2486_v49  ;;  %1372 = vmatpush.bf16.msra.mxu3 %v3641_v48  ;;  %v3757_v49 = vld [vmem:[#allocation36_spill] sm:$0xff]  ;;  %v3758_v48 = vld [vmem:[#allocation67_spill] sm:$0xff]  ;;  %v3791_v38 = vld [vmem:[#allocation45_spill] sm:$0xff] }
 0x1e4   :  { %1188 = vmatpush.bf16.msra.mxu2 %v3687_v42  ;;  %1295 = vmatpush.bf16.msrb.mxu1 %v2225_v45  ;;  %v3752_v45 = vld [vmem:[#allocation29_spill] sm:$0xff] }
 0x1e5   :  { %1334 = vmatpush.bf16.msra.mxu0 %v3643_v0  ;;  %1373 = vmatpush.bf16.msra.mxu3 %v3645_v39  ;;  %v3759_v0 = vld [vmem:[#allocation12_spill] sm:$0xff]  ;;  %v3760_v39 = vld [vmem:[#allocation2_spill] sm:$0xff] }
 0x1e6   :  { %1141 = vmatmul.bf16.vlgmr.msrb.gmra.mxu2 %v3745_v7  ;;  %1180 = vmatmul.bf16.vlgmr.msra.gmra.mxu1 %v3745_v7 }
 0x1e7   :  { %v1105_v7 = vpop.f32.mrf.mxu3 }
 0x1e8   :  { %1189 = vmatpush.bf16.msra.mxu2 %v3746_v17  ;;  %1296 = vmatpush.bf16.msrb.mxu1 %v3747_v23  ;;  %v3785_v23 = vld [vmem:[#allocation27_spill] sm:$0xff]  ;;  %v3794_v7 = vld [vmem:[#allocation52_spill] sm:$0xff] }
 0x1e9   :  { %1335 = vmatpush.bf16.msra.mxu0 %v3748_v33  ;;  %1374 = vmatpush.bf16.msra.mxu3 %v3749_v35 }
 0x1ec   :  { %1190 = vmatpush.bf16.msra.mxu2 %v3750_v43  ;;  %1297 = vmatpush.bf16.msrb.mxu1 %v3751_v55 }
 0x1ed   :  { %1336 = vmatpush.bf16.msra.mxu0 %v3752_v45  ;;  %1375 = vmatpush.bf16.msra.mxu3 %v3753_v59  ;;  %v3786_v59 = vld [vmem:[#allocation31_spill] sm:$0xff] }
 0x1f0   :  { %1191 = vmatpush.bf16.msra.mxu2 %v3754_v2  ;;  %1298 = vmatpush.bf16.msrb.mxu1 %v3755_v19 }
 0x1f1   :  { %1337 = vmatpush.bf16.msra.mxu0 %v3756_v36  ;;  %1376 = vmatpush.bf16.msra.mxu3 %v3757_v49  ;;  %v3787_v36 = vld [vmem:[#allocation35_spill] sm:$0xff] }
 0x1f4   :  { %1192 = vmatpush.bf16.msra.mxu2 %v3758_v48  ;;  %1299 = vmatpush.bf16.msrb.mxu1 %v3759_v0 }
 0x1f5   :  { %1338 = vmatpush.bf16.msra.mxu0 %v3761_v58  ;;  %1377 = vmatpush.bf16.msra.mxu3 %v3763_v8 }
 0x1f7   :  { %1193 = vmatmul.bf16.vlgmr.msra.gmra.mxu2 %v3764_v11 }
 0x1f8   :  { %1305 = vmatpush.bf16.msrb.mxu2 %v3760_v39  ;;  %1344 = vmatpush.bf16.msra.mxu1 %v3762_v61  ;;  %v3788_v39 = vld [vmem:[#allocation39_spill] sm:$0xff] }
 0x1fc   :  { %1306 = vmatpush.bf16.msrb.mxu2 %v3765_v40  ;;  %1345 = vmatpush.bf16.msra.mxu1 %v3766_v20 }
 0x200   :  { %1307 = vmatpush.bf16.msrb.mxu2 %v3767_v1  ;;  %1346 = vmatpush.bf16.msra.mxu1 %v3768_v10 }
 0x204   :  { %1308 = vmatpush.bf16.msrb.mxu2 %v3769_v26  ;;  %1347 = vmatpush.bf16.msra.mxu1 %v3770_v51 }
 0x208   :  { %1309 = vmatpush.bf16.msrb.mxu2 %v3771_v18  ;;  %1348 = vmatpush.bf16.msra.mxu1 %v3772_v32  ;;  %v1274_v32 = vld [vmem:[%s3421_s0 + $0x30] sm:$0xff] }
 0x209   :  { %1498 = vst [vmem:[%s3423_s3] sm:$0xff] %v1274_v32 }
 0x20c   :  { %1310 = vmatpush.bf16.msrb.mxu2 %v3773_v57  ;;  %1349 = vmatpush.bf16.msra.mxu1 %v3774_v30  ;;  %v3346_v57 = vpack.c.bf16 %v1274_v32, %v1274_v32 }
 0x20e   :  { %1287 = vmatmul.bf16.vlgmr.msrb.gmra.mxu0 %v3346_v57  ;;  %1326 = vmatmul.bf16.vlgmr.msrb.gmra.mxu3 %v3346_v57 }
 0x210   :  { %1311 = vmatpush.bf16.msrb.mxu2 %v3775_v53  ;;  %1350 = vmatpush.bf16.msra.mxu1 %v3776_v21  ;;  %v3789_v21 = vld [vmem:[#allocation41_spill] sm:$0xff] }
 0x211   :  { %1383 = vmatpush.bf16.msrb.mxu0 %v3789_v21  ;;  %v3802_v21 = vld [vmem:[#allocation42_spill] sm:$0xff] }
 0x214   :  { %1312 = vmatpush.bf16.msrb.mxu2 %v3777_v3  ;;  %1351 = vmatpush.bf16.msra.mxu1 %v3779_v16  ;;  %v3790_v3 = vld [vmem:[#allocation44_spill] sm:$0xff] }
 0x215   :  { %1422 = vmatpush.bf16.msrb.mxu3 %v3790_v3  ;;  %1384 = vmatpush.bf16.msrb.mxu0 %v3791_v38 }
 0x218   :  { %1357 = vmatpush.bf16.msra.mxu2 %v3778_v12 }
 0x21c   :  { %1358 = vmatpush.bf16.msra.mxu2 %v3780_v29  ;;  %v1077_v33 = vpop.f32.mrf.mxu1  ;;  %v1116_v35 = vpop.f32.mrf.mxu0 }
 0x21d   :  { %v1078_v55 = vadd.f32 %v1077_v33, %v1065_v5  ;;  %v1117_v45 = vadd.f32 %v1116_v35, %v1104_v24  ;;  %v3793_v24 = vld [vmem:[#allocation49_spill] sm:$0xff] }
 0x21e   :  { %1385 = vmatpush.bf16.msrb.mxu0 %v3793_v24  ;;  %v3795_v35 = vld [vmem:[#allocation69_spill] sm:$0xff] }
 0x220   :  { %1359 = vmatpush.bf16.msra.mxu2 %v3781_v44  ;;  %v3792_v44 = vld [vmem:[#allocation48_spill] sm:$0xff] }
 0x221   :  { %1423 = vmatpush.bf16.msrb.mxu3 %v3792_v44 }
 0x223   :  { %v1155_v19 = vpop.f32.mrf.mxu3 }
 0x224   :  { %1360 = vmatpush.bf16.msra.mxu2 %v3782_v56  ;;  %v1079_v49 = vpop.f32.mrf.mxu1  ;;  %v1118_v0 = vpop.f32.mrf.mxu0 }
 0x225   :  { %1424 = vmatpush.bf16.msrb.mxu3 %v3794_v7  ;;  %v3796_v49 = vld [vmem:[#allocation53_spill] sm:$0xff]  ;;  %v3797_v0 = vld [vmem:[#allocation56_spill] sm:$0xff] }
 0x226   :  { %1386 = vmatpush.bf16.msrb.mxu0 %v3796_v49 }
 0x228   :  { %1361 = vmatpush.bf16.msra.mxu2 %v3785_v23 }
 0x229   :  { %1425 = vmatpush.bf16.msrb.mxu3 %v3797_v0 }
 0x22b   :  { %v1157_v58 = vpop.f32.mrf.mxu3 }
 0x22c   :  { %1362 = vmatpush.bf16.msra.mxu2 %v3786_v59 }
 0x230   :  { %1363 = vmatpush.bf16.msra.mxu2 %v3787_v36 }
 0x234   :  { %1364 = vmatpush.bf16.msra.mxu2 %v3788_v39  ;;  %v1275_v39 = vld [vmem:[%s3421_s0 + $0x38] sm:$0xff] }
 0x235   :  { %1499 = vst [vmem:[%s3423_s3 + $0x8] sm:$0xff] %v1275_v39 }
 0x253   :  { %v1129_v61 = vpop.f32.mrf.mxu1 }
 0x254   :  { %v1130_v8 = vadd.f32 %v1129_v61, %v1117_v45  ;;  %v1168_v11 = vpop.f32.mrf.mxu0  ;;  %v3365_v61 = vpack.c.bf16 %v1275_v39, %v1275_v39 }
 0x256   :  { %v1900_v40 = vmul.f32 -1.442695, %v1130_v8  ;;  %1300 = vmatmul.bf16.vlgmr.msrb.gmra.mxu1 %v3365_v61  ;;  %1339 = vmatmul.bf16.vlgmr.msra.gmra.mxu0 %v3365_v61 }
 0x257   :  { %1378 = vmatmul.bf16.vlgmr.msra.gmra.mxu3 %v3365_v61  ;;  %1396 = vmatpush.bf16.msrb.mxu1 %v3802_v21 }
 0x258   :  { %2034 = vpow2.f32 %v1900_v40 }
 0x259   :  { %v1090_v20 = vpop.f32.mrf.mxu2 }
 0x25a   :  { %v1091_v1 = vadd.f32 %v1090_v20, %v1078_v55  ;;  %v3341_v10 = vpop.f32.mrf.mxu3 }
 0x25b   :  { %v1131_v26 = vpop.f32.mrf.mxu1  ;;  %1397 = vmatpush.bf16.msrb.mxu1 %v3741_v6 }
 0x25c   :  { %v1899_v51 = vmul.f32 -1.442695, %v1091_v1  ;;  %v1170_v18 = vpop.f32.mrf.mxu0 }
 0x25e   :  { %v2035_v30 = vpop.eup %2034  ;;  %2036 = vpow2.f32 %v1899_v51  ;;  %v3798_v51 = vld [vmem:[#allocation57_spill] sm:$0xff] }
 0x25f   :  { %v1233_v53 = vadd.f32 1.0, %v2035_v30  ;;  %1387 = vmatpush.bf16.msrb.mxu0 %v3798_v51  ;;  %1398 = vmatpush.bf16.msrb.mxu1 %v3744_v52 }
 0x261   :  { %2038 = vrcp.f32 %v1233_v53  ;;  %v1092_v12 = vpop.f32.mrf.mxu2  ;;  %vm1239_vm9 = vweird.f32 %v1233_v53  ;;  %v1243_v1 = vand.u32 2147483647, %v1233_v53 }
 0x262   :  { %v1209_v16 = vpop.f32.mrf.mxu3 }
 0x263   :  { %v1181_v25 = vpop.f32.mrf.mxu1  ;;  %vm1244_vm12 = vcmp.eq.f32.partialorder %v1243_v1, 8.507059e+37  ;;  %1388 = vmatpush.bf16.msrb.mxu0 %v3739_v27  ;;  %1399 = vmatpush.bf16.msrb.mxu1 %v3679_v54 }
 0x264   :  { %v2037_v29 = vpop.eup %2036  ;;  %v1182_v7 = vadd.f32 %v1181_v25, %v3742_v4 }
 0x265   :  { %v1214_v50 = vadd.f32 1.0, %v2037_v29 }
 0x267   :  { %v2039_v56 = vpop.eup %2038  ;;  %2040 = vrcp.f32 %v1214_v50  ;;  %v1226_v32 = vand.u32 2147483648, %v1214_v50  ;;  %v1224_v12 = vand.u32 2147483647, %v1214_v50  ;;  %vm1220_vm13 = vweird.f32 %v1214_v50  ;;  %1389 = vmatpush.bf16.msrb.mxu0 %v3743_v28  ;;  %1400 = vmatpush.bf16.msrb.mxu1 %v3680_v46 }
 0x268   :  { %v1235_v5 = vmul.f32 %v2039_v56, %v1233_v53  ;;  %vm1240_vm8 = vweird.f32 %v2039_v56 }
 0x269   :  { %v1142_v23 = vpop.f32.mrf.mxu2  ;;  %vm3374_vm10 = vmor %vm1239_vm9, %vm1240_vm8  ;;  %v1227_v38 = vor.u32 1.1754944e-38, %v1226_v32  ;;  %vm1225_vm15 = vcmp.eq.f32.partialorder %v1224_v12, 8.507059e+37 }
 0x26a   :  { %v1236_v33 = vsub.f32 1.0, %v1235_v5  ;;  %v1143_v55 = vadd.f32 %v1142_v23, %v3795_v35 }
 0x26b   :  { %v1183_v45 = vpop.f32.mrf.mxu1  ;;  %1390 = vmatpush.bf16.msrb.mxu0 %v2959_v15  ;;  %1401 = vmatpush.bf16.msrb.mxu1 %v3683_v47 }
 0x26c   :  { %v1237_v59 = vmul.f32 %v2039_v56, %v1236_v33  ;;  %v1156_v36 = vadd.f32 %v1155_v19, %v1143_v55  ;;  %v1245_v19 = vand.u32 2147483648, %v1233_v53 }
 0x26d   :  { %v2041_v58 = vpop.eup %2040 }
 0x26e   :  { %v1238_v8 = vadd.f32 %v2039_v56, %v1237_v59  ;;  %v1216_v40 = vmul.f32 %v2041_v58, %v1214_v50  ;;  %v1169_v20 = vadd.f32 %v1168_v11, %v1156_v36  ;;  %v3801_v11 = vld [vmem:[#allocation60_spill] sm:$0xff]  ;;  %vm1221_vm11 = vweird.f32 %v2041_v58 }
 0x26f   :  { %1426 = vmatpush.bf16.msrb.mxu3 %v3801_v11  ;;  %v1246_v16 = vor.u32 1.1754944e-38, %v1245_v19  ;;  %vm1222_vm14 = vmor %vm1220_vm13, %vm1221_vm11  ;;  %1402 = vmatpush.bf16.msrb.mxu1 %v2927_v37 }
 0x270   :  { %v1217_v26 = vsub.f32 1.0, %v1216_v40  ;;  %2042 = vtanh.f32 %v1169_v20  ;;  %v1242_v3 = vsel %vm3374_vm10, %v2039_v56, %v1238_v8 }
 0x271   :  { %v1144_v30 = vpop.f32.mrf.mxu2  ;;  %v1247_v44 = vsel %vm1244_vm12, %v1246_v16, %v1242_v3 }
 0x272   :  { %v1218_v53 = vmul.f32 %v2041_v58, %v1217_v26  ;;  %v1269_v23 = vmul.f32 %v1247_v44, %v3253_v22 }
 0x273   :  { %1427 = vmatpush.bf16.msrb.mxu3 %v3740_v31  ;;  %1403 = vmatpush.bf16.msrb.mxu1 %v2963_v63 }
 0x274   :  { %v1219_v29 = vadd.f32 %v2041_v58, %v1218_v53 }
 0x276   :  { %v2043_v5 = vpop.eup %2042  ;;  %v1223_v24 = vsel %vm1222_vm14, %v2041_v58, %v1219_v29 }
 0x277   :  { %v1228_v56 = vsel %vm1225_vm15, %v1227_v38, %v1223_v24  ;;  %1428 = vmatpush.bf16.msrb.mxu3 %v2941_v41 }
 0x278   :  { %v1270_v33 = vmul.f32 %v2043_v5, %v1228_v56 }
 0x27a   :  { %v3390_v27 = vadd.f32 %v1270_v33, %v1269_v23  ;;  %v1194_v31 = vpop.f32.mrf.mxu2 }
 0x27b   :  { %v1195_v50 = vadd.f32 %v1194_v31, %v1182_v7  ;;  %1429 = vmatpush.bf16.msrb.mxu3 %v2968_v13 }
 0x27d   :  { %v1208_v6 = vadd.f32 %v3341_v10, %v1195_v50 }
 0x27f   :  { %v1901_v22 = vmul.f32 -1.442695, %v1208_v6 }
 0x281   :  { %2044 = vpow2.f32 %v1901_v22 }
 0x282   :  { %v1196_v28 = vpop.f32.mrf.mxu2 }
 0x287   :  { %v2045_v41 = vpop.eup %2044 }
 0x288   :  { %v1253_v52 = vadd.f32 1.0, %v2045_v41 }
 0x28a   :  { %2046 = vrcp.f32 %v1253_v52  ;;  %v1265_v13 = vand.u32 2147483648, %v1253_v52  ;;  %v1263_v55 = vand.u32 2147483647, %v1253_v52  ;;  %vm1259_vm1 = vweird.f32 %v1253_v52 }
 0x28b   :  { %2048 = vtanh.f32 %v3390_v27  ;;  %v1288_v63 = vpop.f32.mrf.mxu0 }
 0x28c   :  { %v1266_v47 = vor.u32 1.1754944e-38, %v1265_v13  ;;  %vm1264_vm3 = vcmp.eq.f32.partialorder %v1263_v55, 8.507059e+37 }
 0x290   :  { %v2047_v15 = vpop.eup %2046 }
 0x291   :  { %v1255_v10 = vmul.f32 %v2047_v15, %v1253_v52  ;;  %vm1260_vm0 = vweird.f32 %v2047_v15  ;;  %v2049_v59 = vpop.eup %2048 }
 0x292   :  { %vm1261_vm2 = vmor %vm1259_vm1, %vm1260_vm0 }
 0x293   :  { %v1256_v25 = vsub.f32 1.0, %v1255_v10 }
 0x295   :  { %v1257_v54 = vmul.f32 %v2047_v15, %v1256_v25 }
 0x297   :  { %v1258_v46 = vadd.f32 %v2047_v15, %v1257_v54 }
 0x299   :  { %v1262_v45 = vsel %vm1261_vm2, %v2047_v15, %v1258_v46 }
 0x29a   :  { %v1267_v37 = vsel %vm1264_vm3, %v1266_v47, %v1262_v45 }
 0x29b   :  { %v1273_v36 = vmul.f32 %v2049_v59, %v1267_v37 }
 0x29d   :  { %v1278_v49 = vpack.c.bf16 %v1273_v36, %v1273_v36 }
 0x29f   :  { %1313 = vmatmul.bf16.vlgmr.msrb.gmra.mxu2 %v1278_v49  ;;  %1352 = vmatmul.bf16.vlgmr.msra.gmra.mxu1 %v1278_v49 }
 0x2a0   :  { %1391 = vmatmul.bf16.vlgmr.msrb.gmra.mxu0 %v1278_v49  ;;  %1430 = vmatmul.bf16.vlgmr.msrb.gmra.mxu3 %v1278_v49 }
 0x2a1   :  { %1409 = vmatpush.bf16.msrb.mxu2 %v3684_v9  ;;  %v1327_v9 = vpop.f32.mrf.mxu3 }
 0x2a5   :  { %1410 = vmatpush.bf16.msrb.mxu2 %v3685_v34  ;;  %v1290_v34 = vpop.f32.mrf.mxu0 }
 0x2a9   :  { %1411 = vmatpush.bf16.msrb.mxu2 %v3686_v60  ;;  %v1289_v60 = vadd.f32 %v1288_v63, %v3783_v62  ;;  %v1329_v0 = vpop.f32.mrf.mxu3 }
 0x2ad   :  { %1412 = vmatpush.bf16.msrb.mxu2 %v3687_v42  ;;  %v1328_v42 = vadd.f32 %v1327_v9, %v3784_v14 }
 0x2af   :  { %1365 = vmatmul.bf16.vlgmr.msra.gmra.mxu2 %v3346_v57  ;;  %1404 = vmatmul.bf16.vlgmr.msrb.gmra.mxu1 %v3346_v57 }
 0x2b1   :  { %1413 = vmatpush.bf16.msrb.mxu2 %v3746_v17 }
 0x2b5   :  { %1414 = vmatpush.bf16.msrb.mxu2 %v3750_v43 }
 0x2b9   :  { %1415 = vmatpush.bf16.msrb.mxu2 %v3754_v2 }
 0x2bd   :  { %1416 = vmatpush.bf16.msrb.mxu2 %v3758_v48 }
 0x2c0   :  { %1417 = vmatmul.bf16.vlgmr.msrb.gmra.mxu2 %v3365_v61 }
 0x2d3   :  { %v1301_v39 = vpop.f32.mrf.mxu1  ;;  %v1340_v57 = vpop.f32.mrf.mxu0 }
 0x2d4   :  { %v1302_v58 = vadd.f32 %v1301_v39, %v1289_v60  ;;  %v1341_v17 = vadd.f32 %v1340_v57, %v1328_v42 }
 0x2da   :  { %v1379_v8 = vpop.f32.mrf.mxu3 }
 0x2db   :  { %v1303_v43 = vpop.f32.mrf.mxu1  ;;  %v1342_v40 = vpop.f32.mrf.mxu0 }
 0x2e2   :  { %v1381_v2 = vpop.f32.mrf.mxu3 }
 0x31c   :  { %v1353_v20 = vpop.f32.mrf.mxu1 }
 0x31d   :  { %v1354_v48 = vadd.f32 %v1353_v20, %v1341_v17  ;;  %v1392_v19 = vpop.f32.mrf.mxu0 }
 0x31f   :  { %v1903_v61 = vmul.f32 -1.442695, %v1354_v48 }
 0x321   :  { %2050 = vpow2.f32 %v1903_v61 }
 0x322   :  { %v1314_v1 = vpop.f32.mrf.mxu2 }
 0x323   :  { %v1315_v26 = vadd.f32 %v1314_v1, %v1302_v58  ;;  %v1431_v51 = vpop.f32.mrf.mxu3 }
 0x324   :  { %v1355_v62 = vpop.f32.mrf.mxu1 }
 0x325   :  { %v1902_v18 = vmul.f32 -1.442695, %v1315_v26  ;;  %v1394_v14 = vpop.f32.mrf.mxu0 }
 0x327   :  { %v2051_v32 = vpop.eup %2050  ;;  %2052 = vpow2.f32 %v1902_v18 }
 0x328   :  { %v1457_v30 = vadd.f32 1.0, %v2051_v32 }
 0x32a   :  { %2054 = vrcp.f32 %v1457_v30  ;;  %v1316_v11 = vpop.f32.mrf.mxu2  ;;  %v1469_v6 = vand.u32 2147483648, %v1457_v30  ;;  %vm1463_vm5 = vweird.f32 %v1457_v30  ;;  %v1467_v22 = vand.u32 2147483647, %v1457_v30 }
 0x32b   :  { %v1433_v21 = vpop.f32.mrf.mxu3 }
 0x32c   :  { %v1405_v3 = vpop.f32.mrf.mxu1  ;;  %v1470_v25 = vor.u32 1.1754944e-38, %v1469_v6  ;;  %vm1468_vm8 = vcmp.eq.f32.partialorder %v1467_v22, 8.507059e+37 }
 0x32d   :  { %v2053_v53 = vpop.eup %2052  ;;  %v1406_v59 = vadd.f32 %v1405_v3, %v3742_v4 }
 0x32e   :  { %v1438_v12 = vadd.f32 1.0, %v2053_v53 }
 0x330   :  { %v2055_v16 = vpop.eup %2054  ;;  %2056 = vrcp.f32 %v1438_v12  ;;  %v1450_v41 = vand.u32 2147483648, %v1438_v12  ;;  %vm1444_vm9 = vweird.f32 %v1438_v12 }
 0x331   :  { %v1459_v29 = vmul.f32 %v2055_v16, %v1457_v30  ;;  %vm1464_vm4 = vweird.f32 %v2055_v16 }
 0x332   :  { %v1366_v38 = vpop.f32.mrf.mxu2  ;;  %vm1465_vm6 = vmor %vm1463_vm5, %vm1464_vm4  ;;  %v1451_v54 = vor.u32 1.1754944e-38, %v1450_v41 }
 0x333   :  { %v1460_v44 = vsub.f32 1.0, %v1459_v29  ;;  %v1367_v5 = vadd.f32 %v1366_v38, %v3795_v35  ;;  %v1448_v35 = vand.u32 2147483647, %v1438_v12 }
 0x334   :  { %v1407_v24 = vpop.f32.mrf.mxu1 }
 0x335   :  { %v1461_v56 = vmul.f32 %v2055_v16, %v1460_v44  ;;  %v1380_v7 = vadd.f32 %v1379_v8, %v1367_v5  ;;  %vm1449_vm11 = vcmp.eq.f32.partialorder %v1448_v35, 8.507059e+37 }
 0x336   :  { %v2057_v23 = vpop.eup %2056 }
 0x337   :  { %v1462_v33 = vadd.f32 %v2055_v16, %v1461_v56  ;;  %v1440_v31 = vmul.f32 %v2057_v23, %v1438_v12  ;;  %v1393_v50 = vadd.f32 %v1392_v19, %v1380_v7  ;;  %vm1445_vm7 = vweird.f32 %v2057_v23 }
 0x338   :  { %vm1446_vm10 = vmor %vm1444_vm9, %vm1445_vm7 }
 0x339   :  { %v1441_v28 = vsub.f32 1.0, %v1440_v31  ;;  %2058 = vtanh.f32 %v1393_v50  ;;  %v1466_v15 = vsel %vm1465_vm6, %v2055_v16, %v1462_v33 }
 0x33a   :  { %v1368_v52 = vpop.f32.mrf.mxu2  ;;  %v1471_v55 = vsel %vm1468_vm8, %v1470_v25, %v1466_v15 }
 0x33b   :  { %v1442_v10 = vmul.f32 %v2057_v23, %v1441_v28  ;;  %v1493_v37 = vmul.f32 %v1471_v55, %v3390_v27 }
 0x33d   :  { %v1443_v13 = vadd.f32 %v2057_v23, %v1442_v10 }
 0x33f   :  { %v2059_v46 = vpop.eup %2058  ;;  %v1447_v47 = vsel %vm1446_vm10, %v2057_v23, %v1443_v13 }
 0x340   :  { %v1452_v45 = vsel %vm1449_vm11, %v1451_v54, %v1447_v47 }
 0x341   :  { %v1494_v36 = vmul.f32 %v2059_v46, %v1452_v45 }
 0x343   :  { %v1495_v49 = vadd.f32 %v1494_v36, %v1493_v37  ;;  %v1418_v63 = vpop.f32.mrf.mxu2 }
 0x344   :  { %v1419_v9 = vadd.f32 %v1418_v63, %v1406_v59 }
 0x346   :  { %v1432_v34 = vadd.f32 %v1431_v51, %v1419_v9 }
 0x348   :  { %v1904_v60 = vmul.f32 -1.442695, %v1432_v34 }
 0x34a   :  { %2060 = vpow2.f32 %v1904_v60 }
 0x34b   :  { %v1420_v42 = vpop.f32.mrf.mxu2 }
 0x350   :  { %v2061_v0 = vpop.eup %2060 }
 0x351   :  { %v1477_v39 = vadd.f32 1.0, %v2061_v0 }
 0x353   :  { %2062 = vrcp.f32 %v1477_v39  ;;  %v1489_v8 = vand.u32 2147483648, %v1477_v39  ;;  %v1487_v4 = vand.u32 2147483647, %v1477_v39  ;;  %vm1483_vm13 = vweird.f32 %v1477_v39 }
 0x354   :  { %2064 = vtanh.f32 %v1495_v49 }
 0x355   :  { %v1490_v40 = vor.u32 1.1754944e-38, %v1489_v8  ;;  %vm1488_vm15 = vcmp.eq.f32.partialorder %v1487_v4, 8.507059e+37 }
 0x359   :  { %v2063_v57 = vpop.eup %2062 }
 0x35a   :  { %v1479_v58 = vmul.f32 %v2063_v57, %v1477_v39  ;;  %vm1484_vm12 = vweird.f32 %v2063_v57  ;;  %v2065_v20 = vpop.eup %2064 }
 0x35b   :  { %vm1485_vm14 = vmor %vm1483_vm13, %vm1484_vm12 }
 0x35c   :  { %v1480_v17 = vsub.f32 1.0, %v1479_v58 }
 0x35e   :  { %v1481_v43 = vmul.f32 %v2063_v57, %v1480_v17 }
 0x360   :  { %v1482_v27 = vadd.f32 %v2063_v57, %v1481_v43 }
 0x362   :  { %v1486_v2 = vsel %vm1485_vm14, %v2063_v57, %v1482_v27 }
 0x363   :  { %v1491_v48 = vsel %vm1488_vm15, %v1490_v40, %v1486_v2 }
 0x364   :  { %v1497_v19 = vmul.f32 %v2065_v20, %v1491_v48 }
 0x366   :  { %1500 = vst [vmem:[%s3424_s4] sm:$0xff] %v1497_v19 }

</bundles_post_ra>
